<compile_context>
chip_gen: v7x
topology: tpu7x:2x2x1
jax: 0.10.0
libtpu: 0.0.40
codegen_flags: <defaults>
</compile_context>

<pallas_src>
import jax
import jax.numpy as jnp
from jax.experimental import pallas as pl
from jax.experimental.pallas import tpu as pltpu

NUM_CLASSES = 4
NUM_ANCHORS = (4, 6, 6, 6, 6, 4, 4)           # from FPNSSD512CUBE.__init__
FM_SIZES = (8, 4, 2, 1, 1, 1, 1)              # small synthetic FPN pyramid sizes
NUM_LEVELS = len(FM_SIZES)
CIN = 256
COUT = 48                                      # max per-level loc+cls channels (6*4 + 6*4)


def _round_up(x, m):
    return (x + m - 1) // m * m


# ---- packed-input-slab layout (rows of the (N, IN_ROWS, 256) bf16 slab) -----
# For fm > 1: the level section holds, for dw in {0,1,2}, the width-shifted copy
#   S_dw[r*fm + w, :] = zero_padded_level[r, w + dw, :],  r in [0, fm+2), w in [0, fm)
# so the tap (dh, dw) im2col matrix is the contiguous row range
#   [section_off + dw*(fm+2)*fm + dh*fm,  +fm*fm).
# For fm == 1: only the raw 1x1 feature (center tap) is stored.
_in_offsets, _off = [], 0
for _fm in FM_SIZES:
    _in_offsets.append(_off)
    _sec = 3 * (_fm + 2) * _fm if _fm > 1 else 1
    _off += _round_up(_sec, 8)
IN_OFFSETS = tuple(_in_offsets)                # (0, 240, 312, 336, 344, 352, 360)
IN_ROWS = _round_up(_off, 8)                   # 368

# ---- output-slab layout (rows of the (N, OUT_ROWS, 48) f32 slab) ------------
_out_offsets, _o = [], 0
for _fm in FM_SIZES:
    _out_offsets.append(_o)
    _o += _round_up(_fm * _fm, 8)
OUT_OFFSETS = tuple(_out_offsets)              # (0, 64, 80, 88, 96, 104, 112)
OUT_ROWS = _o                                  # 120


# ---------------------------------------------------------------------------
# Fused Pallas kernel: all 7 level heads (loc+cls) for one batch element.
# ---------------------------------------------------------------------------
def fused_head_kernel(x_ref, w_ref, b_ref, out_ref):
    # x_ref  : (1, IN_ROWS, 256)  bf16  packed, pre-padded, width-shifted features
    # w_ref  : (7, 9, 256, 48)    bf16  per-level per-tap weights (loc||cls, padded to 48)
    # b_ref  : (7, 1, 48)         f32   per-level biases (padded to 48)
    # out_ref: (1, OUT_ROWS, 48)  f32   output slab (levels stacked on rows)
    for lvl, fm in enumerate(FM_SIZES):
        in_off = IN_OFFSETS[lvl]
        out_off = OUT_OFFSETS[lvl]
        if fm == 1:
            # 1x1 feature map with padding=1: only the center tap (dh=dw=1) is nonzero.
            lhs = x_ref[0, in_off:in_off + 1, :]                     # (1, 256)
            y = jnp.dot(lhs, w_ref[lvl, 4],
                        preferred_element_type=jnp.float32)          # (1, 48)
            out_ref[0, out_off:out_off + 1, :] = y + b_ref[lvl]
        else:
            p = fm + 2
            m = fm * fm
            acc = jnp.zeros((m, COUT), jnp.float32)
            # 9 accumulated K=256 matmuls; each tap is a contiguous 2-D row slice.
            for dh in range(3):
                for dw in range(3):
                    start = in_off + dw * p * fm + dh * fm
                    lhs = x_ref[0, start:start + m, :]               # (m, 256)
                    acc = acc + jnp.dot(lhs, w_ref[lvl, dh * 3 + dw],
                                        preferred_element_type=jnp.float32)
            out_ref[0, out_off:out_off + m, :] = acc + b_ref[lvl]


def fused_conv_heads(x_slab, w_packed, b_packed):
    """x_slab: (N, IN_ROWS, 256) bf16. Returns (N, OUT_ROWS, 48) f32."""
    n = x_slab.shape[0]

    flops = 0
    for fm in FM_SIZES:
        taps = 9 if fm > 1 else 1
        flops += 2 * fm * fm * taps * CIN * COUT
    flops *= n
    bytes_accessed = (x_slab.size * 2 + w_packed.size * 2 + b_packed.size * 4
                      + n * OUT_ROWS * COUT * 4)

    return pl.pallas_call(
        fused_head_kernel,
        out_shape=jax.ShapeDtypeStruct((n, OUT_ROWS, COUT), jnp.float32),
        grid=(n,),
        in_specs=[
            pl.BlockSpec((1, IN_ROWS, CIN), lambda i: (i, 0, 0)),
            # Grid-invariant weights/biases: constant index_map => fetched once.
            pl.BlockSpec((NUM_LEVELS, 9, CIN, COUT), lambda i: (0, 0, 0, 0)),
            pl.BlockSpec((NUM_LEVELS, 1, COUT), lambda i: (0, 0, 0)),
        ],
        out_specs=pl.BlockSpec((1, OUT_ROWS, COUT), lambda i: (i, 0, 0)),
        compiler_params=pltpu.CompilerParams(
            dimension_semantics=("parallel",)),
        cost_estimate=pl.CostEstimate(
            flops=int(flops), transcendentals=0,
            bytes_accessed=int(bytes_accessed)),
    )(x_slab, w_packed, b_packed)


# ---------------------------------------------------------------------------
# Wrapper-side packing: zero halo + width-shift copies, all plain JAX/XLA.
# ---------------------------------------------------------------------------
def pack_features(feats):
    """feats: list of 7 (N, fm, fm, 256) arrays. Returns (N, IN_ROWS, 256) bf16."""
    n = feats[0].shape[0]
    slab = jnp.zeros((n, IN_ROWS, CIN), jnp.bfloat16)
    for lvl, fm in enumerate(FM_SIZES):
        x = feats[lvl].astype(jnp.bfloat16)
        off = IN_OFFSETS[lvl]
        if fm == 1:
            slab = slab.at[:, off:off + 1, :].set(x.reshape(n, 1, CIN))
        else:
            p = fm + 2
            xp = jnp.pad(x, ((0, 0), (1, 1), (1, 1), (0, 0)))        # zero halo
            sec = jnp.concatenate(
                [xp[:, :, dw:dw + fm, :].reshape(n, p * fm, CIN) for dw in range(3)],
                axis=1)                                              # (n, 3*p*fm, 256)
            slab = slab.at[:, off:off + sec.shape[1], :].set(sec)
    return slab


# ---------------------------------------------------------------------------
# Deterministic parameter init (shapes dictated by FPNSSD512CUBE.__init__).
# ---------------------------------------------------------------------------
def init_params(key):
    w_levels, b_levels, proj_ws = [], [], []
    for i in range(NUM_LEVELS):
        a = NUM_ANCHORS[i]
        cout_loc, cout_cls = a * 4, a * NUM_CLASSES
        cout = cout_loc + cout_cls
        k_wl, k_wc, k_b, k_p, key = jax.random.split(key, 5)
        # HWIO weights (3, 3, CIN, cout); loc and cls heads concatenated on Cout.
        w_loc = 0.05 * jax.random.normal(k_wl, (3, 3, CIN, cout_loc), jnp.float32)
        w_cls = 0.05 * jax.random.normal(k_wc, (3, 3, CIN, cout_cls), jnp.float32)
        w = jnp.concatenate([w_loc, w_cls], axis=-1)
        # Pad Cout only up to 48 (max real channels), tap index = dh*3 + dw.
        w = jnp.pad(w, ((0, 0), (0, 0), (0, 0), (0, COUT - cout)))
        w_levels.append(w.reshape(9, CIN, COUT).astype(jnp.bfloat16))
        b = 0.01 * jax.random.normal(k_b, (cout,), jnp.float32)
        b_levels.append(jnp.pad(b, (0, COUT - cout)).reshape(1, COUT))
        proj_ws.append(0.1 * jax.random.normal(k_p, (3, CIN), jnp.float32))

    params = {
        "w_packed": jnp.stack(w_levels, axis=0),   # (7, 9, 256, 48) bf16
        "b_packed": jnp.stack(b_levels, axis=0),   # (7, 1, 48) f32
        "extractor_proj": proj_ws,
    }
    # TODO(synk): SphPriorBox is an external module not given in the source;
    # priors are a deterministic stub with the correct shape.
    n_priors = sum(f * f * a for f, a in zip(FM_SIZES, NUM_ANCHORS))
    k_pr, _ = jax.random.split(key)
    params["priors"] = jax.random.uniform(k_pr, (n_priors, 4), jnp.float32)
    return params


# TODO(synk): FPN50 (ResNet-50 FPN backbone) is an external module not defined
# in the source; replaced by a deterministic pool + projection stub producing
# 7 feature maps of 256 channels (plain-JAX glue, not part of the kernel).
def extractor_stub(x_nchw, proj_ws):
    n, c, himg, wimg = x_nchw.shape
    feats = []
    for i, fm in enumerate(FM_SIZES):
        pooled = x_nchw.reshape(n, c, fm, himg // fm, fm, wimg // fm).mean(axis=(3, 5))
        pooled = jnp.transpose(pooled, (0, 2, 3, 1))          # NHWC (N, fm, fm, 3)
        feats.append(jnp.maximum(pooled @ proj_ws[i], 0.0))   # (N, fm, fm, 256)
    return feats


# ---------------------------------------------------------------------------
# Forward pass (matches FPNSSD512CUBE.forward semantics).
# ---------------------------------------------------------------------------
def fpnssd_forward(x_nchw, params):
    n = x_nchw.shape[0]
    xs = extractor_stub(x_nchw, params["extractor_proj"])
    slab = pack_features(xs)
    out = fused_conv_heads(slab, params["w_packed"], params["b_packed"])

    loc_preds, cls_preds = [], []
    for lvl, (fm, a) in enumerate(zip(FM_SIZES, NUM_ANCHORS)):
        n_pos = fm * fm
        off = OUT_OFFSETS[lvl]
        blk = out[:, off:off + n_pos, :]                               # (N, n_pos, 48)
        loc_preds.append(blk[:, :, :a * 4].reshape(n, n_pos * a, 4))
        cls_preds.append(blk[:, :, a * 4:a * 4 + a * NUM_CLASSES]
                         .reshape(n, n_pos * a, NUM_CLASSES))
    loc_preds = jnp.concatenate(loc_preds, axis=1)
    cls_preds = jnp.concatenate(cls_preds, axis=1)
    return loc_preds, cls_preds, params["priors"]


if __name__ == "__main__":
    key = jax.random.PRNGKey(0)
    k_x, k_p = jax.random.split(key)
    x = jax.random.normal(k_x, (2, 3, 64, 64), jnp.float32)   # NCHW image input
    params = init_params(k_p)

    fwd = jax.jit(fpnssd_forward)
    loc_preds, cls_preds, priors = fwd(x, params)
    jax.block_until_ready((loc_preds, cls_preds, priors))

    n_priors = sum(f * f * a for f, a in zip(FM_SIZES, NUM_ANCHORS))
    assert loc_preds.shape == (2, n_priors, 4)
    assert cls_preds.shape == (2, n_priors, NUM_CLASSES)
    assert priors.shape == (n_priors, 4)
    print("KERNEL_OK")
</pallas_src>

<mosaic_0001>
module attributes {stable_mosaic.version = 11 : i64} {
  func.func @fused_head_kernel(%arg0: i32, %arg1: memref<1x368x256xbf16, #tpu.memory_space<vmem>>, %arg2: memref<7x9x256x48xbf16, #tpu.memory_space<vmem>>, %arg3: memref<7x1x48xf32, #tpu.memory_space<vmem>>, %arg4: memref<1x120x48xf32, #tpu.memory_space<vmem>>) attributes {dimension_semantics = [#tpu.dimension_semantics<parallel>], iteration_bounds = array<i64: 2>, scalar_prefetch = 0 : i64, scratch_operands = 0 : i64, tpu.core_type = #tpu.core_type<tc>, window_params = [{transform_indices = @transform_0, window_bounds = array<i64: 1, 368, 256>}, {pipeline_mode = #tpu.pipeline_mode<synchronous>, transform_indices = @transform_1, window_bounds = array<i64: 7, 9, 256, 48>}, {pipeline_mode = #tpu.pipeline_mode<synchronous>, transform_indices = @transform_2, window_bounds = array<i64: 7, 1, 48>}, {transform_indices = @transform_3, window_bounds = array<i64: 1, 120, 48>}]} {
    %cst = arith.constant 0.000000e+00 : f32
    %0 = vector.broadcast %cst : f32 to vector<64x48xf32>
    %c0 = arith.constant 0 : index
    %c0_0 = arith.constant 0 : index
    %c0_1 = arith.constant 0 : index
    %1 = vector.load %arg1[%c0, %c0_0, %c0_1] : memref<1x368x256xbf16, #tpu.memory_space<vmem>>, vector<1x64x256xbf16>
    %2 = vector.shape_cast %1 : vector<1x64x256xbf16> to vector<64x256xbf16>
    %c0_2 = arith.constant 0 : index
    %c0_3 = arith.constant 0 : index
    %c0_4 = arith.constant 0 : index
    %c0_5 = arith.constant 0 : index
    %3 = vector.load %arg2[%c0_2, %c0_3, %c0_4, %c0_5] : memref<7x9x256x48xbf16, #tpu.memory_space<vmem>>, vector<1x1x256x48xbf16>
    %4 = vector.shape_cast %3 : vector<1x1x256x48xbf16> to vector<256x48xbf16>
    %cst_6 = arith.constant dense<0.000000e+00> : vector<64x48xf32>
    %5 = tpu.matmul %2, %4, %cst_6 {dimension_numbers = #tpu.dot_dimension_numbers<[1], [0], [0], [1], [0, 0, 1, 1], [], []>} : vector<64x256xbf16>, vector<256x48xbf16>, vector<64x48xf32> -> vector<64x48xf32>
    %6 = arith.addf %0, %5 : vector<64x48xf32>
    %c0_7 = arith.constant 0 : index
    %c80 = arith.constant 80 : index
    %c0_8 = arith.constant 0 : index
    %7 = vector.load %arg1[%c0_7, %c80, %c0_8] : memref<1x368x256xbf16, #tpu.memory_space<vmem>>, vector<1x64x256xbf16>
    %8 = vector.shape_cast %7 : vector<1x64x256xbf16> to vector<64x256xbf16>
    %c0_9 = arith.constant 0 : index
    %c1 = arith.constant 1 : index
    %c0_10 = arith.constant 0 : index
    %c0_11 = arith.constant 0 : index
    %9 = vector.load %arg2[%c0_9, %c1, %c0_10, %c0_11] : memref<7x9x256x48xbf16, #tpu.memory_space<vmem>>, vector<1x1x256x48xbf16>
    %10 = vector.shape_cast %9 : vector<1x1x256x48xbf16> to vector<256x48xbf16>
    %cst_12 = arith.constant dense<0.000000e+00> : vector<64x48xf32>
    %11 = tpu.matmul %8, %10, %cst_12 {dimension_numbers = #tpu.dot_dimension_numbers<[1], [0], [0], [1], [0, 0, 1, 1], [], []>} : vector<64x256xbf16>, vector<256x48xbf16>, vector<64x48xf32> -> vector<64x48xf32>
    %12 = arith.addf %6, %11 : vector<64x48xf32>
    %c0_13 = arith.constant 0 : index
    %c160 = arith.constant 160 : index
    %c0_14 = arith.constant 0 : index
    %13 = vector.load %arg1[%c0_13, %c160, %c0_14] : memref<1x368x256xbf16, #tpu.memory_space<vmem>>, vector<1x64x256xbf16>
    %14 = vector.shape_cast %13 : vector<1x64x256xbf16> to vector<64x256xbf16>
    %c0_15 = arith.constant 0 : index
    %c2 = arith.constant 2 : index
    %c0_16 = arith.constant 0 : index
    %c0_17 = arith.constant 0 : index
    %15 = vector.load %arg2[%c0_15, %c2, %c0_16, %c0_17] : memref<7x9x256x48xbf16, #tpu.memory_space<vmem>>, vector<1x1x256x48xbf16>
    %16 = vector.shape_cast %15 : vector<1x1x256x48xbf16> to vector<256x48xbf16>
    %cst_18 = arith.constant dense<0.000000e+00> : vector<64x48xf32>
    %17 = tpu.matmul %14, %16, %cst_18 {dimension_numbers = #tpu.dot_dimension_numbers<[1], [0], [0], [1], [0, 0, 1, 1], [], []>} : vector<64x256xbf16>, vector<256x48xbf16>, vector<64x48xf32> -> vector<64x48xf32>
    %18 = arith.addf %12, %17 : vector<64x48xf32>
    %c0_19 = arith.constant 0 : index
    %c8 = arith.constant 8 : index
    %c0_20 = arith.constant 0 : index
    %19 = vector.load %arg1[%c0_19, %c8, %c0_20] : memref<1x368x256xbf16, #tpu.memory_space<vmem>>, vector<1x64x256xbf16>
    %20 = vector.shape_cast %19 : vector<1x64x256xbf16> to vector<64x256xbf16>
    %c0_21 = arith.constant 0 : index
    %c3 = arith.constant 3 : index
    %c0_22 = arith.constant 0 : index
    %c0_23 = arith.constant 0 : index
    %21 = vector.load %arg2[%c0_21, %c3, %c0_22, %c0_23] : memref<7x9x256x48xbf16, #tpu.memory_space<vmem>>, vector<1x1x256x48xbf16>
    %22 = vector.shape_cast %21 : vector<1x1x256x48xbf16> to vector<256x48xbf16>
    %cst_24 = arith.constant dense<0.000000e+00> : vector<64x48xf32>
    %23 = tpu.matmul %20, %22, %cst_24 {dimension_numbers = #tpu.dot_dimension_numbers<[1], [0], [0], [1], [0, 0, 1, 1], [], []>} : vector<64x256xbf16>, vector<256x48xbf16>, vector<64x48xf32> -> vector<64x48xf32>
    %24 = arith.addf %18, %23 : vector<64x48xf32>
    %c0_25 = arith.constant 0 : index
    %c88 = arith.constant 88 : index
    %c0_26 = arith.constant 0 : index
    %25 = vector.load %arg1[%c0_25, %c88, %c0_26] : memref<1x368x256xbf16, #tpu.memory_space<vmem>>, vector<1x64x256xbf16>
    %26 = vector.shape_cast %25 : vector<1x64x256xbf16> to vector<64x256xbf16>
    %c0_27 = arith.constant 0 : index
    %c4 = arith.constant 4 : index
    %c0_28 = arith.constant 0 : index
    %c0_29 = arith.constant 0 : index
    %27 = vector.load %arg2[%c0_27, %c4, %c0_28, %c0_29] : memref<7x9x256x48xbf16, #tpu.memory_space<vmem>>, vector<1x1x256x48xbf16>
    %28 = vector.shape_cast %27 : vector<1x1x256x48xbf16> to vector<256x48xbf16>
    %cst_30 = arith.constant dense<0.000000e+00> : vector<64x48xf32>
    %29 = tpu.matmul %26, %28, %cst_30 {dimension_numbers = #tpu.dot_dimension_numbers<[1], [0], [0], [1], [0, 0, 1, 1], [], []>} : vector<64x256xbf16>, vector<256x48xbf16>, vector<64x48xf32> -> vector<64x48xf32>
    %30 = arith.addf %24, %29 : vector<64x48xf32>
    %c0_31 = arith.constant 0 : index
    %c168 = arith.constant 168 : index
    %c0_32 = arith.constant 0 : index
    %31 = vector.load %arg1[%c0_31, %c168, %c0_32] : memref<1x368x256xbf16, #tpu.memory_space<vmem>>, vector<1x64x256xbf16>
    %32 = vector.shape_cast %31 : vector<1x64x256xbf16> to vector<64x256xbf16>
    %c0_33 = arith.constant 0 : index
    %c5 = arith.constant 5 : index
    %c0_34 = arith.constant 0 : index
    %c0_35 = arith.constant 0 : index
    %33 = vector.load %arg2[%c0_33, %c5, %c0_34, %c0_35] : memref<7x9x256x48xbf16, #tpu.memory_space<vmem>>, vector<1x1x256x48xbf16>
    %34 = vector.shape_cast %33 : vector<1x1x256x48xbf16> to vector<256x48xbf16>
    %cst_36 = arith.constant dense<0.000000e+00> : vector<64x48xf32>
    %35 = tpu.matmul %32, %34, %cst_36 {dimension_numbers = #tpu.dot_dimension_numbers<[1], [0], [0], [1], [0, 0, 1, 1], [], []>} : vector<64x256xbf16>, vector<256x48xbf16>, vector<64x48xf32> -> vector<64x48xf32>
    %36 = arith.addf %30, %35 : vector<64x48xf32>
    %c0_37 = arith.constant 0 : index
    %c16 = arith.constant 16 : index
    %c0_38 = arith.constant 0 : index
    %37 = vector.load %arg1[%c0_37, %c16, %c0_38] : memref<1x368x256xbf16, #tpu.memory_space<vmem>>, vector<1x64x256xbf16>
    %38 = vector.shape_cast %37 : vector<1x64x256xbf16> to vector<64x256xbf16>
    %c0_39 = arith.constant 0 : index
    %c6 = arith.constant 6 : index
    %c0_40 = arith.constant 0 : index
    %c0_41 = arith.constant 0 : index
    %39 = vector.load %arg2[%c0_39, %c6, %c0_40, %c0_41] : memref<7x9x256x48xbf16, #tpu.memory_space<vmem>>, vector<1x1x256x48xbf16>
    %40 = vector.shape_cast %39 : vector<1x1x256x48xbf16> to vector<256x48xbf16>
    %cst_42 = arith.constant dense<0.000000e+00> : vector<64x48xf32>
    %41 = tpu.matmul %38, %40, %cst_42 {dimension_numbers = #tpu.dot_dimension_numbers<[1], [0], [0], [1], [0, 0, 1, 1], [], []>} : vector<64x256xbf16>, vector<256x48xbf16>, vector<64x48xf32> -> vector<64x48xf32>
    %42 = arith.addf %36, %41 : vector<64x48xf32>
    %c0_43 = arith.constant 0 : index
    %c96 = arith.constant 96 : index
    %c0_44 = arith.constant 0 : index
    %43 = vector.load %arg1[%c0_43, %c96, %c0_44] : memref<1x368x256xbf16, #tpu.memory_space<vmem>>, vector<1x64x256xbf16>
    %44 = vector.shape_cast %43 : vector<1x64x256xbf16> to vector<64x256xbf16>
    %c0_45 = arith.constant 0 : index
    %c7 = arith.constant 7 : index
    %c0_46 = arith.constant 0 : index
    %c0_47 = arith.constant 0 : index
    %45 = vector.load %arg2[%c0_45, %c7, %c0_46, %c0_47] : memref<7x9x256x48xbf16, #tpu.memory_space<vmem>>, vector<1x1x256x48xbf16>
    %46 = vector.shape_cast %45 : vector<1x1x256x48xbf16> to vector<256x48xbf16>
    %cst_48 = arith.constant dense<0.000000e+00> : vector<64x48xf32>
    %47 = tpu.matmul %44, %46, %cst_48 {dimension_numbers = #tpu.dot_dimension_numbers<[1], [0], [0], [1], [0, 0, 1, 1], [], []>} : vector<64x256xbf16>, vector<256x48xbf16>, vector<64x48xf32> -> vector<64x48xf32>
    %48 = arith.addf %42, %47 : vector<64x48xf32>
    %c0_49 = arith.constant 0 : index
    %c176 = arith.constant 176 : index
    %c0_50 = arith.constant 0 : index
    %49 = vector.load %arg1[%c0_49, %c176, %c0_50] : memref<1x368x256xbf16, #tpu.memory_space<vmem>>, vector<1x64x256xbf16>
    %50 = vector.shape_cast %49 : vector<1x64x256xbf16> to vector<64x256xbf16>
    %c0_51 = arith.constant 0 : index
    %c8_52 = arith.constant 8 : index
    %c0_53 = arith.constant 0 : index
    %c0_54 = arith.constant 0 : index
    %51 = vector.load %arg2[%c0_51, %c8_52, %c0_53, %c0_54] : memref<7x9x256x48xbf16, #tpu.memory_space<vmem>>, vector<1x1x256x48xbf16>
    %52 = vector.shape_cast %51 : vector<1x1x256x48xbf16> to vector<256x48xbf16>
    %cst_55 = arith.constant dense<0.000000e+00> : vector<64x48xf32>
    %53 = tpu.matmul %50, %52, %cst_55 {dimension_numbers = #tpu.dot_dimension_numbers<[1], [0], [0], [1], [0, 0, 1, 1], [], []>} : vector<64x256xbf16>, vector<256x48xbf16>, vector<64x48xf32> -> vector<64x48xf32>
    %54 = arith.addf %48, %53 : vector<64x48xf32>
    %c0_56 = arith.constant 0 : index
    %c0_57 = arith.constant 0 : index
    %c0_58 = arith.constant 0 : index
    %55 = vector.load %arg3[%c0_56, %c0_57, %c0_58] : memref<7x1x48xf32, #tpu.memory_space<vmem>>, vector<1x1x48xf32>
    %56 = vector.shape_cast %55 : vector<1x1x48xf32> to vector<1x48xf32>
    %57 = vector.broadcast %56 : vector<1x48xf32> to vector<64x48xf32>
    %58 = arith.addf %54, %57 : vector<64x48xf32>
    %c0_59 = arith.constant 0 : index
    %c0_60 = arith.constant 0 : index
    %c0_61 = arith.constant 0 : index
    %59 = vector.load %arg4[%c0_59, %c0_60, %c0_61] : memref<1x120x48xf32, #tpu.memory_space<vmem>>, vector<1x64x48xf32>
    %60 = vector.shape_cast %59 : vector<1x64x48xf32> to vector<64x48xf32>
    %61 = vector.shape_cast %58 : vector<64x48xf32> to vector<1x64x48xf32>
    tpu.vector_store %arg4[%c0_59, %c0_60, %c0_61], %61 {strides = array<i32>} : memref<1x120x48xf32, #tpu.memory_space<vmem>>, vector<1x64x48xf32>,
    %cst_62 = arith.constant 0.000000e+00 : f32
    %62 = vector.broadcast %cst_62 : f32 to vector<16x48xf32>
    %c0_63 = arith.constant 0 : index
    %c240 = arith.constant 240 : index
    %c0_64 = arith.constant 0 : index
    %63 = vector.load %arg1[%c0_63, %c240, %c0_64] : memref<1x368x256xbf16, #tpu.memory_space<vmem>>, vector<1x16x256xbf16>
    %64 = vector.shape_cast %63 : vector<1x16x256xbf16> to vector<16x256xbf16>
    %c1_65 = arith.constant 1 : index
    %c0_66 = arith.constant 0 : index
    %c0_67 = arith.constant 0 : index
    %c0_68 = arith.constant 0 : index
    %65 = vector.load %arg2[%c1_65, %c0_66, %c0_67, %c0_68] : memref<7x9x256x48xbf16, #tpu.memory_space<vmem>>, vector<1x1x256x48xbf16>
    %66 = vector.shape_cast %65 : vector<1x1x256x48xbf16> to vector<256x48xbf16>
    %cst_69 = arith.constant dense<0.000000e+00> : vector<16x48xf32>
    %67 = tpu.matmul %64, %66, %cst_69 {dimension_numbers = #tpu.dot_dimension_numbers<[1], [0], [0], [1], [0, 0, 1, 1], [], []>} : vector<16x256xbf16>, vector<256x48xbf16>, vector<16x48xf32> -> vector<16x48xf32>
    %68 = arith.addf %62, %67 : vector<16x48xf32>
    %c0_70 = arith.constant 0 : index
    %c264 = arith.constant 264 : index
    %c0_71 = arith.constant 0 : index
    %69 = vector.load %arg1[%c0_70, %c264, %c0_71] : memref<1x368x256xbf16, #tpu.memory_space<vmem>>, vector<1x16x256xbf16>
    %70 = vector.shape_cast %69 : vector<1x16x256xbf16> to vector<16x256xbf16>
    %c1_72 = arith.constant 1 : index
    %c1_73 = arith.constant 1 : index
    %c0_74 = arith.constant 0 : index
    %c0_75 = arith.constant 0 : index
    %71 = vector.load %arg2[%c1_72, %c1_73, %c0_74, %c0_75] : memref<7x9x256x48xbf16, #tpu.memory_space<vmem>>, vector<1x1x256x48xbf16>
    %72 = vector.shape_cast %71 : vector<1x1x256x48xbf16> to vector<256x48xbf16>
    %cst_76 = arith.constant dense<0.000000e+00> : vector<16x48xf32>
    %73 = tpu.matmul %70, %72, %cst_76 {dimension_numbers = #tpu.dot_dimension_numbers<[1], [0], [0], [1], [0, 0, 1, 1], [], []>} : vector<16x256xbf16>, vector<256x48xbf16>, vector<16x48xf32> -> vector<16x48xf32>
    %74 = arith.addf %68, %73 : vector<16x48xf32>
    %c0_77 = arith.constant 0 : index
    %c288 = arith.constant 288 : index
    %c0_78 = arith.constant 0 : index
    %75 = vector.load %arg1[%c0_77, %c288, %c0_78] : memref<1x368x256xbf16, #tpu.memory_space<vmem>>, vector<1x16x256xbf16>
    %76 = vector.shape_cast %75 : vector<1x16x256xbf16> to vector<16x256xbf16>
    %c1_79 = arith.constant 1 : index
    %c2_80 = arith.constant 2 : index
    %c0_81 = arith.constant 0 : index
    %c0_82 = arith.constant 0 : index
    %77 = vector.load %arg2[%c1_79, %c2_80, %c0_81, %c0_82] : memref<7x9x256x48xbf16, #tpu.memory_space<vmem>>, vector<1x1x256x48xbf16>
    %78 = vector.shape_cast %77 : vector<1x1x256x48xbf16> to vector<256x48xbf16>
    %cst_83 = arith.constant dense<0.000000e+00> : vector<16x48xf32>
    %79 = tpu.matmul %76, %78, %cst_83 {dimension_numbers = #tpu.dot_dimension_numbers<[1], [0], [0], [1], [0, 0, 1, 1], [], []>} : vector<16x256xbf16>, vector<256x48xbf16>, vector<16x48xf32> -> vector<16x48xf32>
    %80 = arith.addf %74, %79 : vector<16x48xf32>
    %c0_84 = arith.constant 0 : index
    %c244 = arith.constant 244 : index
    %c0_85 = arith.constant 0 : index
    %81 = vector.load %arg1[%c0_84, %c244, %c0_85] : memref<1x368x256xbf16, #tpu.memory_space<vmem>>, vector<1x16x256xbf16>
    %82 = vector.shape_cast %81 : vector<1x16x256xbf16> to vector<16x256xbf16>
    %c1_86 = arith.constant 1 : index
    %c3_87 = arith.constant 3 : index
    %c0_88 = arith.constant 0 : index
    %c0_89 = arith.constant 0 : index
    %83 = vector.load %arg2[%c1_86, %c3_87, %c0_88, %c0_89] : memref<7x9x256x48xbf16, #tpu.memory_space<vmem>>, vector<1x1x256x48xbf16>
    %84 = vector.shape_cast %83 : vector<1x1x256x48xbf16> to vector<256x48xbf16>
    %cst_90 = arith.constant dense<0.000000e+00> : vector<16x48xf32>
    %85 = tpu.matmul %82, %84, %cst_90 {dimension_numbers = #tpu.dot_dimension_numbers<[1], [0], [0], [1], [0, 0, 1, 1], [], []>} : vector<16x256xbf16>, vector<256x48xbf16>, vector<16x48xf32> -> vector<16x48xf32>
    %86 = arith.addf %80, %85 : vector<16x48xf32>
    %c0_91 = arith.constant 0 : index
    %c268 = arith.constant 268 : index
    %c0_92 = arith.constant 0 : index
    %87 = vector.load %arg1[%c0_91, %c268, %c0_92] : memref<1x368x256xbf16, #tpu.memory_space<vmem>>, vector<1x16x256xbf16>
    %88 = vector.shape_cast %87 : vector<1x16x256xbf16> to vector<16x256xbf16>
    %c1_93 = arith.constant 1 : index
    %c4_94 = arith.constant 4 : index
    %c0_95 = arith.constant 0 : index
    %c0_96 = arith.constant 0 : index
    %89 = vector.load %arg2[%c1_93, %c4_94, %c0_95, %c0_96] : memref<7x9x256x48xbf16, #tpu.memory_space<vmem>>, vector<1x1x256x48xbf16>
    %90 = vector.shape_cast %89 : vector<1x1x256x48xbf16> to vector<256x48xbf16>
    %cst_97 = arith.constant dense<0.000000e+00> : vector<16x48xf32>
    %91 = tpu.matmul %88, %90, %cst_97 {dimension_numbers = #tpu.dot_dimension_numbers<[1], [0], [0], [1], [0, 0, 1, 1], [], []>} : vector<16x256xbf16>, vector<256x48xbf16>, vector<16x48xf32> -> vector<16x48xf32>
    %92 = arith.addf %86, %91 : vector<16x48xf32>
    %c0_98 = arith.constant 0 : index
    %c292 = arith.constant 292 : index
    %c0_99 = arith.constant 0 : index
    %93 = vector.load %arg1[%c0_98, %c292, %c0_99] : memref<1x368x256xbf16, #tpu.memory_space<vmem>>, vector<1x16x256xbf16>
    %94 = vector.shape_cast %93 : vector<1x16x256xbf16> to vector<16x256xbf16>
    %c1_100 = arith.constant 1 : index
    %c5_101 = arith.constant 5 : index
    %c0_102 = arith.constant 0 : index
    %c0_103 = arith.constant 0 : index
    %95 = vector.load %arg2[%c1_100, %c5_101, %c0_102, %c0_103] : memref<7x9x256x48xbf16, #tpu.memory_space<vmem>>, vector<1x1x256x48xbf16>
    %96 = vector.shape_cast %95 : vector<1x1x256x48xbf16> to vector<256x48xbf16>
    %cst_104 = arith.constant dense<0.000000e+00> : vector<16x48xf32>
    %97 = tpu.matmul %94, %96, %cst_104 {dimension_numbers = #tpu.dot_dimension_numbers<[1], [0], [0], [1], [0, 0, 1, 1], [], []>} : vector<16x256xbf16>, vector<256x48xbf16>, vector<16x48xf32> -> vector<16x48xf32>
    %98 = arith.addf %92, %97 : vector<16x48xf32>
    %c0_105 = arith.constant 0 : index
    %c248 = arith.constant 248 : index
    %c0_106 = arith.constant 0 : index
    %99 = vector.load %arg1[%c0_105, %c248, %c0_106] : memref<1x368x256xbf16, #tpu.memory_space<vmem>>, vector<1x16x256xbf16>
    %100 = vector.shape_cast %99 : vector<1x16x256xbf16> to vector<16x256xbf16>
    %c1_107 = arith.constant 1 : index
    %c6_108 = arith.constant 6 : index
    %c0_109 = arith.constant 0 : index
    %c0_110 = arith.constant 0 : index
    %101 = vector.load %arg2[%c1_107, %c6_108, %c0_109, %c0_110] : memref<7x9x256x48xbf16, #tpu.memory_space<vmem>>, vector<1x1x256x48xbf16>
    %102 = vector.shape_cast %101 : vector<1x1x256x48xbf16> to vector<256x48xbf16>
    %cst_111 = arith.constant dense<0.000000e+00> : vector<16x48xf32>
    %103 = tpu.matmul %100, %102, %cst_111 {dimension_numbers = #tpu.dot_dimension_numbers<[1], [0], [0], [1], [0, 0, 1, 1], [], []>} : vector<16x256xbf16>, vector<256x48xbf16>, vector<16x48xf32> -> vector<16x48xf32>
    %104 = arith.addf %98, %103 : vector<16x48xf32>
    %c0_112 = arith.constant 0 : index
    %c272 = arith.constant 272 : index
    %c0_113 = arith.constant 0 : index
    %105 = vector.load %arg1[%c0_112, %c272, %c0_113] : memref<1x368x256xbf16, #tpu.memory_space<vmem>>, vector<1x16x256xbf16>
    %106 = vector.shape_cast %105 : vector<1x16x256xbf16> to vector<16x256xbf16>
    %c1_114 = arith.constant 1 : index
    %c7_115 = arith.constant 7 : index
    %c0_116 = arith.constant 0 : index
    %c0_117 = arith.constant 0 : index
    %107 = vector.load %arg2[%c1_114, %c7_115, %c0_116, %c0_117] : memref<7x9x256x48xbf16, #tpu.memory_space<vmem>>, vector<1x1x256x48xbf16>
    %108 = vector.shape_cast %107 : vector<1x1x256x48xbf16> to vector<256x48xbf16>
    %cst_118 = arith.constant dense<0.000000e+00> : vector<16x48xf32>
    %109 = tpu.matmul %106, %108, %cst_118 {dimension_numbers = #tpu.dot_dimension_numbers<[1], [0], [0], [1], [0, 0, 1, 1], [], []>} : vector<16x256xbf16>, vector<256x48xbf16>, vector<16x48xf32> -> vector<16x48xf32>
    %110 = arith.addf %104, %109 : vector<16x48xf32>
    %c0_119 = arith.constant 0 : index
    %c296 = arith.constant 296 : index
    %c0_120 = arith.constant 0 : index
    %111 = vector.load %arg1[%c0_119, %c296, %c0_120] : memref<1x368x256xbf16, #tpu.memory_space<vmem>>, vector<1x16x256xbf16>
    %112 = vector.shape_cast %111 : vector<1x16x256xbf16> to vector<16x256xbf16>
    %c1_121 = arith.constant 1 : index
    %c8_122 = arith.constant 8 : index
    %c0_123 = arith.constant 0 : index
    %c0_124 = arith.constant 0 : index
    %113 = vector.load %arg2[%c1_121, %c8_122, %c0_123, %c0_124] : memref<7x9x256x48xbf16, #tpu.memory_space<vmem>>, vector<1x1x256x48xbf16>
    %114 = vector.shape_cast %113 : vector<1x1x256x48xbf16> to vector<256x48xbf16>
    %cst_125 = arith.constant dense<0.000000e+00> : vector<16x48xf32>
    %115 = tpu.matmul %112, %114, %cst_125 {dimension_numbers = #tpu.dot_dimension_numbers<[1], [0], [0], [1], [0, 0, 1, 1], [], []>} : vector<16x256xbf16>, vector<256x48xbf16>, vector<16x48xf32> -> vector<16x48xf32>
    %116 = arith.addf %110, %115 : vector<16x48xf32>
    %c1_126 = arith.constant 1 : index
    %c0_127 = arith.constant 0 : index
    %c0_128 = arith.constant 0 : index
    %117 = vector.load %arg3[%c1_126, %c0_127, %c0_128] : memref<7x1x48xf32, #tpu.memory_space<vmem>>, vector<1x1x48xf32>
    %118 = vector.shape_cast %117 : vector<1x1x48xf32> to vector<1x48xf32>
    %119 = vector.broadcast %118 : vector<1x48xf32> to vector<16x48xf32>
    %120 = arith.addf %116, %119 : vector<16x48xf32>
    %c0_129 = arith.constant 0 : index
    %c64 = arith.constant 64 : index
    %c0_130 = arith.constant 0 : index
    %121 = vector.load %arg4[%c0_129, %c64, %c0_130] : memref<1x120x48xf32, #tpu.memory_space<vmem>>, vector<1x16x48xf32>
    %122 = vector.shape_cast %121 : vector<1x16x48xf32> to vector<16x48xf32>
    %123 = vector.shape_cast %120 : vector<16x48xf32> to vector<1x16x48xf32>
    tpu.vector_store %arg4[%c0_129, %c64, %c0_130], %123 {strides = array<i32>} : memref<1x120x48xf32, #tpu.memory_space<vmem>>, vector<1x16x48xf32>,
    %cst_131 = arith.constant 0.000000e+00 : f32
    %124 = vector.broadcast %cst_131 : f32 to vector<4x48xf32>
    %c0_132 = arith.constant 0 : index
    %c312 = arith.constant 312 : index
    %c0_133 = arith.constant 0 : index
    %125 = vector.load %arg1[%c0_132, %c312, %c0_133] : memref<1x368x256xbf16, #tpu.memory_space<vmem>>, vector<1x4x256xbf16>
    %126 = vector.shape_cast %125 : vector<1x4x256xbf16> to vector<4x256xbf16>
    %c2_134 = arith.constant 2 : index
    %c0_135 = arith.constant 0 : index
    %c0_136 = arith.constant 0 : index
    %c0_137 = arith.constant 0 : index
    %127 = vector.load %arg2[%c2_134, %c0_135, %c0_136, %c0_137] : memref<7x9x256x48xbf16, #tpu.memory_space<vmem>>, vector<1x1x256x48xbf16>
    %128 = vector.shape_cast %127 : vector<1x1x256x48xbf16> to vector<256x48xbf16>
    %cst_138 = arith.constant dense<0.000000e+00> : vector<4x48xf32>
    %129 = tpu.matmul %126, %128, %cst_138 {dimension_numbers = #tpu.dot_dimension_numbers<[1], [0], [0], [1], [0, 0, 1, 1], [], []>} : vector<4x256xbf16>, vector<256x48xbf16>, vector<4x48xf32> -> vector<4x48xf32>
    %130 = arith.addf %124, %129 : vector<4x48xf32>
    %c0_139 = arith.constant 0 : index
    %c320 = arith.constant 320 : index
    %c0_140 = arith.constant 0 : index
    %131 = vector.load %arg1[%c0_139, %c320, %c0_140] : memref<1x368x256xbf16, #tpu.memory_space<vmem>>, vector<1x4x256xbf16>
    %132 = vector.shape_cast %131 : vector<1x4x256xbf16> to vector<4x256xbf16>
    %c2_141 = arith.constant 2 : index
    %c1_142 = arith.constant 1 : index
    %c0_143 = arith.constant 0 : index
    %c0_144 = arith.constant 0 : index
    %133 = vector.load %arg2[%c2_141, %c1_142, %c0_143, %c0_144] : memref<7x9x256x48xbf16, #tpu.memory_space<vmem>>, vector<1x1x256x48xbf16>
    %134 = vector.shape_cast %133 : vector<1x1x256x48xbf16> to vector<256x48xbf16>
    %cst_145 = arith.constant dense<0.000000e+00> : vector<4x48xf32>
    %135 = tpu.matmul %132, %134, %cst_145 {dimension_numbers = #tpu.dot_dimension_numbers<[1], [0], [0], [1], [0, 0, 1, 1], [], []>} : vector<4x256xbf16>, vector<256x48xbf16>, vector<4x48xf32> -> vector<4x48xf32>
    %136 = arith.addf %130, %135 : vector<4x48xf32>
    %c0_146 = arith.constant 0 : index
    %c328 = arith.constant 328 : index
    %c0_147 = arith.constant 0 : index
    %137 = vector.load %arg1[%c0_146, %c328, %c0_147] : memref<1x368x256xbf16, #tpu.memory_space<vmem>>, vector<1x4x256xbf16>
    %138 = vector.shape_cast %137 : vector<1x4x256xbf16> to vector<4x256xbf16>
    %c2_148 = arith.constant 2 : index
    %c2_149 = arith.constant 2 : index
    %c0_150 = arith.constant 0 : index
    %c0_151 = arith.constant 0 : index
    %139 = vector.load %arg2[%c2_148, %c2_149, %c0_150, %c0_151] : memref<7x9x256x48xbf16, #tpu.memory_space<vmem>>, vector<1x1x256x48xbf16>
    %140 = vector.shape_cast %139 : vector<1x1x256x48xbf16> to vector<256x48xbf16>
    %cst_152 = arith.constant dense<0.000000e+00> : vector<4x48xf32>
    %141 = tpu.matmul %138, %140, %cst_152 {dimension_numbers = #tpu.dot_dimension_numbers<[1], [0], [0], [1], [0, 0, 1, 1], [], []>} : vector<4x256xbf16>, vector<256x48xbf16>, vector<4x48xf32> -> vector<4x48xf32>
    %142 = arith.addf %136, %141 : vector<4x48xf32>
    %c0_153 = arith.constant 0 : index
    %c314 = arith.constant 314 : index
    %c0_154 = arith.constant 0 : index
    %143 = vector.load %arg1[%c0_153, %c314, %c0_154] : memref<1x368x256xbf16, #tpu.memory_space<vmem>>, vector<1x4x256xbf16>
    %144 = vector.shape_cast %143 : vector<1x4x256xbf16> to vector<4x256xbf16>
    %c2_155 = arith.constant 2 : index
    %c3_156 = arith.constant 3 : index
    %c0_157 = arith.constant 0 : index
    %c0_158 = arith.constant 0 : index
    %145 = vector.load %arg2[%c2_155, %c3_156, %c0_157, %c0_158] : memref<7x9x256x48xbf16, #tpu.memory_space<vmem>>, vector<1x1x256x48xbf16>
    %146 = vector.shape_cast %145 : vector<1x1x256x48xbf16> to vector<256x48xbf16>
    %cst_159 = arith.constant dense<0.000000e+00> : vector<4x48xf32>
    %147 = tpu.matmul %144, %146, %cst_159 {dimension_numbers = #tpu.dot_dimension_numbers<[1], [0], [0], [1], [0, 0, 1, 1], [], []>} : vector<4x256xbf16>, vector<256x48xbf16>, vector<4x48xf32> -> vector<4x48xf32>
    %148 = arith.addf %142, %147 : vector<4x48xf32>
    %c0_160 = arith.constant 0 : index
    %c322 = arith.constant 322 : index
    %c0_161 = arith.constant 0 : index
    %149 = vector.load %arg1[%c0_160, %c322, %c0_161] : memref<1x368x256xbf16, #tpu.memory_space<vmem>>, vector<1x4x256xbf16>
    %150 = vector.shape_cast %149 : vector<1x4x256xbf16> to vector<4x256xbf16>
    %c2_162 = arith.constant 2 : index
    %c4_163 = arith.constant 4 : index
    %c0_164 = arith.constant 0 : index
    %c0_165 = arith.constant 0 : index
    %151 = vector.load %arg2[%c2_162, %c4_163, %c0_164, %c0_165] : memref<7x9x256x48xbf16, #tpu.memory_space<vmem>>, vector<1x1x256x48xbf16>
    %152 = vector.shape_cast %151 : vector<1x1x256x48xbf16> to vector<256x48xbf16>
    %cst_166 = arith.constant dense<0.000000e+00> : vector<4x48xf32>
    %153 = tpu.matmul %150, %152, %cst_166 {dimension_numbers = #tpu.dot_dimension_numbers<[1], [0], [0], [1], [0, 0, 1, 1], [], []>} : vector<4x256xbf16>, vector<256x48xbf16>, vector<4x48xf32> -> vector<4x48xf32>
    %154 = arith.addf %148, %153 : vector<4x48xf32>
    %c0_167 = arith.constant 0 : index
    %c330 = arith.constant 330 : index
    %c0_168 = arith.constant 0 : index
    %155 = vector.load %arg1[%c0_167, %c330, %c0_168] : memref<1x368x256xbf16, #tpu.memory_space<vmem>>, vector<1x4x256xbf16>
    %156 = vector.shape_cast %155 : vector<1x4x256xbf16> to vector<4x256xbf16>
    %c2_169 = arith.constant 2 : index
    %c5_170 = arith.constant 5 : index
    %c0_171 = arith.constant 0 : index
    %c0_172 = arith.constant 0 : index
    %157 = vector.load %arg2[%c2_169, %c5_170, %c0_171, %c0_172] : memref<7x9x256x48xbf16, #tpu.memory_space<vmem>>, vector<1x1x256x48xbf16>
    %158 = vector.shape_cast %157 : vector<1x1x256x48xbf16> to vector<256x48xbf16>
    %cst_173 = arith.constant dense<0.000000e+00> : vector<4x48xf32>
    %159 = tpu.matmul %156, %158, %cst_173 {dimension_numbers = #tpu.dot_dimension_numbers<[1], [0], [0], [1], [0, 0, 1, 1], [], []>} : vector<4x256xbf16>, vector<256x48xbf16>, vector<4x48xf32> -> vector<4x48xf32>
    %160 = arith.addf %154, %159 : vector<4x48xf32>
    %c0_174 = arith.constant 0 : index
    %c316 = arith.constant 316 : index
    %c0_175 = arith.constant 0 : index
    %161 = vector.load %arg1[%c0_174, %c316, %c0_175] : memref<1x368x256xbf16, #tpu.memory_space<vmem>>, vector<1x4x256xbf16>
    %162 = vector.shape_cast %161 : vector<1x4x256xbf16> to vector<4x256xbf16>
    %c2_176 = arith.constant 2 : index
    %c6_177 = arith.constant 6 : index
    %c0_178 = arith.constant 0 : index
    %c0_179 = arith.constant 0 : index
    %163 = vector.load %arg2[%c2_176, %c6_177, %c0_178, %c0_179] : memref<7x9x256x48xbf16, #tpu.memory_space<vmem>>, vector<1x1x256x48xbf16>
    %164 = vector.shape_cast %163 : vector<1x1x256x48xbf16> to vector<256x48xbf16>
    %cst_180 = arith.constant dense<0.000000e+00> : vector<4x48xf32>
    %165 = tpu.matmul %162, %164, %cst_180 {dimension_numbers = #tpu.dot_dimension_numbers<[1], [0], [0], [1], [0, 0, 1, 1], [], []>} : vector<4x256xbf16>, vector<256x48xbf16>, vector<4x48xf32> -> vector<4x48xf32>
    %166 = arith.addf %160, %165 : vector<4x48xf32>
    %c0_181 = arith.constant 0 : index
    %c324 = arith.constant 324 : index
    %c0_182 = arith.constant 0 : index
    %167 = vector.load %arg1[%c0_181, %c324, %c0_182] : memref<1x368x256xbf16, #tpu.memory_space<vmem>>, vector<1x4x256xbf16>
    %168 = vector.shape_cast %167 : vector<1x4x256xbf16> to vector<4x256xbf16>
    %c2_183 = arith.constant 2 : index
    %c7_184 = arith.constant 7 : index
    %c0_185 = arith.constant 0 : index
    %c0_186 = arith.constant 0 : index
    %169 = vector.load %arg2[%c2_183, %c7_184, %c0_185, %c0_186] : memref<7x9x256x48xbf16, #tpu.memory_space<vmem>>, vector<1x1x256x48xbf16>
    %170 = vector.shape_cast %169 : vector<1x1x256x48xbf16> to vector<256x48xbf16>
    %cst_187 = arith.constant dense<0.000000e+00> : vector<4x48xf32>
    %171 = tpu.matmul %168, %170, %cst_187 {dimension_numbers = #tpu.dot_dimension_numbers<[1], [0], [0], [1], [0, 0, 1, 1], [], []>} : vector<4x256xbf16>, vector<256x48xbf16>, vector<4x48xf32> -> vector<4x48xf32>
    %172 = arith.addf %166, %171 : vector<4x48xf32>
    %c0_188 = arith.constant 0 : index
    %c332 = arith.constant 332 : index
    %c0_189 = arith.constant 0 : index
    %173 = vector.load %arg1[%c0_188, %c332, %c0_189] : memref<1x368x256xbf16, #tpu.memory_space<vmem>>, vector<1x4x256xbf16>
    %174 = vector.shape_cast %173 : vector<1x4x256xbf16> to vector<4x256xbf16>
    %c2_190 = arith.constant 2 : index
    %c8_191 = arith.constant 8 : index
    %c0_192 = arith.constant 0 : index
    %c0_193 = arith.constant 0 : index
    %175 = vector.load %arg2[%c2_190, %c8_191, %c0_192, %c0_193] : memref<7x9x256x48xbf16, #tpu.memory_space<vmem>>, vector<1x1x256x48xbf16>
    %176 = vector.shape_cast %175 : vector<1x1x256x48xbf16> to vector<256x48xbf16>
    %cst_194 = arith.constant dense<0.000000e+00> : vector<4x48xf32>
    %177 = tpu.matmul %174, %176, %cst_194 {dimension_numbers = #tpu.dot_dimension_numbers<[1], [0], [0], [1], [0, 0, 1, 1], [], []>} : vector<4x256xbf16>, vector<256x48xbf16>, vector<4x48xf32> -> vector<4x48xf32>
    %178 = arith.addf %172, %177 : vector<4x48xf32>
    %c2_195 = arith.constant 2 : index
    %c0_196 = arith.constant 0 : index
    %c0_197 = arith.constant 0 : index
    %179 = vector.load %arg3[%c2_195, %c0_196, %c0_197] : memref<7x1x48xf32, #tpu.memory_space<vmem>>, vector<1x1x48xf32>
    %180 = vector.shape_cast %179 : vector<1x1x48xf32> to vector<1x48xf32>
    %181 = vector.broadcast %180 : vector<1x48xf32> to vector<4x48xf32>
    %182 = arith.addf %178, %181 : vector<4x48xf32>
    %c0_198 = arith.constant 0 : index
    %c80_199 = arith.constant 80 : index
    %c0_200 = arith.constant 0 : index
    %183 = vector.load %arg4[%c0_198, %c80_199, %c0_200] : memref<1x120x48xf32, #tpu.memory_space<vmem>>, vector<1x4x48xf32>
    %184 = vector.shape_cast %183 : vector<1x4x48xf32> to vector<4x48xf32>
    %185 = vector.shape_cast %182 : vector<4x48xf32> to vector<1x4x48xf32>
    tpu.vector_store %arg4[%c0_198, %c80_199, %c0_200], %185 {strides = array<i32>} : memref<1x120x48xf32, #tpu.memory_space<vmem>>, vector<1x4x48xf32>,
    %c0_201 = arith.constant 0 : index
    %c336 = arith.constant 336 : index
    %c0_202 = arith.constant 0 : index
    %186 = vector.load %arg1[%c0_201, %c336, %c0_202] : memref<1x368x256xbf16, #tpu.memory_space<vmem>>, vector<1x1x256xbf16>
    %187 = vector.shape_cast %186 : vector<1x1x256xbf16> to vector<1x256xbf16>
    %c3_203 = arith.constant 3 : index
    %c4_204 = arith.constant 4 : index
    %c0_205 = arith.constant 0 : index
    %c0_206 = arith.constant 0 : index
    %188 = vector.load %arg2[%c3_203, %c4_204, %c0_205, %c0_206] : memref<7x9x256x48xbf16, #tpu.memory_space<vmem>>, vector<1x1x256x48xbf16>
    %189 = vector.shape_cast %188 : vector<1x1x256x48xbf16> to vector<256x48xbf16>
    %cst_207 = arith.constant dense<0.000000e+00> : vector<1x48xf32>
    %190 = tpu.matmul %187, %189, %cst_207 {dimension_numbers = #tpu.dot_dimension_numbers<[1], [0], [0], [1], [0, 0, 1, 1], [], []>} : vector<1x256xbf16>, vector<256x48xbf16>, vector<1x48xf32> -> vector<1x48xf32>
    %c3_208 = arith.constant 3 : index
    %c0_209 = arith.constant 0 : index
    %c0_210 = arith.constant 0 : index
    %191 = vector.load %arg3[%c3_208, %c0_209, %c0_210] : memref<7x1x48xf32, #tpu.memory_space<vmem>>, vector<1x1x48xf32>
    %192 = vector.shape_cast %191 : vector<1x1x48xf32> to vector<1x48xf32>
    %193 = arith.addf %190, %192 : vector<1x48xf32>
    %c0_211 = arith.constant 0 : index
    %c88_212 = arith.constant 88 : index
    %c0_213 = arith.constant 0 : index
    %194 = vector.load %arg4[%c0_211, %c88_212, %c0_213] : memref<1x120x48xf32, #tpu.memory_space<vmem>>, vector<1x1x48xf32>
    %195 = vector.shape_cast %194 : vector<1x1x48xf32> to vector<1x48xf32>
    %196 = vector.shape_cast %193 : vector<1x48xf32> to vector<1x1x48xf32>
    tpu.vector_store %arg4[%c0_211, %c88_212, %c0_213], %196 {strides = array<i32>} : memref<1x120x48xf32, #tpu.memory_space<vmem>>, vector<1x1x48xf32>,
    %c0_214 = arith.constant 0 : index
    %c344 = arith.constant 344 : index
    %c0_215 = arith.constant 0 : index
    %197 = vector.load %arg1[%c0_214, %c344, %c0_215] : memref<1x368x256xbf16, #tpu.memory_space<vmem>>, vector<1x1x256xbf16>
    %198 = vector.shape_cast %197 : vector<1x1x256xbf16> to vector<1x256xbf16>
    %c4_216 = arith.constant 4 : index
    %c4_217 = arith.constant 4 : index
    %c0_218 = arith.constant 0 : index
    %c0_219 = arith.constant 0 : index
    %199 = vector.load %arg2[%c4_216, %c4_217, %c0_218, %c0_219] : memref<7x9x256x48xbf16, #tpu.memory_space<vmem>>, vector<1x1x256x48xbf16>
    %200 = vector.shape_cast %199 : vector<1x1x256x48xbf16> to vector<256x48xbf16>
    %cst_220 = arith.constant dense<0.000000e+00> : vector<1x48xf32>
    %201 = tpu.matmul %198, %200, %cst_220 {dimension_numbers = #tpu.dot_dimension_numbers<[1], [0], [0], [1], [0, 0, 1, 1], [], []>} : vector<1x256xbf16>, vector<256x48xbf16>, vector<1x48xf32> -> vector<1x48xf32>
    %c4_221 = arith.constant 4 : index
    %c0_222 = arith.constant 0 : index
    %c0_223 = arith.constant 0 : index
    %202 = vector.load %arg3[%c4_221, %c0_222, %c0_223] : memref<7x1x48xf32, #tpu.memory_space<vmem>>, vector<1x1x48xf32>
    %203 = vector.shape_cast %202 : vector<1x1x48xf32> to vector<1x48xf32>
    %204 = arith.addf %201, %203 : vector<1x48xf32>
    %c0_224 = arith.constant 0 : index
    %c96_225 = arith.constant 96 : index
    %c0_226 = arith.constant 0 : index
    %205 = vector.load %arg4[%c0_224, %c96_225, %c0_226] : memref<1x120x48xf32, #tpu.memory_space<vmem>>, vector<1x1x48xf32>
    %206 = vector.shape_cast %205 : vector<1x1x48xf32> to vector<1x48xf32>
    %207 = vector.shape_cast %204 : vector<1x48xf32> to vector<1x1x48xf32>
    tpu.vector_store %arg4[%c0_224, %c96_225, %c0_226], %207 {strides = array<i32>} : memref<1x120x48xf32, #tpu.memory_space<vmem>>, vector<1x1x48xf32>,
    %c0_227 = arith.constant 0 : index
    %c352 = arith.constant 352 : index
    %c0_228 = arith.constant 0 : index
    %208 = vector.load %arg1[%c0_227, %c352, %c0_228] : memref<1x368x256xbf16, #tpu.memory_space<vmem>>, vector<1x1x256xbf16>
    %209 = vector.shape_cast %208 : vector<1x1x256xbf16> to vector<1x256xbf16>
    %c5_229 = arith.constant 5 : index
    %c4_230 = arith.constant 4 : index
    %c0_231 = arith.constant 0 : index
    %c0_232 = arith.constant 0 : index
    %210 = vector.load %arg2[%c5_229, %c4_230, %c0_231, %c0_232] : memref<7x9x256x48xbf16, #tpu.memory_space<vmem>>, vector<1x1x256x48xbf16>
    %211 = vector.shape_cast %210 : vector<1x1x256x48xbf16> to vector<256x48xbf16>
    %cst_233 = arith.constant dense<0.000000e+00> : vector<1x48xf32>
    %212 = tpu.matmul %209, %211, %cst_233 {dimension_numbers = #tpu.dot_dimension_numbers<[1], [0], [0], [1], [0, 0, 1, 1], [], []>} : vector<1x256xbf16>, vector<256x48xbf16>, vector<1x48xf32> -> vector<1x48xf32>
    %c5_234 = arith.constant 5 : index
    %c0_235 = arith.constant 0 : index
    %c0_236 = arith.constant 0 : index
    %213 = vector.load %arg3[%c5_234, %c0_235, %c0_236] : memref<7x1x48xf32, #tpu.memory_space<vmem>>, vector<1x1x48xf32>
    %214 = vector.shape_cast %213 : vector<1x1x48xf32> to vector<1x48xf32>
    %215 = arith.addf %212, %214 : vector<1x48xf32>
    %c0_237 = arith.constant 0 : index
    %c104 = arith.constant 104 : index
    %c0_238 = arith.constant 0 : index
    %216 = vector.load %arg4[%c0_237, %c104, %c0_238] : memref<1x120x48xf32, #tpu.memory_space<vmem>>, vector<1x1x48xf32>
    %217 = vector.shape_cast %216 : vector<1x1x48xf32> to vector<1x48xf32>
    %218 = vector.shape_cast %215 : vector<1x48xf32> to vector<1x1x48xf32>
    tpu.vector_store %arg4[%c0_237, %c104, %c0_238], %218 {strides = array<i32>} : memref<1x120x48xf32, #tpu.memory_space<vmem>>, vector<1x1x48xf32>,
    %c0_239 = arith.constant 0 : index
    %c360 = arith.constant 360 : index
    %c0_240 = arith.constant 0 : index
    %219 = vector.load %arg1[%c0_239, %c360, %c0_240] : memref<1x368x256xbf16, #tpu.memory_space<vmem>>, vector<1x1x256xbf16>
    %220 = vector.shape_cast %219 : vector<1x1x256xbf16> to vector<1x256xbf16>
    %c6_241 = arith.constant 6 : index
    %c4_242 = arith.constant 4 : index
    %c0_243 = arith.constant 0 : index
    %c0_244 = arith.constant 0 : index
    %221 = vector.load %arg2[%c6_241, %c4_242, %c0_243, %c0_244] : memref<7x9x256x48xbf16, #tpu.memory_space<vmem>>, vector<1x1x256x48xbf16>
    %222 = vector.shape_cast %221 : vector<1x1x256x48xbf16> to vector<256x48xbf16>
    %cst_245 = arith.constant dense<0.000000e+00> : vector<1x48xf32>
    %223 = tpu.matmul %220, %222, %cst_245 {dimension_numbers = #tpu.dot_dimension_numbers<[1], [0], [0], [1], [0, 0, 1, 1], [], []>} : vector<1x256xbf16>, vector<256x48xbf16>, vector<1x48xf32> -> vector<1x48xf32>
    %c6_246 = arith.constant 6 : index
    %c0_247 = arith.constant 0 : index
    %c0_248 = arith.constant 0 : index
    %224 = vector.load %arg3[%c6_246, %c0_247, %c0_248] : memref<7x1x48xf32, #tpu.memory_space<vmem>>, vector<1x1x48xf32>
    %225 = vector.shape_cast %224 : vector<1x1x48xf32> to vector<1x48xf32>
    %226 = arith.addf %223, %225 : vector<1x48xf32>
    %c0_249 = arith.constant 0 : index
    %c112 = arith.constant 112 : index
    %c0_250 = arith.constant 0 : index
    %227 = vector.load %arg4[%c0_249, %c112, %c0_250] : memref<1x120x48xf32, #tpu.memory_space<vmem>>, vector<1x1x48xf32>
    %228 = vector.shape_cast %227 : vector<1x1x48xf32> to vector<1x48xf32>
    %229 = vector.shape_cast %226 : vector<1x48xf32> to vector<1x1x48xf32>
    tpu.vector_store %arg4[%c0_249, %c112, %c0_250], %229 {strides = array<i32>} : memref<1x120x48xf32, #tpu.memory_space<vmem>>, vector<1x1x48xf32>,
    return
  }
  func.func @transform_0(%arg0: i32) -> (i32, i32, i32) {
    %c0_i32 = arith.constant 0 : i32
    %c0_i32_0 = arith.constant 0 : i32
    %c0_i32_1 = arith.constant 0 : i32
    return %arg0, %c0_i32, %c0_i32_0 : i32, i32, i32
  }
  func.func @transform_1(%arg0: i32) -> (i32, i32, i32, i32) {
    %c0_i32 = arith.constant 0 : i32
    %c0_i32_0 = arith.constant 0 : i32
    %c0_i32_1 = arith.constant 0 : i32
    %c0_i32_2 = arith.constant 0 : i32
    %c0_i32_3 = arith.constant 0 : i32
    return %c0_i32, %c0_i32_0, %c0_i32_1, %c0_i32_2 : i32, i32, i32, i32
  }
  func.func @transform_2(%arg0: i32) -> (i32, i32, i32) {
    %c0_i32 = arith.constant 0 : i32
    %c0_i32_0 = arith.constant 0 : i32
    %c0_i32_1 = arith.constant 0 : i32
    %c0_i32_2 = arith.constant 0 : i32
    return %c0_i32, %c0_i32_0, %c0_i32_1 : i32, i32, i32
  }
  func.func @transform_3(%arg0: i32) -> (i32, i32, i32) {
    %c0_i32 = arith.constant 0 : i32
    %c0_i32_0 = arith.constant 0 : i32
    %c0_i32_1 = arith.constant 0 : i32
    return %arg0, %c0_i32, %c0_i32_0 : i32, i32, i32
  }
}

</mosaic_0001>

<bundles_post_ra>
// kernel: fpnssd_forward.1
= control target key start
LH: loop header
LB: loop body
LE: loop exit
PB: predicated region body
PF: predicated region fallthrough
CT: control target
= control target key end

     0   :  { %s9597_s12 = smov 0   ;;  %s11601_s0 = inlined_call_operand.vmem [shape: bf16[2,368,256], index: 0, kind: input, shape index: {}]   ;;  %s11602_s1 = inlined_call_operand.vmem [shape: bf16[7,9,256,48], index: 1, kind: input, shape index: {}]   ;;  %s11603_s2 = inlined_call_operand.vmem [shape: f32[7,1,48], index: 2, kind: input, shape index: {}]   ;;  %s11604_s3 = inlined_call_operand.vmem [shape: f32[2,120,48], index: 3, kind: output, shape index: {}]  }
   0x1 LB: > { %s6517_s13 = sadd.s32 4294967295, %s9575_s12   ;;  %p6521_p0 = scmp.ge.s32.totalorder %s9575_s12, 1  ;;  %s9575_s12 = sphi %s9597_s12, %s13_s12  }
   0x2   : > { %p137_p1 = scmp.lt.s32.totalorder %s9575_s12, 3 }
   0x4   : > { %p138_p2 = pnand %p6521_p0, %p137_p1 }
   0x5   : > { %v8967_v0 = vld [vmem:[%s11602_s1 + $0xc0] sm:$0xff] (!%p138_p2)   ;;  %v8971_v4 = vld [vmem:[%s11602_s1 + $0xc8] sm:$0xff] (!%p138_p2)   ;;  %v8975_v8 = vld [vmem:[%s11602_s1 + $0xd0] sm:$0xff] (!%p138_p2)   ;;  %p161_p3 = scmp.lt.s32.totalorder (!%p138_p2), %s6517_s13, 1  ;;  %vm3026_vm0 = vcmask (!%p138_p2), 1045504   ;;  %vm2420_vm1 = vcmask (!%p138_p2), 392192  }
   0x6   : > { %141 = sbr.rel (%p138_p2) target bundleno = 742 (0x2e6), region = 32  ;;  %v8968_v1 = vld [vmem:[%s11602_s1 + $0x40] sm:$0xff] (!%p138_p2)   ;;  %8113 = vmatprep.subr.bf16.mxu0 (!%p138_p2), %v8967_v0  ;;  %v8972_v5 = vld [vmem:[%s11602_s1 + $0x48] sm:$0xff] (!%p138_p2)   ;;  %v8976_v9 = vld [vmem:[%s11602_s1 + $0x50] sm:$0xff] (!%p138_p2)   ;;  %vm5739_vm2 = vcmask (!%p138_p2), 388096   ;;  %vm5920_vm3 = vcmask (!%p138_p2), 385024  }
   0x7   : > { %v8969_v2 = vld [vmem:[%s11602_s1 + $0x80] sm:$0xff] (!%p138_p2)   ;;  %8153 = vmatprep.subr.bf16.mxu1 (!%p138_p2), %v8968_v1  ;;  %v8973_v6 = vld [vmem:[%s11602_s1 + $0x88] sm:$0xff] (!%p138_p2)   ;;  %v8977_v10 = vld [vmem:[%s11602_s1 + $0x90] sm:$0xff] (!%p138_p2)  }
   0x8   : > { %v8970_v3 = vld [vmem:[%s11602_s1] sm:$0xff] (!%p138_p2)   ;;  %8114 = vmatpush3.bf16.msra.mxu0 (!%p138_p2), %v8969_v2  ;;  %v8974_v7 = vld [vmem:[%s11602_s1 + $0x8] sm:$0xff] (!%p138_p2)   ;;  %v8978_v11 = vld [vmem:[%s11602_s1 + $0x10] sm:$0xff] (!%p138_p2)  }
   0x9   : > { %8154 = vmatpush3.bf16.msra.mxu1 (!%p138_p2), %v8970_v3  ;;  %8115 = vmatprep.subr.bf16.mxu0 (!%p138_p2), %v8971_v4  ;;  %v8979_v12 = vld [vmem:[%s11602_s1 + $0xd8] sm:$0xff] (!%p138_p2)   ;;  %v8983_v16 = vld [vmem:[%s11602_s1 + $0xe0] sm:$0xff] (!%p138_p2)   ;;  %v8987_v20 = vld [vmem:[%s11602_s1 + $0xe8] sm:$0xff] (!%p138_p2)  }
   0xa   : > { %8155 = vmatprep.subr.bf16.mxu1 (!%p138_p2), %v8972_v5  ;;  %v8980_v13 = vld [vmem:[%s11602_s1 + $0x58] sm:$0xff] (!%p138_p2)   ;;  %v8984_v17 = vld [vmem:[%s11602_s1 + $0x60] sm:$0xff] (!%p138_p2)   ;;  %v8988_v21 = vld [vmem:[%s11602_s1 + $0x68] sm:$0xff] (!%p138_p2)  }
   0xb   : > { %v8981_v14 = vld [vmem:[%s11602_s1 + $0x98] sm:$0xff] (!%p138_p2)   ;;  %v8985_v18 = vld [vmem:[%s11602_s1 + $0xa0] sm:$0xff] (!%p138_p2)   ;;  %v8989_v22 = vld [vmem:[%s11602_s1 + $0xa8] sm:$0xff] (!%p138_p2)  }
   0xc   : > { %8116 = vmatpush3.bf16.msra.mxu0 (!%p138_p2), %v8973_v6  ;;  %v8982_v15 = vld [vmem:[%s11602_s1 + $0x18] sm:$0xff] (!%p138_p2)   ;;  %v8986_v19 = vld [vmem:[%s11602_s1 + $0x20] sm:$0xff] (!%p138_p2)   ;;  %v8990_v23 = vld [vmem:[%s11602_s1 + $0x28] sm:$0xff] (!%p138_p2)  }
   0xd   : > { %8156 = vmatpush3.bf16.msra.mxu1 %v8974_v7  ;;  %8117 = vmatprep.subr.bf16.mxu0 %v8975_v8  ;;  %s11606_s13 = smov (!%p161_p3, %s6517_s13), 1  ;;  %v8991_v24 = vld [vmem:[%s11602_s1 + $0xf0] sm:$0xff]   ;;  %v8995_v28 = vld [vmem:[%s11602_s1 + $0xf8] sm:$0xff]   ;;  %v9003_v40 = vld [vmem:[%s11602_s1 + $0x140] sm:$0xff]  }
   0xe   : > { %8157 = vmatprep.subr.bf16.mxu1 %v8976_v9  ;;  %v8992_v25 = vld [vmem:[%s11602_s1 + $0x70] sm:$0xff]   ;;  %s8957_s16 = smul.u32 368, %s11606_s13  ;;  %v8996_v29 = vld [vmem:[%s11602_s1 + $0x78] sm:$0xff]   ;;  %v9004_v41 = vld [vmem:[%s11602_s1 + $0x1c0] sm:$0xff]  }
   0xf   : > { %v8993_v26 = vld [vmem:[%s11602_s1 + $0xb0] sm:$0xff]   ;;  %v8997_v30 = vld [vmem:[%s11602_s1 + $0xb8] sm:$0xff]   ;;  %v9005_v42 = vld [vmem:[%s11602_s1 + $0x100] sm:$0xff]   ;;  %s8958_s11 = smul.u32 120, %s11606_s13 }
  0x10   : > { %8118 = vmatpush3.bf16.msra.mxu0 %v8977_v10  ;;  %v8994_v27 = vld [vmem:[%s11602_s1 + $0x30] sm:$0xff]   ;;  %s9705_s27 = scalar_lea.vmem %s11601_s0, %s8957_s16  ;;  %v8998_v31 = vld [vmem:[%s11602_s1 + $0x38] sm:$0xff]   ;;  %v9006_v43 = vld [vmem:[%s11602_s1 + $0x180] sm:$0xff]  }
  0x11   : > { %8158 = vmatpush3.bf16.msra.mxu1 %v8978_v11  ;;  %8119 = vmatprep.subr.bf16.mxu0 %v8979_v12  ;;  %v212_v32 = vld [vmem:[%s9705_s27 + $0x50] sm:$0xff]  ;;  %v9715_v33 = vld [vmem:[%s9705_s27 + $0x58] sm:$0xff]  ;;  %v172_v34 = vld [vmem:[%s9705_s27] sm:$0xff]  ;;  %s11135_s28 = scalar_lea.vmem %s11604_s3, %s8958_s11 }
  0x12   : > { %8159 = vmatprep.subr.bf16.mxu1 %v8980_v13  ;;  %v6556_v35 = vcombine.low %v212_v32, %v9715_v33  ;;  %v6557_v36 = vcombine.high %v212_v32, %v9715_v33  ;;  %v9721_v37 = vld [vmem:[%s9705_s27 + $0x8] sm:$0xff]  ;;  %v9750_v48 = vld [vmem:[%s9705_s27 + $0x60] sm:$0xff]  ;;  %v9760_v51 = vld [vmem:[%s9705_s27 + $0x10] sm:$0xff] }
  0x13   : > { %v6580_v38 = vcombine.low %v172_v34, %v9721_v37  ;;  %v6581_v39 = vcombine.high %v172_v34, %v9721_v37  ;;  %v9007_v44 = vld [vmem:[%s11602_s1 + $0x148] sm:$0xff]   ;;  %v9763_v52 = vld [vmem:[%s9705_s27 + $0x18] sm:$0xff]  ;;  %v6748_v54 = vcombine.low %v9715_v33, %v9750_v48  ;;  %v9015_v57 = vld [vmem:[%s11602_s1 + $0x150] sm:$0xff]  }
  0x14   : > { %8120 = vmatpush3.bf16.msra.mxu0 %v8981_v14  ;;  %421 = vmatprep.mubr.bf16.mxu0 %v6557_v36  ;;  %v9008_v45 = vld [vmem:[%s11602_s1 + $0x1c8] sm:$0xff]   ;;  %v9773_v55 = vcombine.high %v9760_v51, %v9763_v52  ;;  %v9777_v56 = vcombine.low %v9760_v51, %v9763_v52  ;;  %v9016_v58 = vld [vmem:[%s11602_s1 + $0x1d0] sm:$0xff]   ;;  %v9019_v61 = vld [vmem:[%s11602_s1 + $0x158] sm:$0xff]  }
  0x15   : > { %8160 = vmatpush3.bf16.msra.mxu1 %v8982_v15  ;;  %8121 = vmatprep.subr.bf16.mxu0 %v8983_v16  ;;  %v9009_v46 = vld [vmem:[%s11602_s1 + $0x108] sm:$0xff]   ;;  %v9017_v59 = vld [vmem:[%s11602_s1 + $0x110] sm:$0xff]   ;;  %v9020_v62 = vld [vmem:[%s11602_s1 + $0x1d8] sm:$0xff]  }
  0x16   : > { %8161 = vmatprep.subr.bf16.mxu1 %v8984_v17  ;;  %622 = vmatprep.mubr.bf16.mxu1 %v6581_v39  ;;  %v9010_v47 = vld [vmem:[%s11602_s1 + $0x188] sm:$0xff]   ;;  %v9018_v60 = vld [vmem:[%s11602_s1 + $0x190] sm:$0xff]   ;;  %v9021_v63 = vld [vmem:[%s11602_s1 + $0x118] sm:$0xff]  }
  0x17   : > { %v9753_v49 = vld [vmem:[%s9705_s27 + $0x68] sm:$0xff]  ;;  %v9022_v0 = vld [vmem:[%s11602_s1 + $0x198] sm:$0xff]   ;;  %v9808_v1 = vld [vmem:[%s9705_s27 + $0x70] sm:$0xff] }
  0x18   : > { %8122 = vmatpush3.bf16.msra.mxu0 %v8985_v18  ;;  %v9757_v50 = vcombine.high %v9750_v48, %v9753_v49  ;;  %v9767_v53 = vcombine.low %v9750_v48, %v9753_v49  ;;  %v9811_v2 = vld [vmem:[%s9705_s27 + $0x78] sm:$0xff]  ;;  %v9814_v3 = vld [vmem:[%s9705_s27 + $0x20] sm:$0xff]  ;;  %v9817_v4 = vld [vmem:[%s9705_s27 + $0x28] sm:$0xff] }
  0x19   : > { %8162 = vmatpush3.bf16.msra.mxu1 %v8986_v19  ;;  %8123 = vmatprep.subr.bf16.mxu0 %v8987_v20  ;;  %v9821_v5 = vcombine.high %v9808_v1, %v9811_v2  ;;  %v9825_v6 = vcombine.high %v9814_v3, %v9817_v4  ;;  %v9829_v7 = vcombine.low %v9808_v1, %v9811_v2  ;;  %v9027_v9 = vld [vmem:[%s11602_s1 + $0x160] sm:$0xff]   ;;  %v9031_v13 = vld [vmem:[%s11602_s1 + $0x168] sm:$0xff]   ;;  %v9870_v19 = vld [vmem:[%s9705_s27 + $0x30] sm:$0xff] }
  0x1a   : > { %8163 = vmatprep.subr.bf16.mxu1 %v8988_v21  ;;  %v9833_v8 = vcombine.low %v9814_v3, %v9817_v4  ;;  %v9028_v10 = vld [vmem:[%s11602_s1 + $0x1e0] sm:$0xff]   ;;  %v9032_v14 = vld [vmem:[%s11602_s1 + $0x1e8] sm:$0xff]   ;;  %v9877_v21 = vld [vmem:[%s9705_s27 + $0x38] sm:$0xff] }
  0x1b   : > { %v9029_v11 = vld [vmem:[%s11602_s1 + $0x120] sm:$0xff]   ;;  %v9033_v15 = vld [vmem:[%s11602_s1 + $0x128] sm:$0xff]   ;;  %v9045_v32 = vld [vmem:[%s11602_s1 + $0x138] sm:$0xff]  }
  0x1c   : > { %8124 = vmatpush3.bf16.msra.mxu0 %v8989_v22  ;;  %v9030_v12 = vld [vmem:[%s11602_s1 + $0x1a0] sm:$0xff]   ;;  %v9034_v16 = vld [vmem:[%s11602_s1 + $0x1a8] sm:$0xff]   ;;  %v9046_v34 = vld [vmem:[%s11602_s1 + $0x1b8] sm:$0xff]  }
  0x1d   : > { %8164 = vmatpush3.bf16.msra.mxu1 %v8990_v23  ;;  %8125 = vmatprep.subr.bf16.mxu0 %v8991_v24  ;;  %v9864_v17 = vld [vmem:[%s9705_s27 + $0x80] sm:$0xff]  ;;  %v9867_v18 = vld [vmem:[%s9705_s27 + $0x88] sm:$0xff]  ;;  %v9885_v23 = vcombine.high %v9870_v19, %v9877_v21  ;;  %v9889_v24 = vcombine.low %v9870_v19, %v9877_v21 }
  0x1e   : > { %8165 = vmatprep.subr.bf16.mxu1 %v8992_v25  ;;  %v9874_v20 = vcombine.high %v9864_v17, %v9867_v18  ;;  %v9881_v22 = vcombine.low %v9864_v17, %v9867_v18  ;;  %v9039_v25 = vld [vmem:[%s11602_s1 + $0x170] sm:$0xff]   ;;  %v9923_v36 = vld [vmem:[%s9705_s27 + $0xa8] sm:$0xff] }
  0x20   : > { %8126 = vmatpush3.bf16.msra.mxu0 %v8993_v26  ;;  %v9040_v26 = vld [vmem:[%s11602_s1 + $0x1f0] sm:$0xff]  }
  0x21   : > { %8166 = vmatpush3.bf16.msra.mxu1 %v8994_v27  ;;  %8127 = vmatprep.subr.bf16.mxu0 %v8995_v28  ;;  %v6693_v27 = vcombine.high %v9721_v37, %v9760_v51  ;;  %v9041_v28 = vld [vmem:[%s11602_s1 + $0x130] sm:$0xff]  }
  0x22   : > { %8167 = vmatprep.subr.bf16.mxu1 %v8996_v29  ;;  %v9042_v29 = vld [vmem:[%s11602_s1 + $0x1b0] sm:$0xff]  }
  0x24   : > { %8128 = vmatpush3.bf16.msra.mxu0 %v8997_v30  ;;  %v9043_v30 = vld [vmem:[%s11602_s1 + $0x178] sm:$0xff]  }
  0x25   : > { %8168 = vmatpush3.bf16.msra.mxu1 %v8998_v31  ;;  %8193 = vmatprep.subr.bf16.mxu0 %v9003_v40  ;;  %v9044_v31 = vld [vmem:[%s11602_s1 + $0x1f8] sm:$0xff]   ;;  %v6692_v40 = vcombine.low %v9721_v37, %v9760_v51  ;;  %v9054_v37 = vld [vmem:[%s11602_s1 + $0x280] sm:$0xff]   ;;  %v9058_v51 = vld [vmem:[%s11602_s1 + $0x288] sm:$0xff]  }
  0x26   : > { %8233 = vmatprep.subr.bf16.mxu1 %v9004_v41  ;;  %v9051_v41 = vld [vmem:[%s11602_s1 + $0x240] sm:$0xff]  }
  0x27   : > { %422 = vmatmul.mubr.bf16.vlgmr.msra.gmra.mrb[0].mxu0 %v6556_v35  ;;  %v655_v35 = vld [vmem:[%s9705_s27 + $0xa0] sm:$0xff] }
  0x28   : > { %623 = vmatmul.mubr.bf16.vlgmr.msra.gmra.mrb[0].mxu1 %v6580_v38  ;;  %8194 = vmatpush3.bf16.msra.mxu0 %v9005_v42  ;;  %v6636_v38 = vcombine.low %v655_v35, %v9923_v36  ;;  %v6637_v39 = vcombine.high %v655_v35, %v9923_v36  ;;  %v9052_v42 = vld [vmem:[%s11602_s1 + $0x2c0] sm:$0xff]  }
  0x29   : > { %8234 = vmatpush3.bf16.msra.mxu1 %v9006_v43  ;;  %8195 = vmatprep.subr.bf16.mxu0 %v9007_v44  ;;  %v6695_v43 = vcombine.high %v9763_v52, %v9814_v3  ;;  %v9053_v44 = vld [vmem:[%s11602_s1 + $0x200] sm:$0xff]  }
  0x2a   : > { %8235 = vmatprep.subr.bf16.mxu1 %v9008_v45  ;;  %429 = vmatprep.mubr.bf16.mxu0 %v9757_v50  ;;  %v9055_v45 = vld [vmem:[%s11602_s1 + $0x248] sm:$0xff]  }
  0x2b   : > { %630 = vmatprep.mubr.bf16.mxu1 %v9773_v55 }
  0x2c   : > { %8196 = vmatpush3.bf16.msra.mxu0 %v9009_v46  ;;  %v9056_v46 = vld [vmem:[%s11602_s1 + $0x2c8] sm:$0xff]  }
  0x2d   : > { %8236 = vmatpush3.bf16.msra.mxu1 %v9010_v47  ;;  %8197 = vmatprep.subr.bf16.mxu0 %v9015_v57  ;;  %v9057_v47 = vld [vmem:[%s11602_s1 + $0x208] sm:$0xff]   ;;  %v9956_v57 = vld [vmem:[%s9705_s27 + $0xb0] sm:$0xff] }
  0x2e   : > { %8237 = vmatprep.subr.bf16.mxu1 %v9016_v58  ;;  %v9959_v58 = vld [vmem:[%s9705_s27 + $0xb8] sm:$0xff] }
  0x2f   : > { %430 = vmatmul.mubr.bf16.gmra.mrb[4].mxu0 %v9767_v53 }
  0x30   : > { %631 = vmatmul.mubr.bf16.gmra.mrb[4].mxu1 %v9777_v56  ;;  %8198 = vmatpush3.bf16.msra.mxu0 %v9017_v59  ;;  %v9963_v59 = vcombine.high %v9956_v57, %v9959_v58 }
  0x31   : > { %8238 = vmatpush3.bf16.msra.mxu1 %v9018_v60  ;;  %8199 = vmatprep.subr.bf16.mxu0 %v9019_v61  ;;  %v9967_v60 = vcombine.low %v9956_v57, %v9959_v58  ;;  %v9062_v61 = vld [vmem:[%s11602_s1 + $0x250] sm:$0xff]  }
  0x32   : > { %8239 = vmatprep.subr.bf16.mxu1 %v9020_v62  ;;  %437 = vmatprep.mubr.bf16.mxu0 %v9821_v5  ;;  %v6694_v62 = vcombine.low %v9763_v52, %v9814_v3  ;;  %v9066_v52 = vld [vmem:[%s11602_s1 + $0x290] sm:$0xff]   ;;  %v9067_v3 = vld [vmem:[%s11602_s1 + $0x258] sm:$0xff]  }
  0x33   : > { %638 = vmatprep.mubr.bf16.mxu1 %v9825_v6 }
  0x34   : > { %8200 = vmatpush3.bf16.msra.mxu0 %v9021_v63  ;;  %v9063_v63 = vld [vmem:[%s11602_s1 + $0x2d0] sm:$0xff]  }
  0x35   : > { %8240 = vmatpush3.bf16.msra.mxu1 %v9022_v0  ;;  %8201 = vmatprep.subr.bf16.mxu0 %v9027_v9  ;;  %v6697_v0 = vcombine.high %v9817_v4, %v9870_v19  ;;  %v9065_v9 = vld [vmem:[%s11602_s1 + $0x210] sm:$0xff]  }
  0x36   : > { %8241 = vmatprep.subr.bf16.mxu1 %v9028_v10  ;;  %v9068_v10 = vld [vmem:[%s11602_s1 + $0x2d8] sm:$0xff]  }
  0x37   : > { %438 = vmatmul.mubr.bf16.gmra.mrb[8].mxu0 %v9829_v7 }
  0x38   : > { %639 = vmatmul.mubr.bf16.gmra.mrb[8].mxu1 %v9833_v8  ;;  %8202 = vmatpush3.bf16.msra.mxu0 %v9029_v11  ;;  %v9069_v11 = vld [vmem:[%s11602_s1 + $0x218] sm:$0xff]  }
  0x39   : > { %8242 = vmatpush3.bf16.msra.mxu1 %v9030_v12  ;;  %8203 = vmatprep.subr.bf16.mxu0 %v9031_v13  ;;  %v9070_v12 = vld [vmem:[%s11602_s1 + $0x298] sm:$0xff]   ;;  %v10000_v13 = vld [vmem:[%s9705_s27 + $0xc0] sm:$0xff] }
  0x3a   : > { %8243 = vmatprep.subr.bf16.mxu1 %v9032_v14  ;;  %445 = vmatprep.mubr.bf16.mxu0 %v9874_v20  ;;  %v10003_v14 = vld [vmem:[%s9705_s27 + $0xc8] sm:$0xff] }
  0x3b   : > { %646 = vmatprep.mubr.bf16.mxu1 %v9885_v23 }
  0x3c   : > { %8204 = vmatpush3.bf16.msra.mxu0 %v9033_v15  ;;  %v10007_v15 = vcombine.high %v10000_v13, %v10003_v14 }
  0x3d   : > { %8244 = vmatpush3.bf16.msra.mxu1 %v9034_v16  ;;  %8205 = vmatprep.subr.bf16.mxu0 %v9039_v25  ;;  %v10011_v16 = vcombine.low %v10000_v13, %v10003_v14  ;;  %v9074_v25 = vld [vmem:[%s11602_s1 + $0x260] sm:$0xff]  }
  0x3e   : > { %8245 = vmatprep.subr.bf16.mxu1 %v9040_v26  ;;  %v6696_v26 = vcombine.low %v9817_v4, %v9870_v19  ;;  %v9078_v4 = vld [vmem:[%s11602_s1 + $0x2a0] sm:$0xff]   ;;  %v9079_v19 = vld [vmem:[%s11602_s1 + $0x268] sm:$0xff]  }
  0x3f   : > { %446 = vmatmul.mubr.bf16.gmra.mrb[12].mxu0 %v9881_v22 }
  0x40   : > { %647 = vmatmul.mubr.bf16.gmra.mrb[12].mxu1 %v9889_v24  ;;  %8206 = vmatpush3.bf16.msra.mxu0 %v9041_v28  ;;  %v9077_v28 = vld [vmem:[%s11602_s1 + $0x220] sm:$0xff]  }
  0x41   : > { %8246 = vmatpush3.bf16.msra.mxu1 %v9042_v29  ;;  %1114 = vmatprep.mubr.bf16.mxu1 %v6693_v27  ;;  %v9075_v27 = vld [vmem:[%s11602_s1 + $0x2e0] sm:$0xff]   ;;  %v9080_v29 = vld [vmem:[%s11602_s1 + $0x2e8] sm:$0xff]  }
  0x42   : > { %8207 = vmatprep.subr.bf16.mxu0 %v9043_v30  ;;  %8247 = vmatprep.subr.bf16.mxu1 %v9044_v31  ;;  %v9081_v30 = vld [vmem:[%s11602_s1 + $0x228] sm:$0xff]  }
  0x43   : > { %864 = vmatprep.mubr.bf16.mxu0 %v6637_v39  ;;  %v9082_v31 = vld [vmem:[%s11602_s1 + $0x2a8] sm:$0xff]   ;;  %v10056_v39 = vld [vmem:[%s9705_s27 + $0x40] sm:$0xff] }
  0x44   : > { %8208 = vmatpush3.bf16.msra.mxu0 %v9045_v32  ;;  %v10042_v32 = vld [vmem:[%s9705_s27 + $0xd0] sm:$0xff] }
  0x45   : > { %8248 = vmatpush3.bf16.msra.mxu1 %v9046_v34  ;;  %8273 = vmatprep.subr.bf16.mxu0 %v9051_v41  ;;  %v10045_v34 = vld [vmem:[%s9705_s27 + $0xd8] sm:$0xff]  ;;  %v9086_v41 = vld [vmem:[%s11602_s1 + $0x270] sm:$0xff]  }
  0x46   : > { %8313 = vmatprep.subr.bf16.mxu1 %v9052_v42  ;;  %v10049_v35 = vcombine.high %v10042_v32, %v10045_v34  ;;  %v6698_v42 = vcombine.low %v9877_v21, %v10056_v39 }
  0x47   : > { %865 = vmatmul.mubr.bf16.vlgmr.msra.gmra.mrb[16].mxu0 %v6636_v38  ;;  %v10053_v38 = vcombine.low %v10042_v32, %v10045_v34 }
  0x48   : > { %1115 = vmatmul.mubr.bf16.vlgmr.msra.gmra.mrb[16].mxu1 %v6692_v40  ;;  %8274 = vmatpush3.bf16.msra.mxu0 %v9053_v44  ;;  %v6699_v40 = vcombine.high %v9877_v21, %v10056_v39  ;;  %v6749_v44 = vcombine.high %v9715_v33, %v9750_v48  ;;  %v9090_v21 = vld [vmem:[%s11602_s1 + $0x2b0] sm:$0xff]   ;;  %v9105_v33 = vld [vmem:[%s11602_s1 + $0x308] sm:$0xff]  }
  0x49   : > { %8314 = vmatpush3.bf16.msra.mxu1 %v9054_v37  ;;  %1122 = vmatprep.mubr.bf16.mxu1 %v6695_v43  ;;  %v9087_v43 = vld [vmem:[%s11602_s1 + $0x2f0] sm:$0xff]   ;;  %v9106_v48 = vld [vmem:[%s11602_s1 + $0x388] sm:$0xff]  }
  0x4a   : > { %8275 = vmatprep.subr.bf16.mxu0 %v9055_v45  ;;  %8315 = vmatprep.subr.bf16.mxu1 %v9056_v46  ;;  %v9089_v37 = vld [vmem:[%s11602_s1 + $0x230] sm:$0xff]   ;;  %v6805_v45 = vcombine.high %v9923_v36, %v9956_v57  ;;  %v9091_v46 = vld [vmem:[%s11602_s1 + $0x278] sm:$0xff]  }
  0x4b   : > { %872 = vmatprep.mubr.bf16.mxu0 %v9963_v59 }
  0x4c   : > { %8276 = vmatpush3.bf16.msra.mxu0 %v9057_v47  ;;  %v9092_v47 = vld [vmem:[%s11602_s1 + $0x2f8] sm:$0xff]  }
  0x4d   : > { %8316 = vmatpush3.bf16.msra.mxu1 %v9058_v51  ;;  %8277 = vmatprep.subr.bf16.mxu0 %v9062_v61  ;;  %v9093_v51 = vld [vmem:[%s11602_s1 + $0x238] sm:$0xff]  }
  0x4e   : > { %8317 = vmatprep.subr.bf16.mxu1 %v9063_v63  ;;  %v9094_v61 = vld [vmem:[%s11602_s1 + $0x2b8] sm:$0xff]   ;;  %v9099_v63 = vld [vmem:[%s11602_s1 + $0x340] sm:$0xff]  }
  0x4f   : > { %873 = vmatmul.mubr.bf16.gmra.mrb[20].mxu0 %v9967_v60 }
  0x50   : > { %1123 = vmatmul.mubr.bf16.gmra.mrb[20].mxu1 %v6694_v62  ;;  %8278 = vmatpush3.bf16.msra.mxu0 %v9065_v9  ;;  %v6804_v62 = vcombine.low %v9923_v36, %v9956_v57  ;;  %v6751_v9 = vcombine.high %v9753_v49, %v9808_v1  ;;  %v6807_v36 = vcombine.high %v9959_v58, %v10000_v13  ;;  %v9102_v57 = vld [vmem:[%s11602_s1 + $0x380] sm:$0xff]  }
  0x51   : > { %8318 = vmatpush3.bf16.msra.mxu1 %v9066_v52  ;;  %1130 = vmatprep.mubr.bf16.mxu1 %v6697_v0  ;;  %v9100_v0 = vld [vmem:[%s11602_s1 + $0x3c0] sm:$0xff]  }
  0x52   : > { %8279 = vmatprep.subr.bf16.mxu0 %v9067_v3  ;;  %8319 = vmatprep.subr.bf16.mxu1 %v9068_v10  ;;  %v9101_v52 = vld [vmem:[%s11602_s1 + $0x300] sm:$0xff]   ;;  %v9103_v3 = vld [vmem:[%s11602_s1 + $0x348] sm:$0xff]  }
  0x53   : > { %880 = vmatprep.mubr.bf16.mxu0 %v10007_v15  ;;  %v9104_v10 = vld [vmem:[%s11602_s1 + $0x3c8] sm:$0xff]  }
  0x54   : > { %8280 = vmatpush3.bf16.msra.mxu0 %v9069_v11  ;;  %v9110_v11 = vld [vmem:[%s11602_s1 + $0x350] sm:$0xff]  }
  0x55   : > { %8320 = vmatpush3.bf16.msra.mxu1 %v9070_v12  ;;  %8281 = vmatprep.subr.bf16.mxu0 %v9074_v25  ;;  %v6806_v12 = vcombine.low %v9959_v58, %v10000_v13  ;;  %v9111_v25 = vld [vmem:[%s11602_s1 + $0x3d0] sm:$0xff]   ;;  %v9115_v13 = vld [vmem:[%s11602_s1 + $0x358] sm:$0xff]  }
  0x56   : > { %8321 = vmatprep.subr.bf16.mxu1 %v9075_v27  ;;  %v9114_v58 = vld [vmem:[%s11602_s1 + $0x390] sm:$0xff]   ;;  %v9116_v27 = vld [vmem:[%s11602_s1 + $0x3d8] sm:$0xff]  }
  0x57   : > { %881 = vmatmul.mubr.bf16.gmra.mrb[24].mxu0 %v10011_v16 }
  0x58   : > { %1131 = vmatmul.mubr.bf16.gmra.mrb[24].mxu1 %v6696_v26  ;;  %8282 = vmatpush3.bf16.msra.mxu0 %v9077_v28  ;;  %v6753_v26 = vcombine.high %v9811_v2, %v9864_v17  ;;  %v9117_v28 = vld [vmem:[%s11602_s1 + $0x318] sm:$0xff]  }
  0x59   : > { %8322 = vmatpush3.bf16.msra.mxu1 %v9078_v4  ;;  %8283 = vmatprep.subr.bf16.mxu0 %v9079_v19  ;;  %v9118_v4 = vld [vmem:[%s11602_s1 + $0x398] sm:$0xff]   ;;  %v6752_v19 = vcombine.low %v9811_v2, %v9864_v17  ;;  %v9125_v2 = vld [vmem:[%s11602_s1 + $0x320] sm:$0xff]  }
  0x5a   : > { %8323 = vmatprep.subr.bf16.mxu1 %v9080_v29  ;;  %888 = vmatprep.mubr.bf16.mxu0 %v10049_v35  ;;  %v9122_v29 = vld [vmem:[%s11602_s1 + $0x360] sm:$0xff]  }
  0x5b   : > { %1138 = vmatprep.mubr.bf16.mxu1 %v6699_v40  ;;  %v9126_v17 = vld [vmem:[%s11602_s1 + $0x3a0] sm:$0xff]   ;;  %v9129_v40 = vld [vmem:[%s11602_s1 + $0x328] sm:$0xff]  }
  0x5c   : > { %8284 = vmatpush3.bf16.msra.mxu0 %v9081_v30  ;;  %v6808_v30 = vcombine.low %v10003_v14, %v10042_v32 }
  0x5d   : > { %8324 = vmatpush3.bf16.msra.mxu1 %v9082_v31  ;;  %8285 = vmatprep.subr.bf16.mxu0 %v9086_v41  ;;  %v9123_v31 = vld [vmem:[%s11602_s1 + $0x3e0] sm:$0xff]   ;;  %v9130_v41 = vld [vmem:[%s11602_s1 + $0x3a8] sm:$0xff]  }
  0x5e   : > { %8325 = vmatprep.subr.bf16.mxu1 %v9087_v43  ;;  %v10189_v43 = vld [vmem:[%s9705_s27 + $0xe0] sm:$0xff] }
  0x5f   : > { %889 = vmatmul.mubr.bf16.gmra.mrb[28].mxu0 %v10053_v38 }
  0x60   : > { %1139 = vmatmul.mubr.bf16.gmra.mrb[28].mxu1 %v6698_v42  ;;  %8286 = vmatpush3.bf16.msra.mxu0 %v9089_v37  ;;  %v10186_v42 = vld [vmem:[%s9705_s27 + $0x90] sm:$0xff] }
  0x61   : > { %8326 = vmatpush3.bf16.msra.mxu1 %v9090_v21  ;;  %1364 = vmatprep.mubr.bf16.mxu0 %v6749_v44  ;;  %v6755_v44 = vcombine.high %v9867_v18, %v10186_v42  ;;  %v6754_v37 = vcombine.low %v9867_v18, %v10186_v42  ;;  %v9134_v21 = vld [vmem:[%s11602_s1 + $0x370] sm:$0xff]  }
  0x62   : > { %8287 = vmatprep.subr.bf16.mxu0 %v9091_v46  ;;  %1614 = vmatprep.mubr.bf16.mxu1 %v6805_v45  ;;  %v6811_v45 = vcombine.high %v10045_v34, %v10189_v43  ;;  %v6810_v46 = vcombine.low %v10045_v34, %v10189_v43  ;;  %v9137_v18 = vld [vmem:[%s11602_s1 + $0x330] sm:$0xff]   ;;  %v9139_v34 = vld [vmem:[%s11602_s1 + $0x378] sm:$0xff]  }
  0x63   : > { %8327 = vmatprep.subr.bf16.mxu1 %v9092_v47  ;;  %v9135_v47 = vld [vmem:[%s11602_s1 + $0x3f0] sm:$0xff]  }
  0x64   : > { %8288 = vmatpush3.bf16.msra.mxu0 %v9093_v51  ;;  %v9138_v51 = vld [vmem:[%s11602_s1 + $0x3b0] sm:$0xff]  }
  0x65   : > { %8328 = vmatpush3.bf16.msra.mxu1 %v9094_v61  ;;  %8353 = vmatprep.subr.bf16.mxu0 %v9099_v63  ;;  %v9140_v61 = vld [vmem:[%s11602_s1 + $0x3f8] sm:$0xff]  }
  0x66   : > { %8393 = vmatprep.subr.bf16.mxu1 %v9100_v0  ;;  %v9142_v63 = vld [vmem:[%s11602_s1 + $0x3b8] sm:$0xff]   ;;  %v9143_v0 = vld [vmem:[%s11602_s1 + $0x440] sm:$0xff]  }
  0x67   : > { %1365 = vmatmul.mubr.bf16.vlgmr.msra.gmra.mrb[32].mxu0 %v6748_v54  ;;  %v6750_v54 = vcombine.low %v9753_v49, %v9808_v1  ;;  %v9113_v49 = vld [vmem:[%s11602_s1 + $0x310] sm:$0xff]   ;;  %v6809_v1 = vcombine.high %v10003_v14, %v10042_v32  ;;  %v9127_v14 = vld [vmem:[%s11602_s1 + $0x368] sm:$0xff]  }
  0x68   : > { %1615 = vmatmul.mubr.bf16.vlgmr.msra.gmra.mrb[32].mxu1 %v6804_v62  ;;  %8354 = vmatpush3.bf16.msra.mxu0 %v9101_v52  ;;  %v9128_v32 = vld [vmem:[%s11602_s1 + $0x3e8] sm:$0xff]   ;;  %v9141_v62 = vld [vmem:[%s11602_s1 + $0x338] sm:$0xff]  }
  0x69   : > { %8394 = vmatpush3.bf16.msra.mxu1 %v9102_v57  ;;  %1372 = vmatprep.mubr.bf16.mxu0 %v6751_v9  ;;  %v9144_v9 = vld [vmem:[%s11602_s1 + $0x540] sm:$0xff]   ;;  %v9147_v52 = vld [vmem:[%s11602_s1 + $0x448] sm:$0xff]  }
  0x6a   : > { %8355 = vmatprep.subr.bf16.mxu0 %v9103_v3  ;;  %1622 = vmatprep.mubr.bf16.mxu1 %v6807_v36  ;;  %v9148_v36 = vld [vmem:[%s11602_s1 + $0x548] sm:$0xff]   ;;  %v9152_v3 = vld [vmem:[%s11602_s1 + $0x550] sm:$0xff]  }
  0x6b   : > { %8395 = vmatprep.subr.bf16.mxu1 %v9104_v10  ;;  %v9149_v57 = vld [vmem:[%s11602_s1 + $0x408] sm:$0xff]   ;;  %v9155_v10 = vld [vmem:[%s11602_s1 + $0x458] sm:$0xff]  }
  0x6c   : > { %8356 = vmatpush3.bf16.msra.mxu0 %v9105_v33  ;;  %v9156_v33 = vld [vmem:[%s11602_s1 + $0x558] sm:$0xff]  }
  0x6d   : > { %8396 = vmatpush3.bf16.msra.mxu1 %v9106_v48  ;;  %8357 = vmatprep.subr.bf16.mxu0 %v9110_v11  ;;  %v9157_v48 = vld [vmem:[%s11602_s1 + $0x418] sm:$0xff]   ;;  %v9163_v11 = vld [vmem:[%s11602_s1 + $0x468] sm:$0xff]  }
  0x6e   : > { %8397 = vmatprep.subr.bf16.mxu1 %v9111_v25  ;;  %v9165_v25 = vld [vmem:[%s11602_s1 + $0x428] sm:$0xff]  }
  0x6f   : > { %1373 = vmatmul.mubr.bf16.gmra.mrb[36].mxu0 %v6750_v54  ;;  %v9160_v54 = vld [vmem:[%s11602_s1 + $0x560] sm:$0xff]  }
  0x70   : > { %1623 = vmatmul.mubr.bf16.gmra.mrb[36].mxu1 %v6806_v12  ;;  %8358 = vmatpush3.bf16.msra.mxu0 %v9113_v49  ;;  %v9164_v12 = vld [vmem:[%s11602_s1 + $0x568] sm:$0xff]  }
  0x71   : > { %8398 = vmatpush3.bf16.msra.mxu1 %v9114_v58  ;;  %1380 = vmatprep.mubr.bf16.mxu0 %v6753_v26  ;;  %v1912_v26 = vld [vmem:[%s9705_s27 + $0x98] sm:$0xff] }
  0x72   : > { %8359 = vmatprep.subr.bf16.mxu0 %v9115_v13  ;;  %1630 = vmatprep.mubr.bf16.mxu1 %v6809_v1  ;;  %v6923_v58 = vcombine.high %v10186_v42, %v1912_v26  ;;  %v9170_v13 = vld [vmem:[%s11602_s1 + $0x470] sm:$0xff]  }
  0x73   : > { %8399 = vmatprep.subr.bf16.mxu1 %v9116_v27  ;;  %v9171_v27 = vld [vmem:[%s11602_s1 + $0x570] sm:$0xff]  }
  0x74   : > { %8360 = vmatpush3.bf16.msra.mxu0 %v9117_v28  ;;  %v6922_v28 = vcombine.low %v10186_v42, %v1912_v26  ;;  %v9184_v42 = vld [vmem:[%s11602_s1 + $0x580] sm:$0xff]   ;;  %v9223_v26 = vld [vmem:[%s11602_s1 + $0x648] sm:$0xff]  }
  0x75   : > { %8400 = vmatpush3.bf16.msra.mxu1 %v9118_v4  ;;  %8361 = vmatprep.subr.bf16.mxu0 %v9122_v29  ;;  %v9173_v4 = vld [vmem:[%s11602_s1 + $0x430] sm:$0xff]   ;;  %v9176_v29 = vld [vmem:[%s11602_s1 + $0x578] sm:$0xff]  }
  0x76   : > { %8401 = vmatprep.subr.bf16.mxu1 %v9123_v31  ;;  %v9178_v31 = vld [vmem:[%s11602_s1 + $0x538] sm:$0xff]  }
  0x77   : > { %1381 = vmatmul.mubr.bf16.gmra.mrb[40].mxu0 %v6752_v19  ;;  %v9175_v19 = vld [vmem:[%s11602_s1 + $0x478] sm:$0xff]  }
  0x78   : > { %1631 = vmatmul.mubr.bf16.gmra.mrb[40].mxu1 %v6808_v30  ;;  %8362 = vmatpush3.bf16.msra.mxu0 %v9125_v2  ;;  %v9177_v30 = vld [vmem:[%s11602_s1 + $0x438] sm:$0xff]   ;;  %v2464_v2 = vld [vmem:[%s9705_s27 + $0x108] sm:$0xff] }
  0x79   : > { %8402 = vmatpush3.bf16.msra.mxu1 %v9126_v17  ;;  %8363 = vmatprep.subr.bf16.mxu0 %v9127_v14  ;;  %v10340_v17 = vld [vmem:[%s9705_s27 + $0x110] sm:$0xff] }
  0x7a   : > { %8403 = vmatprep.subr.bf16.mxu1 %v9128_v32  ;;  %1388 = vmatprep.mubr.bf16.mxu0 %v6755_v44  ;;  %v7061_v14 = vcombine.low %v2464_v2, %v10340_v17  ;;  %v7062_v32 = vcombine.high %v2464_v2, %v10340_v17  ;;  %v9185_v44 = vld [vmem:[%s11602_s1 + $0x4c8] sm:$0xff]   ;;  %v9236_v2 = vld [vmem:[%s11602_s1 + $0x6e0] sm:$0xff]  }
  0x7b   : > { %1638 = vmatprep.mubr.bf16.mxu1 %v6811_v45  ;;  %v9188_v45 = vld [vmem:[%s11602_s1 + $0x588] sm:$0xff]  }
  0x7c   : > { %8364 = vmatpush3.bf16.msra.mxu0 %v9129_v40  ;;  %v9181_v40 = vld [vmem:[%s11602_s1 + $0x4c0] sm:$0xff]  }
  0x7d   : > { %8404 = vmatpush3.bf16.msra.mxu1 %v9130_v41  ;;  %8365 = vmatprep.subr.bf16.mxu0 %v9134_v21  ;;  %v9183_v41 = vld [vmem:[%s11602_s1 + $0x480] sm:$0xff]   ;;  %v9189_v21 = vld [vmem:[%s11602_s1 + $0x4d0] sm:$0xff]  }
  0x7e   : > { %8405 = vmatprep.subr.bf16.mxu1 %v9135_v47  ;;  %v9192_v47 = vld [vmem:[%s11602_s1 + $0x590] sm:$0xff]  }
  0x7f   : > { %1389 = vmatmul.mubr.bf16.gmra.mrb[44].mxu0 %v6754_v37  ;;  %v9186_v37 = vld [vmem:[%s11602_s1 + $0x5c8] sm:$0xff]  }
  0x80   : > { %1639 = vmatmul.mubr.bf16.gmra.mrb[44].mxu1 %v6810_v46  ;;  %8366 = vmatpush3.bf16.msra.mxu0 %v9137_v18  ;;  %v9191_v46 = vld [vmem:[%s11602_s1 + $0x490] sm:$0xff]   ;;  %v9193_v18 = vld [vmem:[%s11602_s1 + $0x4d8] sm:$0xff]  }
  0x81   : > { %8406 = vmatpush3.bf16.msra.mxu1 %v9138_v51  ;;  %8367 = vmatprep.subr.bf16.mxu0 %v9139_v34  ;;  %v9194_v51 = vld [vmem:[%s11602_s1 + $0x5d8] sm:$0xff]  }
  0x82   : > { %1864 = vmatprep.mubr.bf16.mxu0 %v9773_v55  ;;  %8407 = vmatprep.subr.bf16.mxu1 %v9140_v61  ;;  %v9145_v55 = vld [vmem:[%s11602_s1 + $0x400] sm:$0xff]   ;;  %v9196_v34 = vld [vmem:[%s11602_s1 + $0x598] sm:$0xff]  }
  0x83   : > { %2114 = vmatprep.mubr.bf16.mxu1 %v9757_v50  ;;  %v9146_v50 = vld [vmem:[%s11602_s1 + $0x500] sm:$0xff]  }
  0x84   : > { %8368 = vmatpush3.bf16.msra.mxu0 %v9141_v62  ;;  %v9198_v61 = vld [vmem:[%s11602_s1 + $0x5e0] sm:$0xff]  }
  0x85   : > { %8408 = vmatpush3.bf16.msra.mxu1 %v9142_v63  ;;  %8433 = vmatprep.subr.bf16.mxu0 %v9143_v0  ;;  %v9199_v62 = vld [vmem:[%s11602_s1 + $0x4a0] sm:$0xff]   ;;  %v9201_v0 = vld [vmem:[%s11602_s1 + $0x4e8] sm:$0xff]  }
  0x86   : > { %8473 = vmatprep.subr.bf16.mxu1 %v9144_v9  ;;  %v9200_v63 = vld [vmem:[%s11602_s1 + $0x5a0] sm:$0xff]   ;;  %v9202_v9 = vld [vmem:[%s11602_s1 + $0x5e8] sm:$0xff]  }
  0x87   : > { %1865 = vmatmul.mubr.bf16.vlgmr.msra.gmra.mrb[48].mxu0 %v9777_v56  ;;  %v9151_v56 = vld [vmem:[%s11602_s1 + $0x450] sm:$0xff]  }
  0x88   : > { %2115 = vmatmul.mubr.bf16.vlgmr.msra.gmra.mrb[48].mxu1 %v9767_v53  ;;  %8434 = vmatpush3.bf16.msra.mxu0 %v9145_v55  ;;  %v9150_v53 = vld [vmem:[%s11602_s1 + $0x508] sm:$0xff]  }
  0x89   : > { %8474 = vmatpush3.bf16.msra.mxu1 %v9146_v50  ;;  %8435 = vmatprep.subr.bf16.mxu0 %v9147_v52  ;;  %v9204_v55 = vld [vmem:[%s11602_s1 + $0x5a8] sm:$0xff]  }
  0x8a   : > { %1872 = vmatprep.mubr.bf16.mxu0 %v9825_v6  ;;  %8475 = vmatprep.subr.bf16.mxu1 %v9148_v36  ;;  %v9153_v6 = vld [vmem:[%s11602_s1 + $0x410] sm:$0xff]   ;;  %v2162_v50 = vld [vmem:[%s9705_s27 + $0xe8] sm:$0xff] }
  0x8b   : > { %2122 = vmatprep.mubr.bf16.mxu1 %v9821_v5  ;;  %v9154_v5 = vld [vmem:[%s11602_s1 + $0x510] sm:$0xff]   ;;  %v6979_v52 = vcombine.high %v10189_v43, %v2162_v50  ;;  %v6978_v36 = vcombine.low %v10189_v43, %v2162_v50 }
  0x8c   : > { %8436 = vmatpush3.bf16.msra.mxu0 %v9149_v57  ;;  %v9207_v57 = vld [vmem:[%s11602_s1 + $0x4f0] sm:$0xff]  }
  0x8d   : > { %8476 = vmatpush3.bf16.msra.mxu1 %v9150_v53  ;;  %8437 = vmatprep.subr.bf16.mxu0 %v9151_v56  ;;  %v9208_v53 = vld [vmem:[%s11602_s1 + $0x5f0] sm:$0xff]  }
  0x8e   : > { %8477 = vmatprep.subr.bf16.mxu1 %v9152_v3  ;;  %v9209_v56 = vld [vmem:[%s11602_s1 + $0x4b0] sm:$0xff]   ;;  %v9211_v3 = vld [vmem:[%s11602_s1 + $0x4f8] sm:$0xff]  }
  0x8f   : > { %1873 = vmatmul.mubr.bf16.gmra.mrb[52].mxu0 %v9833_v8  ;;  %v9159_v8 = vld [vmem:[%s11602_s1 + $0x460] sm:$0xff]   ;;  %v9210_v43 = vld [vmem:[%s11602_s1 + $0x5b0] sm:$0xff]  }
  0x90   : > { %2123 = vmatmul.mubr.bf16.gmra.mrb[52].mxu1 %v9829_v7  ;;  %8438 = vmatpush3.bf16.msra.mxu0 %v9153_v6  ;;  %v9158_v7 = vld [vmem:[%s11602_s1 + $0x518] sm:$0xff]  }
  0x91   : > { %8478 = vmatpush3.bf16.msra.mxu1 %v9154_v5  ;;  %8439 = vmatprep.subr.bf16.mxu0 %v9155_v10  ;;  %v9212_v6 = vld [vmem:[%s11602_s1 + $0x5f8] sm:$0xff]  }
  0x92   : > { %1880 = vmatprep.mubr.bf16.mxu0 %v9885_v23  ;;  %8479 = vmatprep.subr.bf16.mxu1 %v9156_v33  ;;  %v9161_v23 = vld [vmem:[%s11602_s1 + $0x420] sm:$0xff]   ;;  %v9213_v5 = vld [vmem:[%s11602_s1 + $0x4b8] sm:$0xff]   ;;  %v2429_v33 = vld [vmem:[%s9705_s27 + $0xf0] sm:$0xff] }
  0x93   : > { %2130 = vmatprep.mubr.bf16.mxu1 %v9874_v20  ;;  %v9162_v20 = vld [vmem:[%s11602_s1 + $0x520] sm:$0xff]   ;;  %v9214_v10 = vld [vmem:[%s11602_s1 + $0x5b8] sm:$0xff]  }
  0x94   : > { %8440 = vmatpush3.bf16.msra.mxu0 %v9157_v48  ;;  %v10450_v48 = vld [vmem:[%s9705_s27 + $0xf8] sm:$0xff] }
  0x95   : > { %8480 = vmatpush3.bf16.msra.mxu1 %v9158_v7  ;;  %8441 = vmatprep.subr.bf16.mxu0 %v9159_v8  ;;  %v2793_v7 = vld [vmem:[%s9705_s27 + $0x120] sm:$0xff]  ;;  %v10454_v8 = vld [vmem:[%s9705_s27 + $0x128] sm:$0xff] }
  0x96   : > { %8481 = vmatprep.subr.bf16.mxu1 %v9160_v54  ;;  %v7079_v54 = vcombine.low %v2429_v33, %v10450_v48 }
  0x97   : > { %1881 = vmatmul.mubr.bf16.gmra.mrb[56].mxu0 %v9889_v24  ;;  %v1662_v24 = vld [vmem:[%s9705_s27 + $0x48] sm:$0xff] }
  0x98   : > { %2131 = vmatmul.mubr.bf16.gmra.mrb[56].mxu1 %v9881_v22  ;;  %8442 = vmatpush3.bf16.msra.mxu0 %v9161_v23  ;;  %v9166_v22 = vld [vmem:[%s11602_s1 + $0x528] sm:$0xff]   ;;  %v6867_v49 = vcombine.high %v10056_v39, %v1662_v24  ;;  %v6866_v1 = vcombine.low %v10056_v39, %v1662_v24  ;;  %v9174_v39 = vld [vmem:[%s11602_s1 + $0x530] sm:$0xff]   ;;  %v7080_v23 = vcombine.high %v2429_v33, %v10450_v48  ;;  %v9222_v24 = vld [vmem:[%s11602_s1 + $0x680] sm:$0xff]  }
  0x99   : > { %8482 = vmatpush3.bf16.msra.mxu1 %v9162_v20  ;;  %8443 = vmatprep.subr.bf16.mxu0 %v9163_v11  ;;  %v7129_v20 = vcombine.low %v2793_v7, %v10454_v8  ;;  %v7130_v11 = vcombine.high %v2793_v7, %v10454_v8 }
  0x9a   : > { %8483 = vmatprep.subr.bf16.mxu1 %v9164_v12  ;;  %1888 = vmatprep.mubr.bf16.mxu0 %v6867_v49  ;;  %v9219_v12 = vld [vmem:[%s11602_s1 + $0x640] sm:$0xff]   ;;  %v9224_v49 = vld [vmem:[%s11602_s1 + $0x6c8] sm:$0xff]  }
  0x9b   : > { %2138 = vmatprep.mubr.bf16.mxu1 %v6923_v58  ;;  %v9226_v58 = vld [vmem:[%s11602_s1 + $0x688] sm:$0xff]  }
  0x9c   : > { %8444 = vmatpush3.bf16.msra.mxu0 %v9165_v25  ;;  %v9220_v25 = vld [vmem:[%s11602_s1 + $0x6c0] sm:$0xff]  }
  0x9d   : > { %8484 = vmatpush3.bf16.msra.mxu1 %v9166_v22  ;;  %8445 = vmatprep.subr.bf16.mxu0 %v9170_v13  ;;  %v9221_v22 = vld [vmem:[%s11602_s1 + $0x600] sm:$0xff]   ;;  %v9227_v13 = vld [vmem:[%s11602_s1 + $0x650] sm:$0xff]  }
  0x9e   : > { %8485 = vmatprep.subr.bf16.mxu1 %v9171_v27  ;;  %v9228_v27 = vld [vmem:[%s11602_s1 + $0x6d0] sm:$0xff]  }
  0x9f   : > { %1889 = vmatmul.mubr.bf16.gmra.mrb[60].mxu0 %v6866_v1  ;;  %v9225_v1 = vld [vmem:[%s11602_s1 + $0x608] sm:$0xff]  }
  0xa0   : > { %2139 = vmatmul.mubr.bf16.gmra.mrb[60].mxu1 %v6922_v28  ;;  %8446 = vmatpush3.bf16.msra.mxu0 %v9173_v4  ;;  %v9229_v28 = vld [vmem:[%s11602_s1 + $0x610] sm:$0xff]  }
  0xa1   : > { %8486 = vmatpush3.bf16.msra.mxu1 %v9174_v39  ;;  %8447 = vmatprep.subr.bf16.mxu0 %v9175_v19  ;;  %v9230_v4 = vld [vmem:[%s11602_s1 + $0x690] sm:$0xff]   ;;  %v9231_v39 = vld [vmem:[%s11602_s1 + $0x658] sm:$0xff]  }
  0xa2   : > { %2364 = vmatprep.mubr.bf16.mxu0 %v9963_v59  ;;  %8487 = vmatprep.subr.bf16.mxu1 %v9176_v29  ;;  %v9182_v59 = vld [vmem:[%s11602_s1 + $0x5c0] sm:$0xff]   ;;  %v9232_v19 = vld [vmem:[%s11602_s1 + $0x6d8] sm:$0xff]  }
  0xa3   : > { %2637 = vmatprep.mubr.bf16.mxu1 %v7062_v32  ;;  %v9233_v29 = vld [vmem:[%s11602_s1 + $0x618] sm:$0xff]   ;;  %v9238_v32 = vld [vmem:[%s11602_s1 + $0x6a0] sm:$0xff]  }
  0xa4   : > { %8448 = vmatpush3.bf16.msra.mxu0 %v9177_v30  ;;  %v9234_v30 = vld [vmem:[%s11602_s1 + $0x698] sm:$0xff]  }
  0xa5   : > { %8488 = vmatpush3.bf16.msra.mxu1 %v9178_v31  ;;  %8495 = vmatprep.subr.bf16.mxu0 %v9181_v40  ;;  %v9235_v31 = vld [vmem:[%s11602_s1 + $0x660] sm:$0xff]   ;;  %v9239_v40 = vld [vmem:[%s11602_s1 + $0x668] sm:$0xff]  }
  0xa6   : > { %8517 = vmatprep.subr.bf16.mxu1 %v9182_v59  ;;  %v9240_v59 = vld [vmem:[%s11602_s1 + $0x6e8] sm:$0xff]  }
  0xa7   : > { %2365 = vmatmul.mubr.bf16.vlgmr.msra.gmra.mrb[64].mxu0 %v9967_v60  ;;  %v9187_v60 = vld [vmem:[%s11602_s1 + $0x488] sm:$0xff]  }
  0xa8   : > { %2638 = vmatmul.mubr.bf16.vlgmr.msra.gmra.mrb[64].mxu1 %v7061_v14  ;;  %8496 = vmatpush3.bf16.msra.mxu0 %v9183_v41  ;;  %v9237_v14 = vld [vmem:[%s11602_s1 + $0x620] sm:$0xff]   ;;  %v9241_v41 = vld [vmem:[%s11602_s1 + $0x628] sm:$0xff]  }
  0xa9   : > { %8518 = vmatpush3.bf16.msra.mxu1 %v9184_v42  ;;  %2372 = vmatprep.mubr.bf16.mxu0 %v10007_v15  ;;  %v9190_v15 = vld [vmem:[%s11602_s1 + $0x5d0] sm:$0xff]   ;;  %v9242_v42 = vld [vmem:[%s11602_s1 + $0x6a8] sm:$0xff]  }
  0xaa   : > { %8497 = vmatprep.subr.bf16.mxu0 %v9185_v44  ;;  %8519 = vmatprep.subr.bf16.mxu1 %v9186_v37  ;;  %v9243_v44 = vld [vmem:[%s11602_s1 + $0x670] sm:$0xff]  }
  0xab   : > { %2966 = vmatprep.mubr.bf16.mxu1 %v7130_v11  ;;  %v9244_v37 = vld [vmem:[%s11602_s1 + $0x6f0] sm:$0xff]   ;;  %v9264_v11 = vld [vmem:[%s11602_s1 + $0x7c8] sm:$0xff]  }
  0xac   : > { %8498 = vmatpush3.bf16.msra.mxu0 %v9187_v60  ;;  %v9245_v60 = vld [vmem:[%s11602_s1 + $0x630] sm:$0xff]  }
  0xad   : > { %8520 = vmatpush3.bf16.msra.mxu1 %v9188_v45  ;;  %8499 = vmatprep.subr.bf16.mxu0 %v9189_v21  ;;  %v9246_v45 = vld [vmem:[%s11602_s1 + $0x6b0] sm:$0xff]   ;;  %v9247_v21 = vld [vmem:[%s11602_s1 + $0x678] sm:$0xff]  }
  0xae   : > { %8521 = vmatprep.subr.bf16.mxu1 %v9190_v15  ;;  %v9248_v15 = vld [vmem:[%s11602_s1 + $0x6f8] sm:$0xff]  }
  0xaf   : > { %2373 = vmatmul.mubr.bf16.gmra.mrb[68].mxu0 %v10011_v16  ;;  %v9195_v16 = vld [vmem:[%s11602_s1 + $0x498] sm:$0xff]  }
  0xb0   : > { %8500 = vmatpush3.bf16.msra.mxu0 %v9191_v46  ;;  %2380 = vmatprep.mubr.bf16.mxu0 %v10049_v35  ;;  %v9197_v35 = vld [vmem:[%s11602_s1 + $0x4e0] sm:$0xff]   ;;  %v9249_v46 = vld [vmem:[%s11602_s1 + $0x638] sm:$0xff]  }
  0xb1   : > { %8522 = vmatpush3.bf16.msra.mxu1 %v9192_v47  ;;  %8501 = vmatprep.subr.bf16.mxu0 %v9193_v18  ;;  %v9250_v47 = vld [vmem:[%s11602_s1 + $0x6b8] sm:$0xff]   ;;  %v2977_v18 = vld [vmem:[%s9705_s27 + $0xf0] sm:$0xcc] }
  0xb2   : > { %8523 = vmatprep.subr.bf16.mxu1 %v9194_v51  ;;  %v2979_v51 = vld [vmem:[%s9705_s27 + $0x100] sm:$0x33] }
  0xb4   : > { %8502 = vmatpush3.bf16.msra.mxu0 %v9195_v16  ;;  %v3174_v16 = vld [vmem:[%s9705_s27 + $0x108] sm:$0xcc] }
  0xb5   : > { %8524 = vmatpush3.bf16.msra.mxu1 %v9196_v34  ;;  %8503 = vmatprep.subr.bf16.mxu0 %v9197_v35  ;;  %v7180_v34 = vcombine.high %v2977_v18, %v10450_v48  ;;  %v7182_v35 = vcombine.high %v2979_v51, %v2979_v51 }
  0xb6   : > { %8525 = vmatprep.subr.bf16.mxu1 %v9198_v61  ;;  %v7179_v61 = vcombine.low %v2977_v18, %v10450_v48 }
  0xb7   : > { %2381 = vmatmul.mubr.bf16.gmra.mrb[72].mxu0 %v10053_v38  ;;  %v9203_v38 = vld [vmem:[%s11602_s1 + $0x4a8] sm:$0xff]   ;;  %v3030_v50 = vrot.slane %v7180_v34, 2 }
  0xb8   : > { %8504 = vmatpush3.bf16.msra.mxu0 %v9199_v62  ;;  %2388 = vmatprep.mubr.bf16.mxu0 %v6979_v52  ;;  %v3176_v62 = vld [vmem:[%s9705_s27 + $0x118] sm:$0x33]  ;;  %v3031_v52 = vrot.slane %v7182_v35, 2 }
  0xb9   : > { %8526 = vmatpush3.bf16.msra.mxu1 %v9200_v63  ;;  %8505 = vmatprep.subr.bf16.mxu0 %v9201_v0  ;;  %v7181_v63 = vcombine.low %v2979_v51, %v2979_v51  ;;  %v7232_v0 = vcombine.high %v3174_v16, %v10340_v17 }
  0xba   : > { %8527 = vmatprep.subr.bf16.mxu1 %v9202_v9  ;;  %v7234_v9 = vcombine.high %v3176_v62, %v3176_v62 }
  0xbc   : > { %8506 = vmatpush3.bf16.msra.mxu0 %v9203_v38  ;;  %v9257_v38 = vld [vmem:[%s11602_s1 + $0x740] sm:$0xff]  }
  0xbd   : > { %8528 = vmatpush3.bf16.msra.mxu1 %v9204_v55  ;;  %8507 = vmatprep.subr.bf16.mxu0 %v9207_v57  ;;  %v7231_v55 = vcombine.low %v3174_v16, %v10340_v17  ;;  %v9258_v57 = vld [vmem:[%s11602_s1 + $0x7c0] sm:$0xff]   ;;  %v9280_v16 = vld [vmem:[%s11602_s1 + $0x7e8] sm:$0xff]  }
  0xbe   : > { %8529 = vmatprep.subr.bf16.mxu1 %v9208_v53  ;;  %v7233_v53 = vcombine.low %v3176_v62, %v3176_v62  ;;  %v9261_v17 = vld [vmem:[%s11602_s1 + $0x700] sm:$0xff]  }
  0xbf   : > { %2389 = vmatmul.mubr.bf16.gmra.mrb[76].mxu0 %v6978_v36  ;;  %v3027_v36 = vrot.slane %v7179_v61, 2  ;;  %v9281_v61 = vld [vmem:[%s11602_s1 + $0x728] sm:$0xff]  }
  0xc0   : > { %8508 = vmatpush3.bf16.msra.mxu0 %v9209_v56  ;;  %2784 = vmatprep.mubr.bf16.mxu0 %v7080_v23  ;;  %v3028_v56 = vrot.slane %v7181_v63, 2  ;;  %v9282_v63 = vld [vmem:[%s11602_s1 + $0x7a8] sm:$0xff]  }
  0xc1   : > { %8530 = vmatpush3.bf16.msra.mxu1 %v9210_v43  ;;  %8509 = vmatprep.subr.bf16.mxu0 %v9211_v3  ;;  %v3226_v43 = vrot.slane %v7232_v0, 2  ;;  %v3227_v3 = vrot.slane %v7234_v9, 2 }
  0xc2   : > { %8531 = vmatprep.subr.bf16.mxu1 %v9212_v6  ;;  %v3223_v6 = vrot.slane %v7231_v55, 2  ;;  %v3029_v33 = vsel %vm3026_vm0, %v3027_v36, %v3028_v56 }
  0xc3   : > { %v3228_v7 = vsel %vm3026_vm0, %v3226_v43, %v3227_v3  ;;  %v9287_v3 = vld [vmem:[%s11602_s1 + $0x778] sm:$0xff]  }
  0xc4   : > { %8510 = vmatpush3.bf16.msra.mxu0 %v9213_v5  ;;  %v3032_v5 = vsel %vm3026_vm0, %v3030_v50, %v3031_v52  ;;  %v9284_v52 = vld [vmem:[%s11602_s1 + $0x7f0] sm:$0xff]  }
  0xc5   : > { %8532 = vmatpush3.bf16.msra.mxu1 %v9214_v10  ;;  %8539 = vmatprep.subr.bf16.mxu0 %v9219_v12  ;;  %v3224_v10 = vrot.slane %v7233_v53, 2  ;;  %v9265_v12 = vld [vmem:[%s11602_s1 + $0x708] sm:$0xff]   ;;  %v9286_v53 = vld [vmem:[%s11602_s1 + $0x7b0] sm:$0xff]  }
  0xc6   : > { %8561 = vmatprep.subr.bf16.mxu1 %v9220_v25  ;;  %v9266_v25 = vld [vmem:[%s11602_s1 + $0x788] sm:$0xff]  }
  0xc7   : > { %2785 = vmatmul.mubr.bf16.vlgmr.msra.gmra.mrb[80].mxu0 %v7079_v54  ;;  %v9262_v54 = vld [vmem:[%s11602_s1 + $0x780] sm:$0xff]   ;;  %v3225_v23 = vsel %vm3026_vm0, %v3223_v6, %v3224_v10 }
  0xc8   : > { %2967 = vmatmul.mubr.bf16.vlgmr.msra.gmra.mrb[68].mxu1 %v7129_v20  ;;  %8540 = vmatpush3.bf16.msra.mxu0 %v9221_v22  ;;  %v9263_v20 = vld [vmem:[%s11602_s1 + $0x748] sm:$0xff]   ;;  %v9267_v22 = vld [vmem:[%s11602_s1 + $0x750] sm:$0xff]  }
  0xc9   : > { %8562 = vmatpush3.bf16.msra.mxu1 %v9222_v24  ;;  %8541 = vmatprep.subr.bf16.mxu0 %v9223_v26  ;;  %v9268_v26 = vld [vmem:[%s11602_s1 + $0x7d0] sm:$0xff]  }
  0xca   : > { %8563 = vmatprep.subr.bf16.mxu1 %v9224_v49  ;;  %3163 = vmatprep.mubr.bf16.mxu0 %v3032_v5  ;;  %v9288_v5 = vld [vmem:[%s11602_s1 + $0x7f8] sm:$0xff]  }
  0xcb   : > { %3359 = vmatprep.mubr.bf16.mxu1 %v3228_v7 }
  0xcc   : > { %8542 = vmatpush3.bf16.msra.mxu0 %v9225_v1  ;;  %v9269_v1 = vld [vmem:[%s11602_s1 + $0x710] sm:$0xff]  }
  0xcd   : > { %8564 = vmatpush3.bf16.msra.mxu1 %v9226_v58  ;;  %8543 = vmatprep.subr.bf16.mxu0 %v9227_v13  ;;  %v9270_v13 = vld [vmem:[%s11602_s1 + $0x790] sm:$0xff]  }
  0xce   : > { %8565 = vmatprep.subr.bf16.mxu1 %v9228_v27 }
  0xd0   : > { %8544 = vmatpush3.bf16.msra.mxu0 %v9229_v28 }
  0xd1   : > { %8566 = vmatpush3.bf16.msra.mxu1 %v9230_v4  ;;  %8545 = vmatprep.subr.bf16.mxu0 %v9231_v39  ;;  %v9271_v4 = vld [vmem:[%s11602_s1 + $0x758] sm:$0xff]  }
  0xd2   : > { %8567 = vmatprep.subr.bf16.mxu1 %v9232_v19 }
  0xd4   : > { %8546 = vmatpush3.bf16.msra.mxu0 %v9233_v29  ;;  %v9272_v29 = vld [vmem:[%s11602_s1 + $0x7d8] sm:$0xff]  }
  0xd5   : > { %8568 = vmatpush3.bf16.msra.mxu1 %v9234_v30  ;;  %8547 = vmatprep.subr.bf16.mxu0 %v9235_v31  ;;  %v9273_v31 = vld [vmem:[%s11602_s1 + $0x718] sm:$0xff]  }
  0xd6   : > { %8569 = vmatprep.subr.bf16.mxu1 %v9236_v2 }
  0xd8   : > { %8548 = vmatpush3.bf16.msra.mxu0 %v9237_v14 }
  0xd9   : > { %8570 = vmatpush3.bf16.msra.mxu1 %v9238_v32  ;;  %8549 = vmatprep.subr.bf16.mxu0 %v9239_v40  ;;  %v9274_v32 = vld [vmem:[%s11602_s1 + $0x798] sm:$0xff]  }
  0xda   : > { %8571 = vmatprep.subr.bf16.mxu1 %v9240_v59 }
  0xdc   : > { %8550 = vmatpush3.bf16.msra.mxu0 %v9241_v41  ;;  %v9275_v41 = vld [vmem:[%s11602_s1 + $0x760] sm:$0xff]  }
  0xdd   : > { %8572 = vmatpush3.bf16.msra.mxu1 %v9242_v42  ;;  %8551 = vmatprep.subr.bf16.mxu0 %v9243_v44  ;;  %v9276_v44 = vld [vmem:[%s11602_s1 + $0x7e0] sm:$0xff]  }
  0xde   : > { %8573 = vmatprep.subr.bf16.mxu1 %v9244_v37 }
  0xe0   : > { %8552 = vmatpush3.bf16.msra.mxu0 %v9245_v60  ;;  %v9277_v60 = vld [vmem:[%s11602_s1 + $0x720] sm:$0xff]  }
  0xe1   : > { %8574 = vmatpush3.bf16.msra.mxu1 %v9246_v45  ;;  %8553 = vmatprep.subr.bf16.mxu0 %v9247_v21 }
  0xe2   : > { %8575 = vmatprep.subr.bf16.mxu1 %v9248_v15  ;;  %v9278_v15 = vld [vmem:[%s11602_s1 + $0x7a0] sm:$0xff]  }
  0xe4   : > { %8554 = vmatpush3.bf16.msra.mxu0 %v9249_v46 }
  0xe5   : > { %8576 = vmatpush3.bf16.msra.mxu1 %v9250_v47  ;;  %8583 = vmatprep.subr.bf16.mxu0 %v9257_v38  ;;  %v9279_v47 = vld [vmem:[%s11602_s1 + $0x768] sm:$0xff]   ;;  %v9283_v38 = vld [vmem:[%s11602_s1 + $0x770] sm:$0xff]  }
  0xe6   : > { %8605 = vmatprep.subr.bf16.mxu1 %v9258_v57  ;;  %v9285_v57 = vld [vmem:[%s11602_s1 + $0x730] sm:$0xff]  }
  0xe7   : > { %3164 = vmatmul.mubr.bf16.vlgmr.msra.gmra.mrb[84].mxu0 %v3029_v33 }
  0xe8   : > { %3360 = vmatmul.mubr.bf16.vlgmr.msra.gmra.mrb[72].mxu1 %v3225_v23  ;;  %8584 = vmatpush3.bf16.msra.mxu0 %v9261_v17  ;;  %v9289_v17 = vld [vmem:[%s11602_s1 + $0x738] sm:$0xff]   ;;  %v3370_v23 = vld [vmem:[%s9705_s27 + $0x120] sm:$0xcc] }
  0xe9   : > { %8606 = vmatpush3.bf16.msra.mxu1 %v9262_v54  ;;  %8585 = vmatprep.subr.bf16.mxu0 %v9263_v20  ;;  %v9290_v54 = vld [vmem:[%s11602_s1 + $0x7b8] sm:$0xff]   ;;  %v3372_v20 = vld [vmem:[%s9705_s27 + $0x130] sm:$0x33] }
  0xea   : > { %8607 = vmatprep.subr.bf16.mxu1 %v9264_v11 }
  0xec   : > { %8586 = vmatpush3.bf16.msra.mxu0 %v9265_v12 }
  0xed   : > { %8608 = vmatpush3.bf16.msra.mxu1 %v9266_v25  ;;  %8587 = vmatprep.subr.bf16.mxu0 %v9267_v22  ;;  %v7284_v25 = vcombine.high %v3370_v23, %v10454_v8  ;;  %v7286_v22 = vcombine.high %v3372_v20, %v3372_v20 }
  0xee   : > { %8609 = vmatprep.subr.bf16.mxu1 %v9268_v26  ;;  %v7285_v26 = vcombine.low %v3372_v20, %v3372_v20 }
  0xf0   : > { %8588 = vmatpush3.bf16.msra.mxu0 %v9269_v1 }
  0xf1   : > { %8610 = vmatpush3.bf16.msra.mxu1 %v9270_v13  ;;  %8589 = vmatprep.subr.bf16.mxu0 %v9271_v4 }
  0xf2   : > { %8611 = vmatprep.subr.bf16.mxu1 %v9272_v29 }
  0xf4   : > { %8590 = vmatpush3.bf16.msra.mxu0 %v9273_v31 }
  0xf5   : > { %8612 = vmatpush3.bf16.msra.mxu1 %v9274_v32  ;;  %8591 = vmatprep.subr.bf16.mxu0 %v9275_v41  ;;  %v9301_v41 = vld [vmem:[%s11602_s1 + $0x848] sm:$0xff]  }
  0xf6   : > { %8613 = vmatprep.subr.bf16.mxu1 %v9276_v44 }
  0xf8   : > { %8592 = vmatpush3.bf16.msra.mxu0 %v9277_v60 }
  0xf9   : > { %8614 = vmatpush3.bf16.msra.mxu1 %v9278_v15  ;;  %8593 = vmatprep.subr.bf16.mxu0 %v9279_v47  ;;  %v9304_v47 = vld [vmem:[%s11602_s1 + $0x888] sm:$0xff]  }
  0xfa   : > { %v8129_v24 = vpop.f32.mrb[0].mxu0  ;;  %8615 = vmatprep.subr.bf16.mxu1 %v9280_v16  ;;  %v9305_v16 = vld [vmem:[%s11602_s1 + $0x850] sm:$0xff]  }
  0xfb   : > { %v8169_v49 = vpop.f32.mrb[0].mxu1  ;;  %v8130_v58 = vpop.f32.mrb[1].mxu0 }
  0xfc   : > { %v8131_v27 = vadd.f32 %v8130_v58, %v8129_v24  ;;  %v8170_v28 = vpop.f32.mrb[1].mxu1  ;;  %v8132_v19 = vpop.f32.mrb[2].mxu0  ;;  %8594 = vmatpush3.bf16.msra.mxu0 %v9281_v61  ;;  %v7283_v24 = vcombine.low %v3370_v23, %v10454_v8  ;;  %v3420_v8 = vrot.slane %v7285_v26, 2  ;;  %v9306_v61 = vld [vmem:[%s11602_s1 + $0x8d0] sm:$0xff]  }
  0xfd   : > { %v8171_v39 = vadd.f32 %v8170_v28, %v8169_v49  ;;  %v8172_v30 = vpop.f32.mrb[2].mxu1  ;;  %v8133_v14 = vpop.f32.mrb[3].mxu0  ;;  %8616 = vmatpush3.bf16.msra.mxu1 %v9282_v63  ;;  %8595 = vmatprep.subr.bf16.mxu0 %v9283_v38  ;;  %v3566_v49 = vld [vmem:[%s9705_s27 + $0x100] sm:$0xff]  ;;  %v9307_v63 = vld [vmem:[%s11602_s1 + $0x810] sm:$0xff]  }
  0xfe   : > { %v8134_v40 = vadd.f32 %v8133_v14, %v8132_v19  ;;  %v8173_v59 = vpop.f32.mrb[3].mxu1  ;;  %8617 = vmatprep.subr.bf16.mxu1 %v9284_v52  ;;  %v7335_v58 = vcombine.low %v10450_v48, %v3566_v49  ;;  %v7336_v13 = vcombine.high %v10450_v48, %v3566_v49  ;;  %v3423_v19 = vrot.slane %v7286_v22, 2  ;;  %v9299_v48 = vld [vmem:[%s11602_s1 + $0x800] sm:$0xff]  }
  0xff   : > { %v10613_v2 = vadd.f32 %v8171_v39, %v8131_v27  ;;  %v8174_v42 = vadd.f32 %v8173_v59, %v8172_v30  ;;  %v9297_v27 = vld [vmem:[%s11602_s1 + $0x840] sm:$0xff]   ;;  %v3422_v39 = vrot.slane %v7284_v25, 2  ;;  %v3419_v29 = vrot.slane %v7283_v24, 2 }
 0x100   : > { %8596 = vmatpush3.bf16.msra.mxu0 %v9285_v57  ;;  %v9298_v30 = vld [vmem:[%s11602_s1 + $0x8c0] sm:$0xff]   ;;  %3735 = vmatprep.mubr.bf16.mxu1 %v7336_v13 }
 0x101   : > { %v10627_v45 = vadd.f32 %v8174_v42, %v8134_v40  ;;  %8618 = vmatpush3.bf16.msra.mxu1 %v9286_v53  ;;  %8597 = vmatprep.subr.bf16.mxu0 %v9287_v3  ;;  %v3424_v14 = vsel %vm3026_vm0, %v3422_v39, %v3423_v19  ;;  %v3421_v32 = vsel %vm3026_vm0, %v3419_v29, %v3420_v8  ;;  %v9300_v40 = vld [vmem:[%s11602_s1 + $0x880] sm:$0xff]   ;;  %v9319_v19 = vld [vmem:[%s11602_s1 + $0x828] sm:$0xff]  }
 0x102   : > { %v8135_v37 = vpop.f32.mrb[4].mxu0  ;;  %8619 = vmatprep.subr.bf16.mxu1 %v9288_v5  ;;  %3555 = vmatprep.mubr.bf16.mxu0 %v3424_v14  ;;  %v9315_v22 = vld [vmem:[%s11602_s1 + $0x820] sm:$0xff]   ;;  %v9320_v8 = vld [vmem:[%s11602_s1 + $0x8a8] sm:$0xff]  }
 0x103   : > { %v8175_v21 = vpop.f32.mrb[4].mxu1  ;;  %v8136_v46 = vpop.f32.mrb[5].mxu0 }
 0x104   : > { %v8137_v18 = vadd.f32 %v8136_v46, %v8135_v37  ;;  %v8176_v51 = vpop.f32.mrb[5].mxu1  ;;  %v8138_v35 = vpop.f32.mrb[6].mxu0  ;;  %8598 = vmatpush3.bf16.msra.mxu0 %v9289_v17  ;;  %v9302_v37 = vld [vmem:[%s11602_s1 + $0x8c8] sm:$0xff]  }
 0x105   : > { %v8177_v34 = vadd.f32 %v8176_v51, %v8175_v21  ;;  %v8178_v62 = vpop.f32.mrb[6].mxu1  ;;  %v8139_v9 = vpop.f32.mrb[7].mxu0  ;;  %8620 = vmatpush3.bf16.msra.mxu1 %v9290_v54  ;;  %8627 = vmatprep.subr.bf16.mxu0 %v9297_v27  ;;  %v9303_v21 = vld [vmem:[%s11602_s1 + $0x808] sm:$0xff]   ;;  %v9313_v54 = vld [vmem:[%s11602_s1 + $0x860] sm:$0xff]  }
 0x106   : > { %v8140_v55 = vadd.f32 %v8139_v9, %v8138_v35  ;;  %v8179_v50 = vpop.f32.mrb[7].mxu1  ;;  %8649 = vmatprep.subr.bf16.mxu1 %v9298_v30 }
 0x107   : > { %v10644_v0 = vadd.f32 %v8177_v34, %v8137_v18  ;;  %v8180_v36 = vadd.f32 %v8179_v50, %v8178_v62  ;;  %3556 = vmatmul.mubr.bf16.vlgmr.msra.gmra.mrb[88].mxu0 %v3421_v32  ;;  %v9322_v32 = vld [vmem:[%s11602_s1 + $0x8f0] sm:$0xff]  }
 0x108   : > { %3736 = vmatmul.mubr.bf16.vlgmr.msra.gmra.mrb[76].mxu1 %v7335_v58  ;;  %8628 = vmatpush3.bf16.msra.mxu0 %v9299_v48  ;;  %v9317_v58 = vld [vmem:[%s11602_s1 + $0x868] sm:$0xff]  }
 0x109   : > { %v10658_v56 = vadd.f32 %v8180_v36, %v8140_v55  ;;  %8650 = vmatpush3.bf16.msra.mxu1 %v9300_v40  ;;  %8629 = vmatprep.subr.bf16.mxu0 %v9301_v41  ;;  %v9308_v55 = vld [vmem:[%s11602_s1 + $0x890] sm:$0xff]   ;;  %v9309_v36 = vld [vmem:[%s11602_s1 + $0x858] sm:$0xff]  }
 0x10a   : > { %v8141_v43 = vpop.f32.mrb[8].mxu0  ;;  %8651 = vmatprep.subr.bf16.mxu1 %v9302_v37  ;;  %v9323_v41 = vld [vmem:[%s11602_s1 + $0x830] sm:$0xff]  }
 0x10b   : > { %v8181_v6 = vpop.f32.mrb[8].mxu1  ;;  %v8142_v10 = vpop.f32.mrb[9].mxu0  ;;  %v9324_v37 = vld [vmem:[%s11602_s1 + $0x8b0] sm:$0xff]  }
 0x10c   : > { %v8143_v33 = vadd.f32 %v8142_v10, %v8141_v43  ;;  %v8182_v7 = vpop.f32.mrb[9].mxu1  ;;  %v8144_v12 = vpop.f32.mrb[10].mxu0  ;;  %8630 = vmatpush3.bf16.msra.mxu0 %v9303_v21  ;;  %v9310_v43 = vld [vmem:[%s11602_s1 + $0x8d8] sm:$0xff]  }
 0x10d   : > { %v8183_v11 = vadd.f32 %v8182_v7, %v8181_v6  ;;  %v8184_v1 = vpop.f32.mrb[10].mxu1  ;;  %v8145_v4 = vpop.f32.mrb[11].mxu0  ;;  %8652 = vmatpush3.bf16.msra.mxu1 %v9304_v47  ;;  %8631 = vmatprep.subr.bf16.mxu0 %v9305_v16  ;;  %v9311_v6 = vld [vmem:[%s11602_s1 + $0x818] sm:$0xff]  }
 0x10e   : > { %v8146_v31 = vadd.f32 %v8145_v4, %v8144_v12  ;;  %v8185_v59 = vpop.f32.mrb[11].mxu1  ;;  %8653 = vmatprep.subr.bf16.mxu1 %v9306_v61  ;;  %v9318_v4 = vld [vmem:[%s11602_s1 + $0x8e8] sm:$0xff]   ;;  %v3746_v61 = vld [vmem:[%s9705_s27 + $0x118] sm:$0xff] }
 0x10f   : > { %v10682_v28 = vadd.f32 %v8183_v11, %v8143_v33  ;;  %v8186_v42 = vadd.f32 %v8185_v59, %v8184_v1  ;;  %v9312_v33 = vld [vmem:[%s11602_s1 + $0x898] sm:$0xff]   ;;  %v9314_v11 = vld [vmem:[%s11602_s1 + $0x8e0] sm:$0xff]  }
 0x110   : > { %8632 = vmatpush3.bf16.msra.mxu0 %v9307_v63 }
 0x111   : > { %v10704_v15 = vadd.f32 %v8186_v42, %v8146_v31  ;;  %8654 = vmatpush3.bf16.msra.mxu1 %v9308_v55  ;;  %8633 = vmatprep.subr.bf16.mxu0 %v9309_v36  ;;  %v9321_v31 = vld [vmem:[%s11602_s1 + $0x870] sm:$0xff]  }
 0x112   : > { %v8147_v44 = vpop.f32.mrb[12].mxu0  ;;  %8655 = vmatprep.subr.bf16.mxu1 %v9310_v43  ;;  %v9567_v55 = vld [vmem:[%s9705_s27 + $0x110] sm:$0xff]  ;;  %v9568_v43 = vld [vmem:[%s9705_s27 + $0x128] sm:$0xff] }
 0x113   : > { %v8187_v60 = vpop.f32.mrb[12].mxu1  ;;  %v8148_v46 = vpop.f32.mrb[13].mxu0 }
 0x114   : > { %v8149_v18 = vadd.f32 %v8148_v46, %v8147_v44  ;;  %v8188_v51 = vpop.f32.mrb[13].mxu1  ;;  %v8150_v35 = vpop.f32.mrb[14].mxu0  ;;  %8634 = vmatpush3.bf16.msra.mxu0 %v9311_v6 }
 0x115   : > { %v8189_v34 = vadd.f32 %v8188_v51, %v8187_v60  ;;  %v8190_v62 = vpop.f32.mrb[14].mxu1  ;;  %v8151_v38 = vpop.f32.mrb[15].mxu0  ;;  %8656 = vmatpush3.bf16.msra.mxu1 %v9312_v33  ;;  %8635 = vmatprep.subr.bf16.mxu0 %v9313_v54  ;;  %v9334_v33 = vld [vmem:[%s11602_s1 + $0x940] sm:$0xff]  }
 0x116   : > { %v8152_v50 = vadd.f32 %v8151_v38, %v8150_v35  ;;  %v8191_v52 = vpop.f32.mrb[15].mxu1  ;;  %8657 = vmatprep.subr.bf16.mxu1 %v9314_v11 }
 0x117   : > { %v10718_v9 = vadd.f32 %v8189_v34, %v8149_v18  ;;  %v8192_v57 = vadd.f32 %v8191_v52, %v8190_v62  ;;  %v9326_v18 = vld [vmem:[%s11602_s1 + $0x8f8] sm:$0xff]   ;;  %v3926_v52 = vld [vmem:[%s9705_s27 + $0x130] sm:$0xff] }
 0x118   : > { %8636 = vmatpush3.bf16.msra.mxu0 %v9315_v22  ;;  %v9327_v34 = vld [vmem:[%s11602_s1 + $0x838] sm:$0xff]   ;;  %v7436_v6 = vcombine.high %v9568_v43, %v3926_v52 }
 0x119   : > { %v10732_v5 = vadd.f32 %v8192_v57, %v8152_v50  ;;  %8637 = vmatprep.subr.bf16.mxu0 %v9317_v58  ;;  %v7386_v50 = vcombine.high %v9567_v55, %v3746_v61 }
 0x11a   : > { %v8209_v53 = vpop.f32.mrb[16].mxu0  ;;  %4095 = vmatprep.mubr.bf16.mxu1 %v7436_v6 }
 0x11b   : > { %v8210_v3 = vpop.f32.mrb[17].mxu0  ;;  %v8249_v7 = vpop.f32.mrb[16].mxu1  ;;  %3915 = vmatprep.mubr.bf16.mxu0 %v7386_v50 }
 0x11c   : > { %v8211_v10 = vadd.f32 %v8210_v3, %v8209_v53  ;;  %v8212_v17 = vpop.f32.mrb[18].mxu0  ;;  %v8250_v25 = vpop.f32.mrb[17].mxu1  ;;  %8638 = vmatpush3.bf16.msra.mxu0 %v9319_v19  ;;  %v7385_v53 = vcombine.low %v9567_v55, %v3746_v61  ;;  %v7435_v3 = vcombine.low %v9568_v43, %v3926_v52  ;;  %v9350_v61 = vld [vmem:[%s11602_s1 + $0x960] sm:$0xff]  }
 0x11d   : > { %v8213_v20 = vpop.f32.mrb[19].mxu0  ;;  %v8251_v24 = vadd.f32 %v8250_v25, %v8249_v7  ;;  %v8252_v26 = vpop.f32.mrb[18].mxu1  ;;  %8639 = vmatprep.subr.bf16.mxu0 %v9321_v31  ;;  %v9336_v25 = vld [vmem:[%s11602_s1 + $0x900] sm:$0xff]  }
 0x11e   : > { %v897_v23 = vadd.f32 %v8211_v10, %v10613_v2  ;;  %v8214_v12 = vadd.f32 %v8213_v20, %v8212_v17  ;;  %v9316_v2 = vld [vmem:[%s11602_s1 + $0x8a0] sm:$0xff]   ;;  %v8253_v1 = vpop.f32.mrb[19].mxu1 }
 0x11f   : > { %v8254_v27 = vadd.f32 %v8253_v1, %v8252_v26  ;;  %8658 = vmatpush3.bf16.msra.mxu1 %v9316_v2  ;;  %v9333_v10 = vld [vmem:[%s11602_s1 + $0x9c0] sm:$0xff]  }
 0x120   : > { %v898_v49 = vadd.f32 %v8214_v12, %v10627_v45  ;;  %v10754_v13 = vadd.f32 %v8251_v24, %v897_v23  ;;  %8659 = vmatprep.subr.bf16.mxu1 %v9318_v4  ;;  %8640 = vmatpush3.bf16.msra.mxu0 %v9323_v41  ;;  %v9335_v20 = vld [vmem:[%s11602_s1 + $0x980] sm:$0xff]   ;;  %v9340_v4 = vld [vmem:[%s11602_s1 + $0x908] sm:$0xff]  }
 0x121   : > { %v9352_v52 = vld [vmem:[%s11602_s1 + $0x920] sm:$0xff]  }
 0x122   : > { %v8215_v39 = vpop.f32.mrb[20].mxu0  ;;  %v10762_v45 = vadd.f32 %v8254_v27, %v898_v49  ;;  %v9338_v49 = vld [vmem:[%s11602_s1 + $0x948] sm:$0xff]  }
 0x123   : > { %v8216_v29 = vpop.f32.mrb[21].mxu0  ;;  %v8255_v14 = vpop.f32.mrb[20].mxu1  ;;  %8660 = vmatpush3.bf16.msra.mxu1 %v9320_v8 }
 0x124   : > { %v8217_v30 = vadd.f32 %v8216_v29, %v8215_v39  ;;  %v8218_v48 = vpop.f32.mrb[22].mxu0  ;;  %v8256_v44 = vpop.f32.mrb[21].mxu1  ;;  %8661 = vmatprep.subr.bf16.mxu1 %v9322_v32  ;;  %v9341_v29 = vld [vmem:[%s11602_s1 + $0x9d0] sm:$0xff]  }
 0x125   : > { %v8219_v59 = vpop.f32.mrb[23].mxu0  ;;  %v8257_v60 = vadd.f32 %v8256_v44, %v8255_v14  ;;  %v8258_v21 = vpop.f32.mrb[22].mxu1  ;;  %v9343_v14 = vld [vmem:[%s11602_s1 + $0x990] sm:$0xff]   ;;  %v9345_v44 = vld [vmem:[%s11602_s1 + $0x9d8] sm:$0xff]  }
 0x126   : > { %v899_v40 = vadd.f32 %v8217_v30, %v10644_v0  ;;  %v8220_v42 = vadd.f32 %v8219_v59, %v8218_v48  ;;  %v9325_v0 = vld [vmem:[%s11602_s1 + $0x878] sm:$0xff]   ;;  %v8259_v47 = vpop.f32.mrb[23].mxu1  ;;  %v9342_v30 = vld [vmem:[%s11602_s1 + $0x950] sm:$0xff]  }
 0x127   : > { %8662 = vmatpush3.bf16.msra.mxu1 %v9324_v37  ;;  %v8260_v16 = vadd.f32 %v8259_v47, %v8258_v21  ;;  %8641 = vmatprep.subr.bf16.mxu0 %v9325_v0  ;;  %v9344_v59 = vld [vmem:[%s11602_s1 + $0x910] sm:$0xff]  }
 0x128   : > { %v900_v46 = vadd.f32 %v8220_v42, %v10658_v56  ;;  %v10787_v51 = vadd.f32 %v8257_v60, %v899_v40  ;;  %8663 = vmatprep.subr.bf16.mxu1 %v9326_v18  ;;  %v9328_v56 = vld [vmem:[%s11602_s1 + $0x8b8] sm:$0xff]   ;;  %8642 = vmatpush3.bf16.msra.mxu0 %v9327_v34  ;;  %v9349_v34 = vld [vmem:[%s11602_s1 + $0x9e0] sm:$0xff]  }
 0x129   : > { %8671 = vmatprep.subr.bf16.mxu0 %v9333_v10  ;;  %v9346_v60 = vld [vmem:[%s11602_s1 + $0x958] sm:$0xff]  }
 0x12a   : > { %v8221_v35 = vpop.f32.mrb[24].mxu0  ;;  %v10796_v62 = vadd.f32 %v8260_v16, %v900_v46  ;;  %v9347_v46 = vld [vmem:[%s11602_s1 + $0x998] sm:$0xff]  }
 0x12b   : > { %v8222_v63 = vpop.f32.mrb[25].mxu0  ;;  %v8261_v38 = vpop.f32.mrb[24].mxu1  ;;  %8664 = vmatpush3.bf16.msra.mxu1 %v9328_v56  ;;  %3916 = vmatmul.mubr.bf16.vlgmr.msra.gmra.mrb[92].mxu0 %v7385_v53  ;;  %v9353_v53 = vld [vmem:[%s11602_s1 + $0x9e8] sm:$0xff]  }
 0x12c   : > { %v8223_v36 = vadd.f32 %v8222_v63, %v8221_v35  ;;  %v8224_v57 = vpop.f32.mrb[26].mxu0  ;;  %v8262_v23 = vpop.f32.mrb[25].mxu1  ;;  %8693 = vmatprep.subr.bf16.mxu1 %v9334_v33  ;;  %8672 = vmatpush3.bf16.msra.mxu0 %v9335_v20 }
 0x12d   : > { %v8225_v17 = vpop.f32.mrb[27].mxu0  ;;  %v8263_v11 = vadd.f32 %v8262_v23, %v8261_v38  ;;  %v8264_v12 = vpop.f32.mrb[26].mxu1  ;;  %v9351_v38 = vld [vmem:[%s11602_s1 + $0x9a0] sm:$0xff]   ;;  %v9356_v23 = vld [vmem:[%s11602_s1 + $0x928] sm:$0xff]  }
 0x12e   : > { %v901_v7 = vadd.f32 %v8223_v36, %v10682_v28  ;;  %v8226_v54 = vadd.f32 %v8225_v17, %v8224_v57  ;;  %4096 = vmatmul.mubr.bf16.vlgmr.msra.gmra.mrb[80].mxu1 %v7435_v3  ;;  %v8265_v24 = vpop.f32.mrb[27].mxu1  ;;  %v9337_v28 = vld [vmem:[%s11602_s1 + $0x9c8] sm:$0xff]  }
 0x12f   : > { %v8266_v2 = vadd.f32 %v8265_v24, %v8264_v12  ;;  %8694 = vmatpush3.bf16.msra.mxu1 %v9336_v25  ;;  %8673 = vmatprep.subr.bf16.mxu0 %v9337_v28  ;;  %v9355_v17 = vld [vmem:[%s11602_s1 + $0x9a8] sm:$0xff]   ;;  %v9359_v28 = vld [vmem:[%s11602_s1 + $0x9b0] sm:$0xff]  }
 0x130   : > { %v902_v22 = vadd.f32 %v8226_v54, %v10704_v15  ;;  %v10818_v26 = vadd.f32 %v8263_v11, %v901_v7  ;;  %v9339_v15 = vld [vmem:[%s11602_s1 + $0x988] sm:$0xff]   ;;  %8695 = vmatprep.subr.bf16.mxu1 %v9338_v49 }
 0x131   : > { %8674 = vmatpush3.bf16.msra.mxu0 %v9339_v15 }
 0x132   : > { %v8227_v1 = vpop.f32.mrb[28].mxu0  ;;  %v10826_v58 = vadd.f32 %v8266_v2, %v902_v22  ;;  %8675 = vmatprep.subr.bf16.mxu0 %v9341_v29  ;;  %v9358_v22 = vld [vmem:[%s11602_s1 + $0x970] sm:$0xff]  }
 0x133   : > { %v8228_v27 = vpop.f32.mrb[29].mxu0  ;;  %v8267_v8 = vpop.f32.mrb[28].mxu1  ;;  %8696 = vmatpush3.bf16.msra.mxu1 %v9340_v4  ;;  %v9361_v4 = vld [vmem:[%s11602_s1 + $0x9f8] sm:$0xff]  }
 0x134   : > { %v8229_v39 = vadd.f32 %v8228_v27, %v8227_v1  ;;  %v8230_v19 = vpop.f32.mrb[30].mxu0  ;;  %v8268_v40 = vpop.f32.mrb[29].mxu1  ;;  %8697 = vmatprep.subr.bf16.mxu1 %v9342_v30  ;;  %v9360_v1 = vld [vmem:[%s11602_s1 + $0x930] sm:$0xff]   ;;  %v9363_v30 = vld [vmem:[%s11602_s1 + $0x9b8] sm:$0xff]  }
 0x135   : > { %v8231_v31 = vpop.f32.mrb[31].mxu0  ;;  %v8269_v41 = vadd.f32 %v8268_v40, %v8267_v8  ;;  %v8270_v42 = vpop.f32.mrb[30].mxu1  ;;  %8676 = vmatpush3.bf16.msra.mxu0 %v9343_v14  ;;  %v4152_v40 = vld [vmem:[%s9705_s27 + $0x140] sm:$0x33] }
 0x136   : > { %v903_v48 = vadd.f32 %v8229_v39, %v10718_v9  ;;  %v8232_v32 = vadd.f32 %v8231_v31, %v8230_v19  ;;  %v8271_v37 = vpop.f32.mrb[31].mxu1  ;;  %8677 = vmatprep.subr.bf16.mxu0 %v9345_v44 }
 0x137   : > { %8698 = vmatpush3.bf16.msra.mxu1 %v9344_v59  ;;  %v8272_v0 = vadd.f32 %v8271_v37, %v8270_v42  ;;  %v4118_v59 = vld [vmem:[%s9705_s27 + $0x138] sm:$0x33]  ;;  %v7519_v42 = vcombine.low %v4152_v40, %v4152_v40  ;;  %v9369_v37 = vld [vmem:[%s11602_s1 + $0xa40] sm:$0xff]  }
 0x138   : > { %v904_v9 = vadd.f32 %v8232_v32, %v10732_v5  ;;  %v10851_v21 = vadd.f32 %v8269_v41, %v903_v48  ;;  %8699 = vmatprep.subr.bf16.mxu1 %v9346_v60  ;;  %v9348_v5 = vld [vmem:[%s11602_s1 + $0x918] sm:$0xff]   ;;  %v7537_v44 = vcombine.low %v4118_v59, %v4118_v59 }
 0x139   : > { %8678 = vmatpush3.bf16.msra.mxu0 %v9347_v46  ;;  %v9364_v32 = vld [vmem:[%s11602_s1 + $0x938] sm:$0xff]   ;;  %v9370_v46 = vld [vmem:[%s11602_s1 + $0xa00] sm:$0xff]  }
 0x13a   : > { %v8289_v47 = vpop.f32.mrb[32].mxu0  ;;  %v10859_v18 = vadd.f32 %v8272_v0, %v904_v9  ;;  %8679 = vmatprep.subr.bf16.mxu0 %v9349_v34  ;;  %v7538_v9 = vcombine.high %v4118_v59, %v4118_v59  ;;  %v9388_v59 = vld [vmem:[%s11602_s1 + $0xaa0] sm:$0xff]  }
 0x13b   : > { %v8290_v16 = vpop.f32.mrb[33].mxu0  ;;  %8700 = vmatpush3.bf16.msra.mxu1 %v9348_v5  ;;  %v8329_v63 = vpop.f32.mrb[32].mxu1 }
 0x13c   : > { %v8291_v35 = vadd.f32 %v8290_v16, %v8289_v47  ;;  %v8292_v56 = vpop.f32.mrb[34].mxu0  ;;  %8701 = vmatprep.subr.bf16.mxu1 %v9350_v61  ;;  %v8330_v57 = vpop.f32.mrb[33].mxu1  ;;  %4464 = vmatprep.mubr.bf16.mxu1 %v7538_v9  ;;  %v9371_v16 = vld [vmem:[%s11602_s1 + $0xac0] sm:$0xff]  }
 0x13d   : > { %v8293_v50 = vpop.f32.mrb[35].mxu0  ;;  %v8331_v43 = vadd.f32 %v8330_v57, %v8329_v63  ;;  %v8332_v3 = vpop.f32.mrb[34].mxu1  ;;  %8680 = vmatpush3.bf16.msra.mxu0 %v9351_v38  ;;  %v9373_v38 = vld [vmem:[%s11602_s1 + $0xa48] sm:$0xff]  }
 0x13e   : > { %v1397_v55 = vadd.f32 %v8291_v35, %v10754_v13  ;;  %v8294_v36 = vadd.f32 %v8293_v50, %v8292_v56  ;;  %v9354_v13 = vld [vmem:[%s11602_s1 + $0x968] sm:$0xff]   ;;  %v8333_v10 = vpop.f32.mrb[35].mxu1  ;;  %8681 = vmatprep.subr.bf16.mxu0 %v9353_v53  ;;  %v9372_v35 = vld [vmem:[%s11602_s1 + $0xa80] sm:$0xff]  }
 0x13f   : > { %8702 = vmatpush3.bf16.msra.mxu1 %v9352_v52  ;;  %v8334_v7 = vadd.f32 %v8333_v10, %v8332_v3  ;;  %v9374_v52 = vld [vmem:[%s11602_s1 + $0xa08] sm:$0xff]  }
 0x140   : > { %v1398_v6 = vadd.f32 %v8294_v36, %v10762_v45  ;;  %v10884_v33 = vadd.f32 %v8331_v43, %v1397_v55  ;;  %8703 = vmatprep.subr.bf16.mxu1 %v9354_v13  ;;  %v9357_v45 = vld [vmem:[%s11602_s1 + $0x9f0] sm:$0xff]   ;;  %v9375_v53 = vld [vmem:[%s11602_s1 + $0xac8] sm:$0xff]  }
 0x141   : > { %8682 = vmatpush3.bf16.msra.mxu0 %v9355_v17  ;;  %v9376_v13 = vld [vmem:[%s11602_s1 + $0xa88] sm:$0xff]  }
 0x142   : > { %v8295_v54 = vpop.f32.mrb[36].mxu0  ;;  %v10889_v11 = vadd.f32 %v8334_v7, %v1398_v6  ;;  %8683 = vmatprep.subr.bf16.mxu0 %v9357_v45 }
 0x143   : > { %v8296_v20 = vpop.f32.mrb[37].mxu0  ;;  %8704 = vmatpush3.bf16.msra.mxu1 %v9356_v23  ;;  %v8335_v24 = vpop.f32.mrb[36].mxu1 }
 0x144   : > { %v8297_v12 = vadd.f32 %v8296_v20, %v8295_v54  ;;  %v8298_v25 = vpop.f32.mrb[38].mxu0  ;;  %8705 = vmatprep.subr.bf16.mxu1 %v9358_v22  ;;  %v8336_v27 = vpop.f32.mrb[37].mxu1  ;;  %v9378_v54 = vld [vmem:[%s11602_s1 + $0xa10] sm:$0xff]  }
 0x145   : > { %v8299_v49 = vpop.f32.mrb[39].mxu0  ;;  %v8337_v39 = vadd.f32 %v8336_v27, %v8335_v24  ;;  %v8338_v19 = vpop.f32.mrb[38].mxu1  ;;  %8684 = vmatpush3.bf16.msra.mxu0 %v9359_v28  ;;  %v9379_v20 = vld [vmem:[%s11602_s1 + $0xad0] sm:$0xff]   ;;  %v9381_v28 = vld [vmem:[%s11602_s1 + $0xa58] sm:$0xff]  }
 0x146   : > { %v1399_v2 = vadd.f32 %v8297_v12, %v10787_v51  ;;  %v8300_v15 = vadd.f32 %v8299_v49, %v8298_v25  ;;  %v9362_v51 = vld [vmem:[%s11602_s1 + $0x978] sm:$0xff]   ;;  %v8339_v8 = vpop.f32.mrb[39].mxu1  ;;  %8685 = vmatprep.subr.bf16.mxu0 %v9361_v4  ;;  %v9380_v25 = vld [vmem:[%s11602_s1 + $0xa90] sm:$0xff]  }
 0x147   : > { %8706 = vmatpush3.bf16.msra.mxu1 %v9360_v1  ;;  %v8340_v31 = vadd.f32 %v8339_v8, %v8338_v19  ;;  %v9383_v4 = vld [vmem:[%s11602_s1 + $0xad8] sm:$0xff]  }
 0x148   : > { %v1400_v29 = vadd.f32 %v8300_v15, %v10796_v62  ;;  %v10914_v48 = vadd.f32 %v8337_v39, %v1399_v2  ;;  %8707 = vmatprep.subr.bf16.mxu1 %v9362_v51  ;;  %v7520_v62 = vcombine.high %v4152_v40, %v4152_v40  ;;  %v9384_v19 = vld [vmem:[%s11602_s1 + $0xa98] sm:$0xff]  }
 0x149   : > { %8686 = vmatpush3.bf16.msra.mxu0 %v9363_v30  ;;  %v9386_v30 = vld [vmem:[%s11602_s1 + $0xa20] sm:$0xff]  }
 0x14a   : > { %v8301_v14 = vpop.f32.mrb[40].mxu0  ;;  %v10924_v0 = vadd.f32 %v8340_v31, %v1400_v29  ;;  %4321 = vmatprep.mubr.bf16.mxu0 %v7520_v62  ;;  %8715 = vmatprep.subr.bf16.mxu0 %v9369_v37  ;;  %v9389_v62 = vld [vmem:[%s11602_s1 + $0xa68] sm:$0xff]  }
 0x14b   : > { %v8302_v41 = vpop.f32.mrb[41].mxu0  ;;  %8708 = vmatpush3.bf16.msra.mxu1 %v9364_v32  ;;  %v8341_v5 = vpop.f32.mrb[40].mxu1  ;;  %v9387_v32 = vld [vmem:[%s11602_s1 + $0xae0] sm:$0xff]   ;;  %v9390_v37 = vld [vmem:[%s11602_s1 + $0xa28] sm:$0xff]  }
 0x14c   : > { %v8304_v60 = vpop.f32.mrb[42].mxu0  ;;  %v8303_v47 = vadd.f32 %v8302_v41, %v8301_v14  ;;  %v8342_v63 = vpop.f32.mrb[41].mxu1  ;;  %4322 = vmatmul.mubr.bf16.vlgmr.msra.gmra.mrb[96].mxu0 %v7519_v42  ;;  %8737 = vmatprep.subr.bf16.mxu1 %v9371_v16 }
 0x14d   : > { %v8305_v34 = vpop.f32.mrb[43].mxu0  ;;  %v8343_v55 = vadd.f32 %v8342_v63, %v8341_v5  ;;  %v8344_v50 = vpop.f32.mrb[42].mxu1  ;;  %8716 = vmatpush3.bf16.msra.mxu0 %v9370_v46 }
 0x14e   : > { %v1401_v56 = vadd.f32 %v8303_v47, %v10818_v26  ;;  %v8306_v61 = vadd.f32 %v8305_v34, %v8304_v60  ;;  %4465 = vmatmul.mubr.bf16.vlgmr.msra.gmra.mrb[84].mxu1 %v7537_v44  ;;  %v8345_v57 = vpop.f32.mrb[43].mxu1  ;;  %8717 = vmatprep.subr.bf16.mxu0 %v9373_v38  ;;  %v9392_v34 = vld [vmem:[%s11602_s1 + $0xaa8] sm:$0xff]   ;;  %v9394_v38 = vld [vmem:[%s11602_s1 + $0xa30] sm:$0xff]  }
 0x14f   : > { %8738 = vmatpush3.bf16.msra.mxu1 %v9372_v35  ;;  %v8346_v43 = vadd.f32 %v8345_v57, %v8344_v50  ;;  %v9396_v57 = vld [vmem:[%s11602_s1 + $0xab0] sm:$0xff]  }
 0x150   : > { %v1402_v36 = vadd.f32 %v8306_v61, %v10826_v58  ;;  %v10943_v26 = vadd.f32 %v8343_v55, %v1401_v56  ;;  %8739 = vmatprep.subr.bf16.mxu1 %v9375_v53  ;;  %v9377_v58 = vld [vmem:[%s11602_s1 + $0xa50] sm:$0xff]  }
 0x151   : > { %8718 = vmatpush3.bf16.msra.mxu0 %v9374_v52  ;;  %v9393_v61 = vld [vmem:[%s11602_s1 + $0xa70] sm:$0xff]  }
 0x152   : > { %v8307_v3 = vpop.f32.mrb[44].mxu0  ;;  %v10951_v10 = vadd.f32 %v8346_v43, %v1402_v36  ;;  %8719 = vmatprep.subr.bf16.mxu0 %v9377_v58  ;;  %v9395_v52 = vld [vmem:[%s11602_s1 + $0xaf0] sm:$0xff]   ;;  %v9398_v58 = vld [vmem:[%s11602_s1 + $0xa38] sm:$0xff]  }
 0x153   : > { %v8308_v6 = vpop.f32.mrb[45].mxu0  ;;  %v8347_v23 = vpop.f32.mrb[44].mxu1  ;;  %8740 = vmatpush3.bf16.msra.mxu1 %v9376_v13 }
 0x154   : > { %v8309_v17 = vadd.f32 %v8308_v6, %v8307_v3  ;;  %v8310_v7 = vpop.f32.mrb[46].mxu0  ;;  %v8348_v24 = vpop.f32.mrb[45].mxu1  ;;  %8741 = vmatprep.subr.bf16.mxu1 %v9379_v20  ;;  %v9397_v3 = vld [vmem:[%s11602_s1 + $0xa78] sm:$0xff]  }
 0x155   : > { %v8311_v12 = vpop.f32.mrb[47].mxu0  ;;  %v8349_v2 = vadd.f32 %v8348_v24, %v8347_v23  ;;  %v8350_v49 = vpop.f32.mrb[46].mxu1  ;;  %8720 = vmatpush3.bf16.msra.mxu0 %v9378_v54  ;;  %v9399_v54 = vld [vmem:[%s11602_s1 + $0xaf8] sm:$0xff]  }
 0x156   : > { %v1403_v45 = vadd.f32 %v8309_v17, %v10851_v21  ;;  %v8312_v22 = vadd.f32 %v8311_v12, %v8310_v7  ;;  %v9382_v21 = vld [vmem:[%s11602_s1 + $0xa18] sm:$0xff]   ;;  %v8351_v15 = vpop.f32.mrb[47].mxu1  ;;  %8721 = vmatprep.subr.bf16.mxu0 %v9381_v28 }
 0x157   : > { %8742 = vmatpush3.bf16.msra.mxu1 %v9380_v25  ;;  %v8352_v39 = vadd.f32 %v8351_v15, %v8350_v49  ;;  %v9402_v24 = vld [vmem:[%s11602_s1 + $0xab8] sm:$0xff]  }
 0x158   : > { %v1404_v1 = vadd.f32 %v8312_v22, %v10859_v18  ;;  %v10973_v27 = vadd.f32 %v8349_v2, %v1403_v45  ;;  %8743 = vmatprep.subr.bf16.mxu1 %v9383_v4  ;;  %v9385_v18 = vld [vmem:[%s11602_s1 + $0xa60] sm:$0xff]   ;;  %v4472_v45 = vld [vmem:[%s9705_s27 + $0x148] sm:$0x33]  ;;  %v4650_v49 = vld [vmem:[%s9705_s27 + $0x138] sm:$0x66] }
 0x159   : > { %8722 = vmatpush3.bf16.msra.mxu0 %v9382_v21  ;;  %v7587_v25 = vcombine.low %v4472_v45, %v4472_v45  ;;  %v7588_v22 = vcombine.high %v4472_v45, %v4472_v45  ;;  %v7638_v15 = vcombine.high %v4650_v49, %v4650_v49  ;;  %v9406_v4 = vld [vmem:[%s11602_s1 + $0xb00] sm:$0xff]  }
 0x15a   : > { %v8369_v51 = vpop.f32.mrb[48].mxu0  ;;  %v10982_v29 = vadd.f32 %v8352_v39, %v1404_v1  ;;  %8723 = vmatprep.subr.bf16.mxu0 %v9385_v18  ;;  %v7637_v1 = vcombine.low %v4650_v49, %v4650_v49  ;;  %v9425_v49 = vld [vmem:[%s11602_s1 + $0xb68] sm:$0xff]  }
 0x15b   : > { %v8370_v8 = vpop.f32.mrb[49].mxu0  ;;  %8744 = vmatpush3.bf16.msra.mxu1 %v9384_v19  ;;  %v8409_v40 = vpop.f32.mrb[48].mxu1  ;;  %4641 = vmatprep.mubr.bf16.mxu0 %v7588_v22 }
 0x15c   : > { %v8371_v31 = vadd.f32 %v8370_v8, %v8369_v51  ;;  %v8372_v14 = vpop.f32.mrb[50].mxu0  ;;  %8745 = vmatprep.subr.bf16.mxu1 %v9387_v32  ;;  %v8410_v9 = vpop.f32.mrb[49].mxu1  ;;  %v9407_v51 = vld [vmem:[%s11602_s1 + $0xbc0] sm:$0xff]   ;;  %v4689_v8 = vrot.slane %v7637_v1, 1  ;;  %v9409_v32 = vld [vmem:[%s11602_s1 + $0xb48] sm:$0xff]  }
 0x15d   : > { %v8373_v42 = vpop.f32.mrb[51].mxu0  ;;  %8724 = vmatpush3.bf16.msra.mxu0 %v9386_v30  ;;  %v8411_v60 = vadd.f32 %v8410_v9, %v8409_v40  ;;  %v8412_v46 = vpop.f32.mrb[50].mxu1  ;;  %v4690_v30 = vrot.slane %v7638_v15, 1  ;;  %v9410_v40 = vld [vmem:[%s11602_s1 + $0xb08] sm:$0xff]  }
 0x15e   : > { %v1897_v41 = vadd.f32 %v8371_v31, %v10884_v33  ;;  %v8374_v44 = vadd.f32 %v8373_v42, %v8372_v14  ;;  %8725 = vmatprep.subr.bf16.mxu0 %v9389_v62  ;;  %v9391_v33 = vld [vmem:[%s11602_s1 + $0xae8] sm:$0xff]   ;;  %v8413_v5 = vpop.f32.mrb[51].mxu1  ;;  %v9408_v31 = vld [vmem:[%s11602_s1 + $0xb80] sm:$0xff]  }
 0x15f   : > { %8746 = vmatpush3.bf16.msra.mxu1 %v9388_v59  ;;  %v8414_v35 = vadd.f32 %v8413_v5, %v8412_v46  ;;  %4821 = vmatprep.mubr.bf16.mxu1 %v4690_v30  ;;  %v9411_v42 = vld [vmem:[%s11602_s1 + $0xbc8] sm:$0xff]   ;;  %v9414_v5 = vld [vmem:[%s11602_s1 + $0xb10] sm:$0xff]  }
 0x160   : > { %v1898_v47 = vadd.f32 %v8374_v44, %v10889_v11  ;;  %v11007_v16 = vadd.f32 %v8411_v60, %v1897_v41  ;;  %8747 = vmatprep.subr.bf16.mxu1 %v9391_v33  ;;  %v9412_v9 = vld [vmem:[%s11602_s1 + $0xb88] sm:$0xff]   ;;  %v9413_v60 = vld [vmem:[%s11602_s1 + $0xb50] sm:$0xff]  }
 0x161   : > { %8726 = vmatpush3.bf16.msra.mxu0 %v9390_v37  ;;  %v9426_v15 = vld [vmem:[%s11602_s1 + $0xb28] sm:$0xff]  }
 0x162   : > { %v8375_v56 = vpop.f32.mrb[52].mxu0  ;;  %v11015_v11 = vadd.f32 %v8414_v35, %v1898_v47  ;;  %8727 = vmatprep.subr.bf16.mxu0 %v9393_v61 }
 0x163   : > { %v8376_v63 = vpop.f32.mrb[53].mxu0  ;;  %8748 = vmatpush3.bf16.msra.mxu1 %v9392_v34  ;;  %v8415_v36 = vpop.f32.mrb[52].mxu1 }
 0x164   : > { %v8377_v55 = vadd.f32 %v8376_v63, %v8375_v56  ;;  %v8378_v50 = vpop.f32.mrb[54].mxu0  ;;  %8749 = vmatprep.subr.bf16.mxu1 %v9395_v52  ;;  %v8416_v6 = vpop.f32.mrb[53].mxu1  ;;  %v9415_v56 = vld [vmem:[%s11602_s1 + $0xbd0] sm:$0xff]  }
 0x165   : > { %v8379_v43 = vpop.f32.mrb[55].mxu0  ;;  %8728 = vmatpush3.bf16.msra.mxu0 %v9394_v38  ;;  %v8417_v17 = vadd.f32 %v8416_v6, %v8415_v36  ;;  %v8418_v7 = vpop.f32.mrb[54].mxu1  ;;  %v9418_v36 = vld [vmem:[%s11602_s1 + $0xb18] sm:$0xff]  }
 0x166   : > { %v1899_v53 = vadd.f32 %v8377_v55, %v10914_v48  ;;  %v8380_v13 = vadd.f32 %v8379_v43, %v8378_v50  ;;  %8729 = vmatprep.subr.bf16.mxu0 %v9397_v3  ;;  %v8419_v23 = vpop.f32.mrb[55].mxu1  ;;  %v9417_v55 = vld [vmem:[%s11602_s1 + $0xb58] sm:$0xff]  }
 0x167   : > { %8750 = vmatpush3.bf16.msra.mxu1 %v9396_v57  ;;  %v8420_v12 = vadd.f32 %v8419_v23, %v8418_v7  ;;  %v9419_v43 = vld [vmem:[%s11602_s1 + $0xbd8] sm:$0xff]   ;;  %v9422_v23 = vld [vmem:[%s11602_s1 + $0xb20] sm:$0xff]  }
 0x168   : > { %v1900_v48 = vadd.f32 %v8380_v13, %v10924_v0  ;;  %v11037_v20 = vadd.f32 %v8417_v17, %v1899_v53  ;;  %8751 = vmatprep.subr.bf16.mxu1 %v9399_v54  ;;  %v9403_v0 = vld [vmem:[%s11602_s1 + $0xb40] sm:$0xff]  }
 0x169   : > { %8730 = vmatpush3.bf16.msra.mxu0 %v9398_v58  ;;  %v9420_v58 = vld [vmem:[%s11602_s1 + $0xb98] sm:$0xff]   ;;  %v9421_v17 = vld [vmem:[%s11602_s1 + $0xb60] sm:$0xff]  }
 0x16a   : > { %v8381_v28 = vpop.f32.mrb[56].mxu0  ;;  %v11043_v2 = vadd.f32 %v8420_v12, %v1900_v48  ;;  %8759 = vmatprep.subr.bf16.mxu0 %v9403_v0 }
 0x16b   : > { %v8382_v21 = vpop.f32.mrb[57].mxu0  ;;  %8752 = vmatpush3.bf16.msra.mxu1 %v9402_v24  ;;  %v8421_v18 = vpop.f32.mrb[56].mxu1 }
 0x16c   : > { %v8383_v39 = vadd.f32 %v8382_v21, %v8381_v28  ;;  %v8384_v19 = vpop.f32.mrb[58].mxu0  ;;  %4642 = vmatmul.mubr.bf16.vlgmr.msra.gmra.mrb[100].mxu0 %v7587_v25  ;;  %8781 = vmatprep.subr.bf16.mxu1 %v9407_v51  ;;  %v8422_v41 = vpop.f32.mrb[57].mxu1  ;;  %v9423_v25 = vld [vmem:[%s11602_s1 + $0xbe0] sm:$0xff]  }
 0x16d   : > { %8760 = vmatpush3.bf16.msra.mxu0 %v9406_v4  ;;  %v8385_v59 = vpop.f32.mrb[59].mxu0  ;;  %v8423_v62 = vadd.f32 %v8422_v41, %v8421_v18  ;;  %v8424_v44 = vpop.f32.mrb[58].mxu1  ;;  %v11121_v28 = vld [vmem:[%s11603_s2] ss:$0 sm:$0xff] }
 0x16e   : > { %v1901_v14 = vadd.f32 %v8383_v39, %v10943_v26  ;;  %8761 = vmatprep.subr.bf16.mxu0 %v9409_v32  ;;  %4822 = vmatmul.mubr.bf16.vlgmr.msra.gmra.mrb[88].mxu1 %v4689_v8  ;;  %v8386_v26 = vadd.f32 %v8385_v59, %v8384_v19  ;;  %v8425_v37 = vpop.f32.mrb[59].mxu1  ;;  %v9427_v19 = vld [vmem:[%s11602_s1 + $0xbe8] sm:$0xff]  }
 0x16f   : > { %8782 = vmatpush3.bf16.msra.mxu1 %v9408_v31  ;;  %v8426_v33 = vadd.f32 %v8425_v37, %v8424_v44  ;;  %v9428_v8 = vld [vmem:[%s11602_s1 + $0xba8] sm:$0xff]  }
 0x170   : > { %v1902_v46 = vadd.f32 %v8386_v26, %v10951_v10  ;;  %v11075_v47 = vadd.f32 %v8423_v62, %v1901_v14  ;;  %8783 = vmatprep.subr.bf16.mxu1 %v9411_v42  ;;  %v9416_v10 = vld [vmem:[%s11602_s1 + $0xb90] sm:$0xff]  }
 0x171   : > { %8762 = vmatpush3.bf16.msra.mxu0 %v9410_v40  ;;  %v9429_v14 = vld [vmem:[%s11602_s1 + $0xb70] sm:$0xff]  }
 0x172   : > { %8763 = vmatprep.subr.bf16.mxu0 %v9413_v60  ;;  %v8387_v34 = vpop.f32.mrb[60].mxu0  ;;  %v11080_v35 = vadd.f32 %v8426_v33, %v1902_v46  ;;  %v9431_v42 = vld [vmem:[%s11602_s1 + $0xbf0] sm:$0xff]   ;;  %v9433_v60 = vld [vmem:[%s11602_s1 + $0xb78] sm:$0xff]  }
 0x173   : > { %v8388_v61 = vpop.f32.mrb[61].mxu0  ;;  %8784 = vmatpush3.bf16.msra.mxu1 %v9412_v9  ;;  %v8427_v50 = vpop.f32.mrb[60].mxu1  ;;  %v9432_v62 = vld [vmem:[%s11602_s1 + $0xbb0] sm:$0xff]  }
 0x174   : > { %v8389_v63 = vadd.f32 %v8388_v61, %v8387_v34  ;;  %v8390_v38 = vpop.f32.mrb[62].mxu0  ;;  %8785 = vmatprep.subr.bf16.mxu1 %v9415_v56  ;;  %v8428_v53 = vpop.f32.mrb[61].mxu1  ;;  %v9435_v56 = vld [vmem:[%s11602_s1 + $0xbf8] sm:$0xff]  }
 0x175   : > { %8764 = vmatpush3.bf16.msra.mxu0 %v9414_v5  ;;  %v8391_v57 = vpop.f32.mrb[63].mxu0  ;;  %v8429_v13 = vadd.f32 %v8428_v53, %v8427_v50  ;;  %v8430_v6 = vpop.f32.mrb[62].mxu1  ;;  %v9434_v5 = vld [vmem:[%s11602_s1 + $0xb38] sm:$0xff]   ;;  %v9439_v50 = vld [vmem:[%s11602_s1 + $0xc40] sm:$0xff]  }
 0x176   : > { %v1903_v52 = vadd.f32 %v8389_v63, %v10973_v27  ;;  %8765 = vmatprep.subr.bf16.mxu0 %v9417_v55  ;;  %v8392_v3 = vadd.f32 %v8391_v57, %v8390_v38  ;;  %v8431_v27 = vpop.f32.mrb[63].mxu1 }
 0x177   : > { %8786 = vmatpush3.bf16.msra.mxu1 %v9416_v10  ;;  %v8432_v54 = vadd.f32 %v8431_v27, %v8430_v6  ;;  %v4830_v10 = vld [vmem:[%s9705_s27 + $0x140] sm:$0x66] }
 0x178   : > { %v1904_v7 = vadd.f32 %v8392_v3, %v10982_v29  ;;  %v11105_v48 = vadd.f32 %v8429_v13, %v1903_v52  ;;  %8787 = vmatprep.subr.bf16.mxu1 %v9419_v43  ;;  %v9424_v29 = vld [vmem:[%s11602_s1 + $0xba0] sm:$0xff]   ;;  %v7687_v63 = vcombine.low %v4830_v10, %v4830_v10  ;;  %v7688_v38 = vcombine.high %v4830_v10, %v4830_v10  ;;  %v5010_v52 = vld [vmem:[%s9705_s27 + $0x148] sm:$0x66] }
 0x179   : > { %8766 = vmatpush3.bf16.msra.mxu0 %v9418_v36  ;;  %v7737_v43 = vcombine.low %v5010_v52, %v5010_v52  ;;  %v7738_v3 = vcombine.high %v5010_v52, %v5010_v52  ;;  %v9442_v13 = vld [vmem:[%s11602_s1 + $0xc00] sm:$0xff]  }
 0x17a   : > { %8767 = vmatprep.subr.bf16.mxu0 %v9421_v17  ;;  %v8449_v45 = vpop.f32.mrb[64].mxu0  ;;  %v11110_v12 = vadd.f32 %v8432_v54, %v1904_v7  ;;  %v4869_v57 = vrot.slane %v7687_v63, 1  ;;  %v4870_v53 = vrot.slane %v7688_v38, 1  ;;  %v9443_v6 = vld [vmem:[%s11602_s1 + $0xcc0] sm:$0xff]   ;;  %v9445_v54 = vld [vmem:[%s11602_s1 + $0xc48] sm:$0xff]  }
 0x17b   : > { %v8450_v22 = vpop.f32.mrb[65].mxu0  ;;  %8788 = vmatpush3.bf16.msra.mxu1 %v9420_v58  ;;  %v8489_v39 = vpop.f32.mrb[64].mxu1  ;;  %v5049_v27 = vrot.slane %v7737_v43, 1  ;;  %v5050_v17 = vrot.slane %v7738_v3, 1  ;;  %v9444_v7 = vld [vmem:[%s11602_s1 + $0xc80] sm:$0xff]   ;;  %v9468_v43 = vld [vmem:[%s11602_s1 + $0xcb0] sm:$0xff]  }
 0x17c   : > { %v8451_v24 = vadd.f32 %v8450_v22, %v8449_v45  ;;  %v8452_v0 = vpop.f32.mrb[66].mxu0  ;;  %8789 = vmatprep.subr.bf16.mxu1 %v9423_v25  ;;  %v8490_v51 = vpop.f32.mrb[65].mxu1  ;;  %5001 = vmatprep.mubr.bf16.mxu0 %v4870_v53  ;;  %v9446_v25 = vld [vmem:[%s11602_s1 + $0xc08] sm:$0xff]   ;;  %v9467_v53 = vld [vmem:[%s11602_s1 + $0xcf0] sm:$0xff]   ;;  %v9469_v3 = vld [vmem:[%s11602_s1 + $0xc78] sm:$0xff]  }
 0x17d   : > { %8768 = vmatpush3.bf16.msra.mxu0 %v9422_v23  ;;  %v8453_v21 = vpop.f32.mrb[67].mxu0  ;;  %v11145_v31 = vadd.f32 %v8490_v51, %v8489_v39  ;;  %v8492_v37 = vpop.f32.mrb[66].mxu1  ;;  %5181 = vmatprep.mubr.bf16.mxu1 %v5050_v17 }
 0x17e   : > { %v2397_v1 = vadd.f32 %v8451_v24, %v11007_v16  ;;  %v8454_v4 = vadd.f32 %v8453_v21, %v8452_v0  ;;  %8769 = vmatprep.subr.bf16.mxu0 %v9425_v49  ;;  %v8493_v46 = vpop.f32.mrb[67].mxu1 }
 0x17f   : > { %8790 = vmatpush3.bf16.msra.mxu1 %v9424_v29  ;;  %v9447_v29 = vld [vmem:[%s11602_s1 + $0xcc8] sm:$0xff]  }
 0x180   : > { %v2412_v16 = vadd.f32 %v11121_v28, %v2397_v1  ;;  %v2398_v18 = vadd.f32 %v8454_v4, %v11015_v11  ;;  %8791 = vmatprep.subr.bf16.mxu1 %v9427_v19  ;;  %v9430_v11 = vld [vmem:[%s11602_s1 + $0xb30] sm:$0xff]  }
 0x181   : > { %8770 = vmatpush3.bf16.msra.mxu0 %v9426_v15  ;;  %v9449_v1 = vld [vmem:[%s11602_s1 + $0xc50] sm:$0xff]  }
 0x182   : > { %v8455_v30 = vpop.f32.mrb[68].mxu0  ;;  %2421 = vst.msk [vmem:[%s11135_s28] sm:$0xff] %vm2420_vm1, %v2412_v16  ;;  %v2413_v40 = vadd.f32 %v11121_v28, %v2398_v18  ;;  %8771 = vmatprep.subr.bf16.mxu0 %v9429_v14  ;;  %v9450_v4 = vld [vmem:[%s11602_s1 + $0xc10] sm:$0xff]   ;;  %v9453_v14 = vld [vmem:[%s11602_s1 + $0xc58] sm:$0xff]  }
 0x183   : > { %v8456_v32 = vpop.f32.mrb[69].mxu0  ;;  %8792 = vmatpush3.bf16.msra.mxu1 %v9428_v8  ;;  %v9452_v18 = vld [vmem:[%s11602_s1 + $0xc90] sm:$0xff]  }
 0x184   : > { %v8457_v59 = vadd.f32 %v8456_v32, %v8455_v30  ;;  %v8458_v41 = vpop.f32.mrb[70].mxu0  ;;  %2422 = vst.msk [vmem:[%s11135_s28 + $0x8] sm:$0xff] %vm2420_vm1, %v2413_v40  ;;  %8793 = vmatprep.subr.bf16.mxu1 %v9431_v42  ;;  %v9454_v40 = vld [vmem:[%s11602_s1 + $0xc18] sm:$0xff]  }
 0x185   : > { %v8459_v26 = vpop.f32.mrb[71].mxu0  ;;  %8772 = vmatpush3.bf16.msra.mxu0 %v9430_v11 }
 0x186   : > { %v2399_v44 = vadd.f32 %v8457_v59, %v11037_v20  ;;  %v8460_v9 = vadd.f32 %v8459_v26, %v8458_v41  ;;  %v11173_v20 = vadd.f32 %v8493_v46, %v8492_v37  ;;  %8773 = vmatprep.subr.bf16.mxu0 %v9433_v60  ;;  %v9456_v41 = vld [vmem:[%s11602_s1 + $0xc98] sm:$0xff]   ;;  %v9460_v60 = vld [vmem:[%s11602_s1 + $0xca0] sm:$0xff]  }
 0x187   : > { %8794 = vmatpush3.bf16.msra.mxu1 %v9432_v62  ;;  %v9458_v62 = vld [vmem:[%s11602_s1 + $0xc20] sm:$0xff]  }
 0x188   : > { %v2414_v33 = vadd.f32 %v11121_v28, %v2399_v44  ;;  %v2400_v34 = vadd.f32 %v8460_v9, %v11043_v2  ;;  %8795 = vmatprep.subr.bf16.mxu1 %v9435_v56  ;;  %v9438_v2 = vld [vmem:[%s11602_s1 + $0xbb8] sm:$0xff]   ;;  %v9459_v9 = vld [vmem:[%s11602_s1 + $0xce0] sm:$0xff]  }
 0x189   : > { %8774 = vmatpush3.bf16.msra.mxu0 %v9434_v5  ;;  %v9461_v5 = vld [vmem:[%s11602_s1 + $0xc68] sm:$0xff]  }
 0x18a   : > { %2423 = vst.msk [vmem:[%s11135_s28 + $0x10] sm:$0xff] %vm2420_vm1, %v2414_v33  ;;  %v2415_v61 = vadd.f32 %v11121_v28, %v2400_v34  ;;  %v8461_v55 = vpop.f32.mrb[72].mxu0  ;;  %8803 = vmatprep.subr.bf16.mxu0 %v9439_v50  ;;  %v9464_v50 = vld [vmem:[%s11602_s1 + $0xca8] sm:$0xff]  }
 0x18b   : > { %v8462_v36 = vpop.f32.mrb[73].mxu0  ;;  %8796 = vmatpush3.bf16.msra.mxu1 %v9438_v2 }
 0x18c   : > { %2424 = vst.msk [vmem:[%s11135_s28 + $0x18] sm:$0xff] %vm2420_vm1, %v2415_v61  ;;  %v8463_v58 = vadd.f32 %v8462_v36, %v8461_v55  ;;  %8825 = vmatprep.subr.bf16.mxu1 %v9443_v6  ;;  %5002 = vmatmul.mubr.bf16.vlgmr.msra.gmra.mrb[104].mxu0 %v4869_v57  ;;  %v8464_v45 = vpop.f32.mrb[74].mxu0  ;;  %v9462_v61 = vld [vmem:[%s11602_s1 + $0xc28] sm:$0xff]   ;;  %v9465_v36 = vld [vmem:[%s11602_s1 + $0xc70] sm:$0xff]   ;;  %v9471_v6 = vld [vmem:[%s11602_s1 + $0xcf8] sm:$0xff]  }
 0x18d   : > { %8804 = vmatpush3.bf16.msra.mxu0 %v9442_v13  ;;  %v8465_v22 = vpop.f32.mrb[75].mxu0  ;;  %v9466_v57 = vld [vmem:[%s11602_s1 + $0xc30] sm:$0xff]   ;;  %v9470_v13 = vld [vmem:[%s11602_s1 + $0xc38] sm:$0xff]  }
 0x18e   : > { %v2401_v23 = vadd.f32 %v8463_v58, %v11075_v47  ;;  %5182 = vmatmul.mubr.bf16.vlgmr.msra.gmra.mrb[92].mxu1 %v5049_v27  ;;  %8805 = vmatprep.subr.bf16.mxu0 %v9445_v54  ;;  %v8466_v0 = vadd.f32 %v8465_v22, %v8464_v45  ;;  %v9448_v47 = vld [vmem:[%s11602_s1 + $0xc88] sm:$0xff]   ;;  %v5190_v58 = vld [vmem:[%s9705_s27 + $0x138] sm:$0xcc]  ;;  %v9475_v54 = vld [vmem:[%s11602_s1 + $0xd40] sm:$0xff]  }
 0x18f   : > { %8826 = vmatpush3.bf16.msra.mxu1 %v9444_v7  ;;  %v7787_v27 = vcombine.low %v5190_v58, %v5190_v58  ;;  %v7788_v17 = vcombine.high %v5190_v58, %v5190_v58  ;;  %v9474_v7 = vld [vmem:[%s11602_s1 + $0xcb8] sm:$0xff]   ;;  %v9516_v58 = vld [vmem:[%s11602_s1 + $0xfa8] sm:$0xff]  }
 0x190   : > { %v2416_v24 = vadd.f32 %v11121_v28, %v2401_v23  ;;  %v2402_v21 = vadd.f32 %v8466_v0, %v11080_v35  ;;  %8827 = vmatprep.subr.bf16.mxu1 %v9447_v29  ;;  %v9451_v35 = vld [vmem:[%s11602_s1 + $0xcd0] sm:$0xff]   ;;  %v9479_v0 = vld [vmem:[%s11602_s1 + $0xd48] sm:$0xff]  }
 0x191   : > { %8806 = vmatpush3.bf16.msra.mxu0 %v9446_v25  ;;  %v5229_v23 = vrot.slane %v7787_v27, 2  ;;  %v5230_v45 = vrot.slane %v7788_v17, 2  ;;  %v5370_v25 = vld [vmem:[%s9705_s27 + $0x140] sm:$0xcc]  ;;  %v9507_v27 = vld [vmem:[%s11602_s1 + $0x1410] sm:$0xff]  }
 0x192   : > { %v8467_v49 = vpop.f32.mrb[76].mxu0  ;;  %2425 = vst.msk [vmem:[%s11135_s28 + $0x20] sm:$0xff] %vm2420_vm1, %v2416_v24  ;;  %v2417_v51 = vadd.f32 %v11121_v28, %v2402_v21  ;;  %8807 = vmatprep.subr.bf16.mxu0 %v9449_v1  ;;  %v7837_v22 = vcombine.low %v5370_v25, %v5370_v25  ;;  %v7838_v29 = vcombine.high %v5370_v25, %v5370_v25  ;;  %v9478_v24 = vld [vmem:[%s11602_s1 + $0xd00] sm:$0xff]   ;;  %v9480_v21 = vld [vmem:[%s11602_s1 + $0xd08] sm:$0xff]   ;;  %v9481_v1 = vld [vmem:[%s11602_s1 + $0xd50] sm:$0xff]  }
 0x193   : > { %v8468_v15 = vpop.f32.mrb[77].mxu0  ;;  %8828 = vmatpush3.bf16.msra.mxu1 %v9448_v47  ;;  %5361 = vmatprep.mubr.bf16.mxu0 %v5230_v45  ;;  %v9518_v17 = vld [vmem:[%s11602_s1 + $0xff0] sm:$0xff]   ;;  %v9522_v45 = vld [vmem:[%s11602_s1 + $0xff8] sm:$0xff]   ;;  %v9513_v25 = vld [vmem:[%s11602_s1 + $0x1460] sm:$0xff]  }
 0x194   : > { %v8469_v39 = vadd.f32 %v8468_v15, %v8467_v49  ;;  %v8470_v19 = vpop.f32.mrb[78].mxu0  ;;  %2426 = vst.msk [vmem:[%s11135_s28 + $0x28] sm:$0xff] %vm2420_vm1, %v2417_v51  ;;  %8829 = vmatprep.subr.bf16.mxu1 %v9451_v35  ;;  %v5409_v47 = vrot.slane %v7837_v22, 2  ;;  %v5410_v49 = vrot.slane %v7838_v29, 2  ;;  %v9482_v15 = vld [vmem:[%s11602_s1 + $0xd10] sm:$0xff]   ;;  %v9486_v51 = vld [vmem:[%s11602_s1 + $0xd20] sm:$0xff]  }
 0x195   : > { %v8471_v16 = vpop.f32.mrb[79].mxu0  ;;  %8808 = vmatpush3.bf16.msra.mxu0 %v9450_v4  ;;  %v9483_v4 = vld [vmem:[%s11602_s1 + $0xd58] sm:$0xff]   ;;  %v9487_v35 = vld [vmem:[%s11602_s1 + $0xd68] sm:$0xff]   ;;  %v9515_v29 = vld [vmem:[%s11602_s1 + $0x1420] sm:$0xff]  }
 0x196   : > { %v2403_v8 = vadd.f32 %v8469_v39, %v11105_v48  ;;  %v8472_v30 = vadd.f32 %v8471_v16, %v8470_v19  ;;  %8809 = vmatprep.subr.bf16.mxu0 %v9453_v14  ;;  %v9455_v48 = vld [vmem:[%s11602_s1 + $0xcd8] sm:$0xff]   ;;  %5541 = vmatprep.mubr.bf16.mxu1 %v5410_v49  ;;  %v9485_v19 = vld [vmem:[%s11602_s1 + $0xd60] sm:$0xff]  }
 0x197   : > { %8830 = vmatpush3.bf16.msra.mxu1 %v9452_v18  ;;  %v9484_v39 = vld [vmem:[%s11602_s1 + $0xd18] sm:$0xff]   ;;  %v9493_v16 = vld [vmem:[%s11602_s1 + $0xfc0] sm:$0xff]  }
 0x198   : > { %v2418_v32 = vadd.f32 %v11121_v28, %v2403_v8  ;;  %v2404_v11 = vadd.f32 %v8472_v30, %v11110_v12  ;;  %8831 = vmatprep.subr.bf16.mxu1 %v9455_v48  ;;  %v9457_v12 = vld [vmem:[%s11602_s1 + $0xc60] sm:$0xff]   ;;  %v5550_v8 = vld [vmem:[%s9705_s27 + $0x148] sm:$0xcc]  ;;  %v9524_v22 = vld [vmem:[%s11602_s1 + $0xfb8] sm:$0xff]  }
 0x199   : > { %8810 = vmatpush3.bf16.msra.mxu0 %v9454_v40  ;;  %v9494_v18 = vld [vmem:[%s11602_s1 + $0xf80] sm:$0xff]   ;;  %v7888_v14 = vcombine.high %v5550_v8, %v5550_v8 }
 0x19a   : > { %2427 = vst.msk [vmem:[%s11135_s28 + $0x30] sm:$0xff] %vm2420_vm1, %v2418_v32  ;;  %v2419_v59 = vadd.f32 %v11121_v28, %v2404_v11  ;;  %v8511_v42 = vpop.f32.mrb[80].mxu0  ;;  %8811 = vmatprep.subr.bf16.mxu0 %v9457_v12 }
 0x19b   : > { %v8512_v26 = vpop.f32.mrb[81].mxu0  ;;  %v8533_v37 = vpop.f32.mrb[68].mxu1  ;;  %8832 = vmatpush3.bf16.msra.mxu1 %v9456_v41  ;;  %v5590_v12 = vrot.slane %v7888_v14, 2 }
 0x19c   : > { %2428 = vst.msk [vmem:[%s11135_s28 + $0x38] sm:$0xff] %vm2420_vm1, %v2419_v59  ;;  %v8513_v44 = vadd.f32 %v8512_v26, %v8511_v42  ;;  %v8514_v28 = vpop.f32.mrb[82].mxu0  ;;  %8833 = vmatprep.subr.bf16.mxu1 %v9459_v9  ;;  %v8534_v56 = vpop.f32.mrb[69].mxu1  ;;  %v9488_v59 = vld [vmem:[%s11602_s1 + $0xd28] sm:$0xff]   ;;  %v9489_v42 = vld [vmem:[%s11602_s1 + $0xd70] sm:$0xff]  }
 0x19d   : > { %v8515_v33 = vpop.f32.mrb[83].mxu0  ;;  %8812 = vmatpush3.bf16.msra.mxu0 %v9458_v62  ;;  %v8535_v10 = vadd.f32 %v8534_v56, %v8533_v37  ;;  %v8536_v63 = vpop.f32.mrb[70].mxu1  ;;  %v9498_v26 = vld [vmem:[%s11602_s1 + $0xfc8] sm:$0xff]  }
 0x19e   : > { %v2787_v46 = vadd.f32 %v8513_v44, %v11145_v31  ;;  %v8516_v34 = vadd.f32 %v8515_v33, %v8514_v28  ;;  %8813 = vmatprep.subr.bf16.mxu0 %v9461_v5  ;;  %v9463_v31 = vld [vmem:[%s11602_s1 + $0xce8] sm:$0xff]   ;;  %v8537_v2 = vpop.f32.mrb[71].mxu1  ;;  %v9490_v5 = vld [vmem:[%s11602_s1 + $0xd30] sm:$0xff]  }
 0x19f   : > { %8834 = vmatpush3.bf16.msra.mxu1 %v9460_v60  ;;  %v8538_v52 = vadd.f32 %v8537_v2, %v8536_v63  ;;  %v7887_v2 = vcombine.low %v5550_v8, %v5550_v8 }
 0x1a0   : > { %v2790_v38 = vadd.f32 %v8516_v34, %v11173_v20  ;;  %v11275_v55 = vadd.f32 %v8535_v10, %v2787_v46  ;;  %8835 = vmatprep.subr.bf16.mxu1 %v9463_v31  ;;  %v9500_v46 = vld [vmem:[%s11602_s1 + $0xf88] sm:$0xff]   ;;  %v9491_v10 = vld [vmem:[%s11602_s1 + $0xd78] sm:$0xff]  }
 0x1a1   : > { %8814 = vmatpush3.bf16.msra.mxu0 %v9462_v61  ;;  %v9502_v61 = vld [vmem:[%s11602_s1 + $0xfd0] sm:$0xff]   ;;  %v9492_v31 = vld [vmem:[%s11602_s1 + $0xd38] sm:$0xff]  }
 0x1a2   : > { %v11283_v20 = vadd.f32 %v8538_v52, %v2790_v38  ;;  %8815 = vmatprep.subr.bf16.mxu0 %v9465_v36  ;;  %v9504_v38 = vld [vmem:[%s11602_s1 + $0xf90] sm:$0xff]   ;;  %v9508_v52 = vld [vmem:[%s11602_s1 + $0xf98] sm:$0xff]   ;;  %v5589_v36 = vrot.slane %v7887_v2, 2 }
 0x1a3   : > { %8836 = vmatpush3.bf16.msra.mxu1 %v9464_v50  ;;  %v9497_v50 = vld [vmem:[%s11602_s1 + $0x1440] sm:$0xff]   ;;  %v9541_v2 = vld [vmem:[%s11602_s1 + $0x1d50] sm:$0xff]  }
 0x1a4   : > { %8837 = vmatprep.subr.bf16.mxu1 %v9467_v53  ;;  %v9501_v53 = vld [vmem:[%s11602_s1 + $0x1448] sm:$0xff]  }
 0x1a5   : > { %8816 = vmatpush3.bf16.msra.mxu0 %v9466_v57  ;;  %v9510_v57 = vld [vmem:[%s11602_s1 + $0xfe0] sm:$0xff]  }
 0x1a6   : > { %8817 = vmatprep.subr.bf16.mxu0 %v9469_v3  ;;  %v9503_v3 = vld [vmem:[%s11602_s1 + $0x1408] sm:$0xff]  }
 0x1a7   : > { %8838 = vmatpush3.bf16.msra.mxu1 %v9468_v43  ;;  %v9512_v43 = vld [vmem:[%s11602_s1 + $0xfa0] sm:$0xff]  }
 0x1a8   : > { %8839 = vmatprep.subr.bf16.mxu1 %v9471_v6  ;;  %v9505_v6 = vld [vmem:[%s11602_s1 + $0x1450] sm:$0xff]  }
 0x1a9   : > { %8818 = vmatpush3.bf16.msra.mxu0 %v9470_v13  ;;  %v9514_v13 = vld [vmem:[%s11602_s1 + $0xfe8] sm:$0xff]  }
 0x1aa   : > { %8847 = vmatprep.subr.bf16.mxu0 %v9475_v54  ;;  %v9520_v54 = vld [vmem:[%s11602_s1 + $0xfb0] sm:$0xff]  }
 0x1ab   : > { %8840 = vmatpush3.bf16.msra.mxu1 %v9474_v7  ;;  %v9509_v7 = vld [vmem:[%s11602_s1 + $0x1458] sm:$0xff]  }
 0x1ac   : > { %5362 = vmatmul.mubr.bf16.vlgmr.msra.gmra.mrb[108].mxu0 %v5229_v23  ;;  %8869 = vmatprep.subr.bf16.mxu1 %v9493_v16  ;;  %v9511_v23 = vld [vmem:[%s11602_s1 + $0x1418] sm:$0xff]  }
 0x1ad   : > { %8848 = vmatpush3.bf16.msra.mxu0 %v9478_v24  ;;  %5721 = vmatprep.mubr.bf16.mxu0 %v5590_v12  ;;  %v5741_v24 = vld [vmem:[%s9705_s27 + $0x150] sm:$0x11] }
 0x1ae   : > { %8849 = vmatprep.subr.bf16.mxu0 %v9479_v0  ;;  %5542 = vmatmul.mubr.bf16.vlgmr.msra.gmra.mrb[96].mxu1 %v5409_v47  ;;  %v9517_v0 = vld [vmem:[%s11602_s1 + $0x1468] sm:$0xff]   ;;  %v7940_v47 = vcombine.low %v5741_v24, %v5741_v24  ;;  %v7941_v49 = vcombine.high %v5741_v24, %v5741_v24 }
 0x1af   : > { %8870 = vmatpush3.bf16.msra.mxu1 %v9494_v18  ;;  %v9534_v18 = vld [vmem:[%s11602_s1 + $0x18c8] sm:$0xff]  }
 0x1b0   : > { %8871 = vmatprep.subr.bf16.mxu1 %v9498_v26  ;;  %5912 = vmatprep.mubr.bf16.mxu1 %v7941_v49  ;;  %v9536_v26 = vld [vmem:[%s11602_s1 + $0x1888] sm:$0xff]   ;;  %v9557_v49 = vld [vmem:[%s11602_s1 + $0x1d70] sm:$0xff]  }
 0x1b1   : > { %8850 = vmatpush3.bf16.msra.mxu0 %v9480_v21  ;;  %v9519_v21 = vld [vmem:[%s11602_s1 + $0x1428] sm:$0xff]  }
 0x1b2   : > { %8851 = vmatprep.subr.bf16.mxu0 %v9481_v1  ;;  %v9529_v1 = vld [vmem:[%s11602_s1 + $0x18c0] sm:$0xff]  }
 0x1b3   : > { %8872 = vmatpush3.bf16.msra.mxu1 %v9500_v46  ;;  %v9540_v46 = vld [vmem:[%s11602_s1 + $0x1890] sm:$0xff]  }
 0x1b4   : > { %8873 = vmatprep.subr.bf16.mxu1 %v9502_v61  ;;  %v9544_v61 = vld [vmem:[%s11602_s1 + $0x1898] sm:$0xff]  }
 0x1b5   : > { %8852 = vmatpush3.bf16.msra.mxu0 %v9482_v15 }
 0x1b6   : > { %8853 = vmatprep.subr.bf16.mxu0 %v9483_v4  ;;  %v9530_v4 = vld [vmem:[%s11602_s1 + $0x1880] sm:$0xff]  }
 0x1b7   : > { %8874 = vmatpush3.bf16.msra.mxu1 %v9504_v38  ;;  %v9539_v38 = vld [vmem:[%s11602_s1 + $0x1d08] sm:$0xff]  }
 0x1b9   : > { %8854 = vmatpush3.bf16.msra.mxu0 %v9484_v39  ;;  %v5922_v39 = vld [vmem:[%s9705_s27 + $0x158] sm:$0x11] }
 0x1ba   : > { %8855 = vmatprep.subr.bf16.mxu0 %v9485_v19  ;;  %v8555_v30 = vpop.f32.mrb[84].mxu0  ;;  %v7992_v16 = vcombine.high %v5922_v39, %v5922_v39 }
 0x1bb   : > { %v8556_v32 = vpop.f32.mrb[85].mxu0  ;;  %v8577_v40 = vpop.f32.mrb[72].mxu1 }
 0x1bc   : > { %v8557_v11 = vadd.f32 %v8556_v32, %v8555_v30  ;;  %v8558_v48 = vpop.f32.mrb[86].mxu0  ;;  %v8578_v41 = vpop.f32.mrb[73].mxu1 }
 0x1bd   : > { %8856 = vmatpush3.bf16.msra.mxu0 %v9486_v51  ;;  %v8559_v62 = vpop.f32.mrb[87].mxu0  ;;  %v8579_v44 = vadd.f32 %v8578_v41, %v8577_v40  ;;  %v8580_v28 = vpop.f32.mrb[74].mxu1  ;;  %v9523_v41 = vld [vmem:[%s11602_s1 + $0x1430] sm:$0xff]  }
 0x1be   : > { %8857 = vmatprep.subr.bf16.mxu0 %v9487_v35  ;;  %v3172_v9 = vadd.f32 %v8557_v11, %v11275_v55  ;;  %v8560_v37 = vadd.f32 %v8559_v62, %v8558_v48  ;;  %v8581_v60 = vpop.f32.mrb[75].mxu1  ;;  %v9506_v55 = vld [vmem:[%s11602_s1 + $0xfd8] sm:$0xff]   ;;  %v9521_v35 = vld [vmem:[%s11602_s1 + $0x1470] sm:$0xff]  }
 0x1bf   : > { %v8582_v33 = vadd.f32 %v8581_v60, %v8580_v28  ;;  %8875 = vmatprep.subr.bf16.mxu1 %v9506_v55  ;;  %v9525_v62 = vld [vmem:[%s11602_s1 + $0x1478] sm:$0xff]   ;;  %v9550_v55 = vld [vmem:[%s11602_s1 + $0x18e8] sm:$0xff]  }
 0x1c0   : > { %v3173_v34 = vadd.f32 %v8560_v37, %v11283_v20  ;;  %v11365_v56 = vadd.f32 %v8579_v44, %v3172_v9  ;;  %v9499_v20 = vld [vmem:[%s11602_s1 + $0x1400] sm:$0xff]   ;;  %8876 = vmatpush3.bf16.msra.mxu1 %v9508_v52  ;;  %v9538_v9 = vld [vmem:[%s11602_s1 + $0x18d0] sm:$0xff]   ;;  %v9528_v37 = vld [vmem:[%s11602_s1 + $0x1438] sm:$0xff]  }
 0x1c1   : > { %8858 = vmatpush3.bf16.msra.mxu0 %v9488_v59  ;;  %8877 = vmatprep.subr.bf16.mxu1 %v9510_v57  ;;  %v9552_v52 = vld [vmem:[%s11602_s1 + $0x18a8] sm:$0xff]   ;;  %v9547_v57 = vld [vmem:[%s11602_s1 + $0x1d18] sm:$0xff]  }
 0x1c2   : > { %8859 = vmatprep.subr.bf16.mxu0 %v9489_v42  ;;  %v11373_v63 = vadd.f32 %v8582_v33, %v3173_v34  ;;  %v9533_v33 = vld [vmem:[%s11602_s1 + $0x1d40] sm:$0xff]   ;;  %v7991_v34 = vcombine.low %v5922_v39, %v5922_v39 }
 0x1c4   : > { %8878 = vmatpush3.bf16.msra.mxu1 %v9512_v43  ;;  %v9549_v43 = vld [vmem:[%s11602_s1 + $0x1d60] sm:$0xff]  }
 0x1c5   : > { %8860 = vmatpush3.bf16.msra.mxu0 %v9490_v5  ;;  %8879 = vmatprep.subr.bf16.mxu1 %v9514_v13  ;;  %v9542_v5 = vld [vmem:[%s11602_s1 + $0x18d8] sm:$0xff]   ;;  %v9551_v13 = vld [vmem:[%s11602_s1 + $0x1d20] sm:$0xff]  }
 0x1c6   : > { %8861 = vmatprep.subr.bf16.mxu0 %v9491_v10  ;;  %v9537_v10 = vld [vmem:[%s11602_s1 + $0x1d48] sm:$0xff]  }
 0x1c8   : > { %8880 = vmatpush3.bf16.msra.mxu1 %v9516_v58  ;;  %v6102_v58 = vld [vmem:[%s9705_s27 + $0x160] sm:$0x11] }
 0x1c9   : > { %8862 = vmatpush3.bf16.msra.mxu0 %v9492_v31  ;;  %8881 = vmatprep.subr.bf16.mxu1 %v9518_v17  ;;  %v9548_v31 = vld [vmem:[%s11602_s1 + $0x18a0] sm:$0xff]   ;;  %v8042_v17 = vcombine.low %v6102_v58, %v6102_v58 }
 0x1ca   : > { %8891 = vmatprep.subr.bf16.mxu0 %v9497_v50  ;;  %v9543_v50 = vld [vmem:[%s11602_s1 + $0x1d10] sm:$0xff]  }
 0x1cc   : > { %5722 = vmatmul.mubr.bf16.vlgmr.msra.gmra.mrb[112].mxu0 %v5589_v36  ;;  %8882 = vmatpush3.bf16.msra.mxu1 %v9520_v54  ;;  %v9545_v36 = vld [vmem:[%s11602_s1 + $0x1d58] sm:$0xff]  }
 0x1cd   : > { %8892 = vmatpush3.bf16.msra.mxu0 %v9499_v20  ;;  %8883 = vmatprep.subr.bf16.mxu1 %v9522_v45  ;;  %v9554_v20 = vld [vmem:[%s11602_s1 + $0x18f0] sm:$0xff]  }
 0x1ce   : > { %8893 = vmatprep.subr.bf16.mxu0 %v9501_v53  ;;  %6093 = vmatprep.mubr.bf16.mxu0 %v7992_v16  ;;  %v9556_v53 = vld [vmem:[%s11602_s1 + $0x18b0] sm:$0xff]   ;;  %v7454_v16 = vld [vmem:[%s11603_s2 + $0x1] ss:$0 sm:$0xff] }
 0x1d0   : > { %8884 = vmatpush3.bf16.msra.mxu1 %v9524_v22 }
 0x1d1   : > { %8894 = vmatpush3.bf16.msra.mxu0 %v9503_v3  ;;  %8913 = vmatprep.subr.bf16.mxu1 %v9529_v1  ;;  %v9558_v3 = vld [vmem:[%s11602_s1 + $0x18f8] sm:$0xff]  }
 0x1d2   : > { %8895 = vmatprep.subr.bf16.mxu0 %v9505_v6  ;;  %v9560_v6 = vld [vmem:[%s11602_s1 + $0x18b8] sm:$0xff]  }
 0x1d3   : > { %5913 = vmatmul.mubr.bf16.vlgmr.msra.gmra.mrb[100].mxu1 %v7940_v47 }
 0x1d4   : > { %8914 = vmatpush3.bf16.msra.mxu1 %v9530_v4 }
 0x1d5   : > { %8896 = vmatpush3.bf16.msra.mxu0 %v9507_v27  ;;  %8915 = vmatprep.subr.bf16.mxu1 %v9534_v18  ;;  %v9553_v27 = vld [vmem:[%s11602_s1 + $0x1d68] sm:$0xff]   ;;  %v9563_v18 = vld [vmem:[%s11602_s1 + $0x1d78] sm:$0xff]  }
 0x1d6   : > { %8897 = vmatprep.subr.bf16.mxu0 %v9509_v7  ;;  %v8043_v7 = vcombine.high %v6102_v58, %v6102_v58 }
 0x1d8   : > { %8916 = vmatpush3.bf16.msra.mxu1 %v9536_v26  ;;  %6273 = vmatprep.mubr.bf16.mxu1 %v8043_v7 }
 0x1d9   : > { %8898 = vmatpush3.bf16.msra.mxu0 %v9511_v23  ;;  %8917 = vmatprep.subr.bf16.mxu1 %v9538_v9  ;;  %v6282_v23 = vld [vmem:[%s9705_s27 + $0x168] sm:$0x11] }
 0x1da   : > { %8899 = vmatprep.subr.bf16.mxu0 %v9513_v25  ;;  %v8599_v19 = vpop.f32.mrb[88].mxu0  ;;  %v9555_v25 = vld [vmem:[%s11602_s1 + $0x1d28] sm:$0xff]  }
 0x1db   : > { %v8621_v15 = vpop.f32.mrb[76].mxu1  ;;  %v8600_v8 = vpop.f32.mrb[89].mxu0 }
 0x1dc   : > { %v8622_v51 = vpop.f32.mrb[77].mxu1  ;;  %v8601_v32 = vadd.f32 %v8600_v8, %v8599_v19  ;;  %v8602_v40 = vpop.f32.mrb[90].mxu0  ;;  %8918 = vmatpush3.bf16.msra.mxu1 %v9540_v46 }
 0x1dd   : > { %8900 = vmatpush3.bf16.msra.mxu0 %v9515_v29  ;;  %v8623_v30 = vadd.f32 %v8622_v51, %v8621_v15  ;;  %v8624_v14 = vpop.f32.mrb[78].mxu1  ;;  %v8603_v48 = vpop.f32.mrb[91].mxu0  ;;  %8919 = vmatprep.subr.bf16.mxu1 %v9542_v5  ;;  %v8094_v29 = vcombine.high %v6282_v23, %v6282_v23 }
 0x1de   : > { %8901 = vmatprep.subr.bf16.mxu0 %v9517_v0  ;;  %v8625_v11 = vpop.f32.mrb[79].mxu1  ;;  %v3564_v42 = vadd.f32 %v8601_v32, %v11365_v56  ;;  %v8604_v12 = vadd.f32 %v8603_v48, %v8602_v40  ;;  %v9535_v56 = vld [vmem:[%s11602_s1 + $0x1d00] sm:$0xff]   ;;  %v9564_v40 = vld [vmem:[%s11602_s1 + $0x1d38] sm:$0xff]   ;;  %v8093_v48 = vcombine.low %v6282_v23, %v6282_v23 }
 0x1df   : > { %v8626_v59 = vadd.f32 %v8625_v11, %v8624_v14 }
 0x1e0   : > { %v3565_v44 = vadd.f32 %v8604_v12, %v11373_v63  ;;  %v11472_v28 = vadd.f32 %v8623_v30, %v3564_v42  ;;  %8920 = vmatpush3.bf16.msra.mxu1 %v9544_v61  ;;  %v9546_v63 = vld [vmem:[%s11602_s1 + $0x18e0] sm:$0xff]  }
 0x1e1   : > { %8902 = vmatpush3.bf16.msra.mxu0 %v9519_v21  ;;  %8921 = vmatprep.subr.bf16.mxu1 %v9546_v63 }
 0x1e2   : > { %8903 = vmatprep.subr.bf16.mxu0 %v9521_v35  ;;  %v11480_v60 = vadd.f32 %v8626_v59, %v3565_v44  ;;  %v9559_v35 = vld [vmem:[%s11602_s1 + $0x1d30] sm:$0xff]  }
 0x1e4   : > { %8922 = vmatpush3.bf16.msra.mxu1 %v9548_v31 }
 0x1e5   : > { %8904 = vmatpush3.bf16.msra.mxu0 %v9523_v41  ;;  %8923 = vmatprep.subr.bf16.mxu1 %v9550_v55 }
 0x1e6   : > { %8905 = vmatprep.subr.bf16.mxu0 %v9525_v62 }
 0x1e8   : > { %8924 = vmatpush3.bf16.msra.mxu1 %v9552_v52 }
 0x1e9   : > { %8906 = vmatpush3.bf16.msra.mxu0 %v9528_v37  ;;  %8925 = vmatprep.subr.bf16.mxu1 %v9554_v20 }
 0x1ea   : > { %8935 = vmatprep.subr.bf16.mxu0 %v9533_v33 }
 0x1ec   : > { %6094 = vmatmul.mubr.bf16.vlgmr.msra.gmra.mrb[116].mxu0 %v7991_v34  ;;  %8926 = vmatpush3.bf16.msra.mxu1 %v9556_v53 }
 0x1ed   : > { %8936 = vmatpush3.bf16.msra.mxu0 %v9535_v56  ;;  %8927 = vmatprep.subr.bf16.mxu1 %v9558_v3 }
 0x1ee   : > { %8937 = vmatprep.subr.bf16.mxu0 %v9537_v10  ;;  %6453 = vmatprep.mubr.bf16.mxu0 %v8094_v29 }
 0x1f0   : > { %8928 = vmatpush3.bf16.msra.mxu1 %v9560_v6 }
 0x1f1   : > { %8938 = vmatpush3.bf16.msra.mxu0 %v9539_v38 }
 0x1f2   : > { %8939 = vmatprep.subr.bf16.mxu0 %v9541_v2 }
 0x1f3   : > { %6274 = vmatmul.mubr.bf16.vlgmr.msra.gmra.mrb[104].mxu1 %v8042_v17 }
 0x1f5   : > { %8940 = vmatpush3.bf16.msra.mxu0 %v9543_v50 }
 0x1f6   : > { %8941 = vmatprep.subr.bf16.mxu0 %v9545_v36 }
 0x1f9   : > { %8942 = vmatpush3.bf16.msra.mxu0 %v9547_v57 }
 0x1fa   : > { %8943 = vmatprep.subr.bf16.mxu0 %v9549_v43 }
 0x1fd   : > { %8944 = vmatpush3.bf16.msra.mxu0 %v9551_v13 }
 0x1fe   : > { %v8643_v45 = vpop.f32.mrb[92].mxu0  ;;  %8945 = vmatprep.subr.bf16.mxu0 %v9553_v27 }
 0x1ff   : > { %v8644_v24 = vpop.f32.mrb[93].mxu0 }
 0x200   : > { %v8645_v21 = vadd.f32 %v8644_v24, %v8643_v45  ;;  %v8646_v1 = vpop.f32.mrb[94].mxu0 }
 0x201   : > { %v8665_v54 = vpop.f32.mrb[80].mxu1  ;;  %v8647_v4 = vpop.f32.mrb[95].mxu0  ;;  %8946 = vmatpush3.bf16.msra.mxu0 %v9555_v25 }
 0x202   : > { %v8666_v22 = vpop.f32.mrb[81].mxu1  ;;  %v3924_v19 = vadd.f32 %v8645_v21, %v11472_v28  ;;  %v8648_v51 = vadd.f32 %v8647_v4, %v8646_v1  ;;  %8947 = vmatprep.subr.bf16.mxu0 %v9557_v49 }
 0x203   : > { %v8667_v0 = vadd.f32 %v8666_v22, %v8665_v54  ;;  %v8668_v47 = vpop.f32.mrb[82].mxu1 }
 0x204   : > { %v8669_v15 = vpop.f32.mrb[83].mxu1  ;;  %v3925_v8 = vadd.f32 %v8648_v51, %v11480_v60 }
 0x205   : > { %v8670_v39 = vadd.f32 %v8669_v15, %v8668_v47  ;;  %v4104_v30 = vadd.f32 %v8667_v0, %v3924_v19  ;;  %8948 = vmatpush3.bf16.msra.mxu0 %v9559_v35 }
 0x206   : > { %8949 = vmatprep.subr.bf16.mxu0 %v9563_v18  ;;  %v7939_v18 = vld [vmem:[%s11603_s2 + $0x3] sm:$0x1] }
 0x207   : > { %v4114_v14 = vadd.f32 %v7454_v16, %v4104_v30  ;;  %v4105_v32 = vadd.f32 %v8670_v39, %v3925_v8  ;;  %v7906_v39 = vld [vmem:[%s11603_s2 + $0x2] ss:$0 sm:$0xff] }
 0x209   : > { %4116 = vst.msk [vmem:[%s11135_s28 + $0x40] sm:$0xff] %vm2420_vm1, %v4114_v14  ;;  %v4115_v11 = vadd.f32 %v7454_v16, %v4105_v32  ;;  %8950 = vmatpush3.bf16.msra.mxu0 %v9564_v40 }
 0x20b   : > { %4117 = vst.msk [vmem:[%s11135_s28 + $0x48] sm:$0xff] %vm2420_vm1, %v4115_v11 }
 0x20c   : > { %6454 = vmatmul.mubr.bf16.vlgmr.msra.gmra.mrb[120].mxu0 %v8093_v48  ;;  %v7990_v48 = vld [vmem:[%s11603_s2 + $0x4] sm:$0x1] }
 0x21f   : > { %v8687_v59 = vpop.f32.mrb[96].mxu0 }
 0x220   : > { %v8688_v42 = vpop.f32.mrb[97].mxu0 }
 0x221   : > { %v8709_v41 = vpop.f32.mrb[84].mxu1  ;;  %v8689_v26 = vadd.f32 %v8688_v42, %v8687_v59  ;;  %v8690_v44 = vpop.f32.mrb[98].mxu0 }
 0x222   : > { %v8710_v12 = vpop.f32.mrb[85].mxu1  ;;  %v8691_v9 = vpop.f32.mrb[99].mxu0  ;;  %v8041_v44 = vld [vmem:[%s11603_s2 + $0x5] sm:$0x1] }
 0x223   : > { %v8711_v62 = vadd.f32 %v8710_v12, %v8709_v41  ;;  %v8712_v28 = vpop.f32.mrb[86].mxu1 }
 0x224   : > { %v8713_v37 = vpop.f32.mrb[87].mxu1 }
 0x225   : > { %v4467_v60 = vadd.f32 %v8711_v62, %v8689_v26 }
 0x23f   : > { %v8731_v46 = vpop.f32.mrb[100].mxu0 }
 0x240   : > { %v8732_v33 = vpop.f32.mrb[101].mxu0 }
 0x241   : > { %v8733_v5 = vadd.f32 %v8732_v33, %v8731_v46  ;;  %v8734_v34 = vpop.f32.mrb[102].mxu0  ;;  %v8753_v56 = vpop.f32.mrb[88].mxu1 }
 0x242   : > { %v8735_v61 = vpop.f32.mrb[103].mxu0  ;;  %v8754_v63 = vpop.f32.mrb[89].mxu1 }
 0x243   : > { %v4649_v10 = vadd.f32 %v8733_v5, %v4467_v60  ;;  %v8755_v38 = vadd.f32 %v8754_v63, %v8753_v56  ;;  %v8756_v31 = vpop.f32.mrb[90].mxu1  ;;  %v8092_v5 = vld [vmem:[%s11603_s2 + $0x6] sm:$0x1] }
 0x244   : > { %v8757_v2 = vpop.f32.mrb[91].mxu1 }
 0x245   : > { %v4829_v55 = vadd.f32 %v8755_v38, %v4649_v10 }
 0x25f   : > { %v8775_v50 = vpop.f32.mrb[104].mxu0 }
 0x260   : > { %v8776_v52 = vpop.f32.mrb[105].mxu0 }
 0x261   : > { %v8777_v36 = vadd.f32 %v8776_v52, %v8775_v50  ;;  %v8778_v20 = vpop.f32.mrb[106].mxu0  ;;  %v8797_v57 = vpop.f32.mrb[92].mxu1 }
 0x262   : > { %v8779_v53 = vpop.f32.mrb[107].mxu0  ;;  %v8798_v43 = vpop.f32.mrb[93].mxu1 }
 0x263   : > { %v5009_v3 = vadd.f32 %v8777_v36, %v4829_v55  ;;  %v8799_v13 = vadd.f32 %v8798_v43, %v8797_v57  ;;  %v8800_v6 = vpop.f32.mrb[94].mxu1 }
 0x264   : > { %v8801_v58 = vpop.f32.mrb[95].mxu1 }
 0x265   : > { %v5189_v27 = vadd.f32 %v8799_v13, %v5009_v3 }
 0x27f   : > { %v8819_v17 = vpop.f32.mrb[108].mxu0 }
 0x280   : > { %v8820_v7 = vpop.f32.mrb[109].mxu0 }
 0x281   : > { %v8821_v54 = vadd.f32 %v8820_v7, %v8819_v17  ;;  %v8822_v23 = vpop.f32.mrb[110].mxu0  ;;  %v8841_v45 = vpop.f32.mrb[96].mxu1 }
 0x282   : > { %v8823_v25 = vpop.f32.mrb[111].mxu0  ;;  %v8842_v29 = vpop.f32.mrb[97].mxu1 }
 0x283   : > { %v5369_v22 = vadd.f32 %v8821_v54, %v5189_v27  ;;  %v8843_v24 = vadd.f32 %v8842_v29, %v8841_v45  ;;  %v8844_v0 = vpop.f32.mrb[98].mxu1 }
 0x284   : > { %v8845_v47 = vpop.f32.mrb[99].mxu1 }
 0x285   : > { %v5549_v49 = vadd.f32 %v8843_v24, %v5369_v22 }
 0x29f   : > { %v8863_v21 = vpop.f32.mrb[112].mxu0 }
 0x2a0   : > { %v8864_v1 = vpop.f32.mrb[113].mxu0 }
 0x2a1   : > { %v8865_v15 = vadd.f32 %v8864_v1, %v8863_v21  ;;  %v8866_v4 = vpop.f32.mrb[114].mxu0 }
 0x2a2   : > { %v8867_v19 = vpop.f32.mrb[115].mxu0 }
 0x2a3   : > { %v5729_v51 = vadd.f32 %v8865_v15, %v5549_v49 }
 0x2a5   : > { %v5738_v35 = vadd.f32 %v7906_v39, %v5729_v51 }
 0x2a6   : > { %v8885_v16 = vpop.f32.mrb[100].mxu1 }
 0x2a7   : > { %5740 = vst.msk [vmem:[%s11135_s28 + $0x50] sm:$0xf] %vm5739_vm2, %v5738_v35  ;;  %v8886_v8 = vpop.f32.mrb[101].mxu1 }
 0x2a8   : > { %v8887_v30 = vadd.f32 %v8886_v8, %v8885_v16  ;;  %v8888_v14 = vpop.f32.mrb[102].mxu1 }
 0x2a9   : > { %v8889_v32 = vpop.f32.mrb[103].mxu1 }
 0x2aa   : > { %v5915_v40 = vadd.f32 %v8887_v30, %v7939_v18 }
 0x2ac   : > { %5921 = vst.msk [vmem:[%s11135_s28 + $0x58] sm:$0x1] %vm5920_vm3, %v5915_v40 }
 0x2bf   : > { %v8907_v11 = vpop.f32.mrb[116].mxu0 }
 0x2c0   : > { %v8908_v59 = vpop.f32.mrb[117].mxu0 }
 0x2c1   : > { %v8909_v41 = vadd.f32 %v8908_v59, %v8907_v11  ;;  %v8910_v42 = vpop.f32.mrb[118].mxu0 }
 0x2c2   : > { %v8911_v12 = vpop.f32.mrb[119].mxu0 }
 0x2c3   : > { %v6096_v26 = vadd.f32 %v8909_v41, %v7990_v48 }
 0x2c5   : > { %6101 = vst.msk [vmem:[%s11135_s28 + $0x60] sm:$0x1] %vm5920_vm3, %v6096_v26 }
 0x2c6   : > { %v8929_v62 = vpop.f32.mrb[104].mxu1 }
 0x2c7   : > { %v8930_v28 = vpop.f32.mrb[105].mxu1 }
 0x2c8   : > { %v8931_v9 = vadd.f32 %v8930_v28, %v8929_v62  ;;  %v8932_v37 = vpop.f32.mrb[106].mxu1 }
 0x2c9   : > { %v8933_v60 = vpop.f32.mrb[107].mxu1 }
 0x2ca   : > { %v6276_v46 = vadd.f32 %v8931_v9, %v8041_v44 }
 0x2cc   : > { %6281 = vst.msk [vmem:[%s11135_s28 + $0x68] sm:$0x1] %vm5920_vm3, %v6276_v46 }
 0x2df   : > { %v8951_v33 = vpop.f32.mrb[120].mxu0 }
 0x2e0   : > { %v8952_v34 = vpop.f32.mrb[121].mxu0 }
 0x2e1   : > { %v8953_v56 = vadd.f32 %v8952_v34, %v8951_v33  ;;  %v8954_v61 = vpop.f32.mrb[122].mxu0 }
 0x2e2   : > { %v8955_v10 = vpop.f32.mrb[123].mxu0 }
 0x2e3   : > { %v6456_v63 = vadd.f32 %v8953_v56, %v8092_v5 }
 0x2e5   : > { %6461 = vst.msk [vmem:[%s11135_s28 + $0x70] sm:$0x1] %vm5920_vm3, %v6456_v63 }
 0x2e6 PF: > { %s13_s12 = sadd.s32 1, %s9575_s12  }
 0x2e7   : > { %p10_p4 = scmp.ge.s32.totalorder %s13_s12, 4  }
 0x2e9   :  { %12 = sbr.rel (!%p10_p4) target bundleno = 1 (0x1), region = 98 }

</bundles_post_ra>
